<compile_context>
chip_gen: v7x
topology: tpu7x:2x2x1
jax: 0.10.0
libtpu: 0.0.40
codegen_flags: <defaults>
</compile_context>

<pallas_src>
import functools
import math

import jax
import jax.numpy as jnp
from jax.experimental import pallas as pl
from jax.experimental.pallas import tpu as pltpu

# --------------------- model config (hidden=128 implied by Linear(128, 1)) ----------
VOCAB = 1000
MAX_POS = 64
TYPE_VOCAB = 2
HIDDEN = 128
N_LAYERS = 2
N_HEADS = 2
HEAD_DIM = HIDDEN // N_HEADS
INTERMEDIATE = 256
LN_EPS = 1e-12
B = 2
S = 8

_INV_SQRT2 = 0.7071067811865476
_ATTN_SCALE = 1.0 / math.sqrt(HEAD_DIM)


# --------------------------------- kernel helpers -----------------------------------
def _layernorm(x, g, b):
    mu = jnp.mean(x, axis=-1, keepdims=True)
    var = jnp.mean((x - mu) ** 2, axis=-1, keepdims=True)
    return (x - mu) * jax.lax.rsqrt(var + LN_EPS) * g + b


def _gelu_exact(x):
    # exact (erf) GELU, matching PyTorch BERT
    return 0.5 * x * (1.0 + jax.lax.erf(x * _INV_SQRT2))


# --------------------------------- the fused kernel ---------------------------------
def _bert_kernel(emb_ref, bias_ref,
                 emb_ln_g_ref, emb_ln_b_ref,
                 qkv_w_ref, qkv_b_ref, o_w_ref, o_b_ref,
                 i_w_ref, i_b_ref, f_w_ref, f_b_ref,
                 ln1_g_ref, ln1_b_ref, ln2_g_ref, ln2_b_ref,
                 pooler_w_ref, pooler_b_ref, cls_w_ref, cls_b_ref,
                 out_ref, *, batch, seq):
    bias = bias_ref[...]  # (B, S) additive attention-mask bias

    # ---- embedding LayerNorm (word+pos+type already summed in the wrapper) ----------
    h = _layernorm(emb_ref[...].astype(jnp.float32),
                   emb_ln_g_ref[...], emb_ln_b_ref[...])          # (B*S, H)

    # ---- encoder: N_LAYERS transformer layers, fully unrolled, VMEM-resident --------
    for l in range(N_LAYERS):
        # fused Q/K/V projection: (T, H) x (H, 3H)
        qkv = jnp.dot(h, qkv_w_ref[l],
                      preferred_element_type=jnp.float32) + qkv_b_ref[l]

        # self-attention; (batch, head) pairs unrolled, output assembled lane-dense
        ctx_rows = []
        for bi in range(batch):
            r0 = bi * seq
            bias_b = bias[bi:bi + 1, :]                            # (1, S)
            head_ctx = []
            for hd in range(N_HEADS):
                c0 = hd * HEAD_DIM
                q_bh = qkv[r0:r0 + seq, c0:c0 + HEAD_DIM]                          # (S, dh)
                k_bh = qkv[r0:r0 + seq, HIDDEN + c0:HIDDEN + c0 + HEAD_DIM]        # (S, dh)
                v_bh = qkv[r0:r0 + seq, 2 * HIDDEN + c0:2 * HIDDEN + c0 + HEAD_DIM]

                s = jnp.dot(q_bh, k_bh.T,
                            preferred_element_type=jnp.float32) * _ATTN_SCALE      # (S, S)
                s = s + bias_b
                m = jnp.max(s, axis=-1, keepdims=True)
                p = jnp.exp(s - m)
                p = p * pl.reciprocal(jnp.sum(p, axis=-1, keepdims=True), approx=True)
                head_ctx.append(jnp.dot(p, v_bh,
                                        preferred_element_type=jnp.float32))       # (S, dh)
            ctx_rows.append(jnp.concatenate(head_ctx, axis=-1))    # (S, H)
        ctx = jnp.concatenate(ctx_rows, axis=0)                    # (B*S, H), lane-dense

        attn_out = jnp.dot(ctx, o_w_ref[l],
                           preferred_element_type=jnp.float32) + o_b_ref[l]
        h = _layernorm(attn_out + h, ln1_g_ref[l], ln1_b_ref[l])

        ffn = _gelu_exact(jnp.dot(h, i_w_ref[l],
                                  preferred_element_type=jnp.float32) + i_b_ref[l])
        ffn = jnp.dot(ffn, f_w_ref[l],
                      preferred_element_type=jnp.float32) + f_b_ref[l]
        h = _layernorm(ffn + h, ln2_g_ref[l], ln2_b_ref[l])

    # ---- pooler: dense + tanh on the [CLS] token of each sequence --------------------
    cls = jnp.concatenate([h[bi * seq:bi * seq + 1, :] for bi in range(batch)], axis=0)
    pooled = jnp.tanh(jnp.dot(cls, pooler_w_ref[...],
                              preferred_element_type=jnp.float32) + pooler_b_ref[...])

    # ---- l2: Dropout(0.2) -> identity in eval/inference ------------------------------
    # TODO(synk): training-mode dropout would use pltpu.prng_seed / prng_random_bits.

    # ---- l3: Linear(128, 1) as a VPU/XLU reduction (avoids a 1-lane MXU output) ------
    logits = jnp.sum(pooled * cls_w_ref[...], axis=-1, keepdims=True) + cls_b_ref[...]
    out_ref[...] = logits.astype(out_ref.dtype)


# --------------------------------- host-side wrapper --------------------------------
def _full_spec(shape):
    nd = len(shape)
    return pl.BlockSpec(shape, lambda i, _nd=nd: (0,) * _nd)


def bert_class_forward(params, ids, mask, token_type_ids):
    batch, seq = ids.shape
    # embeddings: gather is glue in plain JAX; everything after is one fused kernel
    positions = jnp.arange(seq, dtype=jnp.int32)
    emb = (params["word_emb"][ids]
           + params["pos_emb"][positions][None, :, :]
           + params["type_emb"][token_type_ids]).reshape(batch * seq, HIDDEN)
    # extended attention mask: (1 - mask) * -10000, applied per key position
    mask_bias = (1.0 - mask.astype(jnp.float32)) * -10000.0       # (B, S)

    operands = (
        emb, mask_bias,
        params["emb_ln_g"], params["emb_ln_b"],
        params["qkv_w"], params["qkv_b"], params["o_w"], params["o_b"],
        params["i_w"], params["i_b"], params["f_w"], params["f_b"],
        params["ln1_g"], params["ln1_b"], params["ln2_g"], params["ln2_b"],
        params["pooler_w"], params["pooler_b"], params["cls_w"], params["cls_b"],
    )
    return pl.pallas_call(
        functools.partial(_bert_kernel, batch=batch, seq=seq),
        out_shape=jax.ShapeDtypeStruct((batch, 1), jnp.float32),
        grid=(1,),
        in_specs=[_full_spec(x.shape) for x in operands],
        out_specs=_full_spec((batch, 1)),
        compiler_params=pltpu.CompilerParams(dimension_semantics=("arbitrary",)),
    )(*operands)


# --------------------------- parameter init (deterministic) -------------------------
def _dense(key, din, dout):
    kw, kb = jax.random.split(key)
    return (jax.random.normal(kw, (din, dout), jnp.float32) * 0.02,
            jax.random.normal(kb, (dout,), jnp.float32) * 0.02)


def init_params(key):
    keys = jax.random.split(key, 8 + N_LAYERS)
    p = {
        "word_emb": jax.random.normal(keys[0], (VOCAB, HIDDEN), jnp.float32) * 0.02,
        "pos_emb": jax.random.normal(keys[1], (MAX_POS, HIDDEN), jnp.float32) * 0.02,
        "type_emb": jax.random.normal(keys[2], (TYPE_VOCAB, HIDDEN), jnp.float32) * 0.02,
        "emb_ln_g": jnp.ones((1, HIDDEN), jnp.float32),
        "emb_ln_b": jnp.zeros((1, HIDDEN), jnp.float32),
    }
    pw, pb = _dense(keys[3], HIDDEN, HIDDEN)
    p["pooler_w"], p["pooler_b"] = pw, pb.reshape(1, HIDDEN)
    cw, cb = _dense(keys[4], HIDDEN, 1)                     # torch.nn.Linear(128, 1)
    p["cls_w"], p["cls_b"] = cw.reshape(1, HIDDEN), cb.reshape(1, 1)

    qkv_w, qkv_b, o_w, o_b, i_w, i_b, f_w, f_b = ([] for _ in range(8))
    for l in range(N_LAYERS):
        lk = jax.random.split(keys[8 + l], 6)
        qw, qb = _dense(lk[0], HIDDEN, HIDDEN)
        kw_, kb_ = _dense(lk[1], HIDDEN, HIDDEN)
        vw, vb = _dense(lk[2], HIDDEN, HIDDEN)
        ow, ob = _dense(lk[3], HIDDEN, HIDDEN)
        iw, ib = _dense(lk[4], HIDDEN, INTERMEDIATE)
        fw, fb = _dense(lk[5], INTERMEDIATE, HIDDEN)
        qkv_w.append(jnp.concatenate([qw, kw_, vw], axis=1))                 # (H, 3H)
        qkv_b.append(jnp.concatenate([qb, kb_, vb], axis=0).reshape(1, 3 * HIDDEN))
        o_w.append(ow); o_b.append(ob.reshape(1, HIDDEN))
        i_w.append(iw); i_b.append(ib.reshape(1, INTERMEDIATE))
        f_w.append(fw); f_b.append(fb.reshape(1, HIDDEN))

    p["qkv_w"], p["qkv_b"] = jnp.stack(qkv_w), jnp.stack(qkv_b)
    p["o_w"], p["o_b"] = jnp.stack(o_w), jnp.stack(o_b)
    p["i_w"], p["i_b"] = jnp.stack(i_w), jnp.stack(i_b)
    p["f_w"], p["f_b"] = jnp.stack(f_w), jnp.stack(f_b)
    p["ln1_g"] = jnp.ones((N_LAYERS, 1, HIDDEN), jnp.float32)
    p["ln1_b"] = jnp.zeros((N_LAYERS, 1, HIDDEN), jnp.float32)
    p["ln2_g"] = jnp.ones((N_LAYERS, 1, HIDDEN), jnp.float32)
    p["ln2_b"] = jnp.zeros((N_LAYERS, 1, HIDDEN), jnp.float32)
    return p


# --------------------------------------- main ---------------------------------------
if __name__ == "__main__":
    params = init_params(jax.random.PRNGKey(0))

    ids = jax.random.randint(jax.random.PRNGKey(1), (B, S), 0, VOCAB, dtype=jnp.int32)
    mask = jnp.ones((B, S), jnp.int32).at[1, 6:].set(0)        # pad last tokens of row 1
    token_type_ids = jnp.zeros((B, S), jnp.int32).at[:, 4:].set(1)

    out = jax.jit(bert_class_forward)(params, ids, mask, token_type_ids)
    out = jax.block_until_ready(out)
    assert out.shape == (B, 1) and out.dtype == jnp.float32
    assert bool(jnp.all(jnp.isfinite(out)))
    print("KERNEL_OK")
</pallas_src>

<mosaic_0001>
module attributes {stable_mosaic.version = 11 : i64} {
  func.func @_bert_kernel(%arg0: i32, %arg1: memref<16x128xf32, #tpu.memory_space<vmem>>, %arg2: memref<2x8xf32, #tpu.memory_space<vmem>>, %arg3: memref<1x128xf32, #tpu.memory_space<vmem>>, %arg4: memref<1x128xf32, #tpu.memory_space<vmem>>, %arg5: memref<2x128x384xf32, #tpu.memory_space<vmem>>, %arg6: memref<2x1x384xf32, #tpu.memory_space<vmem>>, %arg7: memref<2x128x128xf32, #tpu.memory_space<vmem>>, %arg8: memref<2x1x128xf32, #tpu.memory_space<vmem>>, %arg9: memref<2x128x256xf32, #tpu.memory_space<vmem>>, %arg10: memref<2x1x256xf32, #tpu.memory_space<vmem>>, %arg11: memref<2x256x128xf32, #tpu.memory_space<vmem>>, %arg12: memref<2x1x128xf32, #tpu.memory_space<vmem>>, %arg13: memref<2x1x128xf32, #tpu.memory_space<vmem>>, %arg14: memref<2x1x128xf32, #tpu.memory_space<vmem>>, %arg15: memref<2x1x128xf32, #tpu.memory_space<vmem>>, %arg16: memref<2x1x128xf32, #tpu.memory_space<vmem>>, %arg17: memref<128x128xf32, #tpu.memory_space<vmem>>, %arg18: memref<1x128xf32, #tpu.memory_space<vmem>>, %arg19: memref<1x128xf32, #tpu.memory_space<vmem>>, %arg20: memref<1x1xf32, #tpu.memory_space<vmem>>, %arg21: memref<2x1xf32, #tpu.memory_space<vmem>>) attributes {dimension_semantics = [#tpu.dimension_semantics<arbitrary>], iteration_bounds = array<i64: 1>, scalar_prefetch = 0 : i64, scratch_operands = 0 : i64, tpu.core_type = #tpu.core_type<tc>, window_params = [{pipeline_mode = #tpu.pipeline_mode<synchronous>, transform_indices = @transform_0, window_bounds = array<i64: 16, 128>}, {pipeline_mode = #tpu.pipeline_mode<synchronous>, transform_indices = @transform_1, window_bounds = array<i64: 2, 8>}, {pipeline_mode = #tpu.pipeline_mode<synchronous>, transform_indices = @transform_2, window_bounds = array<i64: 1, 128>}, {pipeline_mode = #tpu.pipeline_mode<synchronous>, transform_indices = @transform_3, window_bounds = array<i64: 1, 128>}, {pipeline_mode = #tpu.pipeline_mode<synchronous>, transform_indices = @transform_4, window_bounds = array<i64: 2, 128, 384>}, {pipeline_mode = #tpu.pipeline_mode<synchronous>, transform_indices = @transform_5, window_bounds = array<i64: 2, 1, 384>}, {pipeline_mode = #tpu.pipeline_mode<synchronous>, transform_indices = @transform_6, window_bounds = array<i64: 2, 128, 128>}, {pipeline_mode = #tpu.pipeline_mode<synchronous>, transform_indices = @transform_7, window_bounds = array<i64: 2, 1, 128>}, {pipeline_mode = #tpu.pipeline_mode<synchronous>, transform_indices = @transform_8, window_bounds = array<i64: 2, 128, 256>}, {pipeline_mode = #tpu.pipeline_mode<synchronous>, transform_indices = @transform_9, window_bounds = array<i64: 2, 1, 256>}, {pipeline_mode = #tpu.pipeline_mode<synchronous>, transform_indices = @transform_10, window_bounds = array<i64: 2, 256, 128>}, {pipeline_mode = #tpu.pipeline_mode<synchronous>, transform_indices = @transform_11, window_bounds = array<i64: 2, 1, 128>}, {pipeline_mode = #tpu.pipeline_mode<synchronous>, transform_indices = @transform_12, window_bounds = array<i64: 2, 1, 128>}, {pipeline_mode = #tpu.pipeline_mode<synchronous>, transform_indices = @transform_13, window_bounds = array<i64: 2, 1, 128>}, {pipeline_mode = #tpu.pipeline_mode<synchronous>, transform_indices = @transform_14, window_bounds = array<i64: 2, 1, 128>}, {pipeline_mode = #tpu.pipeline_mode<synchronous>, transform_indices = @transform_15, window_bounds = array<i64: 2, 1, 128>}, {pipeline_mode = #tpu.pipeline_mode<synchronous>, transform_indices = @transform_16, window_bounds = array<i64: 128, 128>}, {pipeline_mode = #tpu.pipeline_mode<synchronous>, transform_indices = @transform_17, window_bounds = array<i64: 1, 128>}, {pipeline_mode = #tpu.pipeline_mode<synchronous>, transform_indices = @transform_18, window_bounds = array<i64: 1, 128>}, {pipeline_mode = #tpu.pipeline_mode<synchronous>, transform_indices = @transform_19, window_bounds = array<i64: 1, 1>}, {pipeline_mode = #tpu.pipeline_mode<synchronous>, transform_indices = @transform_20, window_bounds = array<i64: 2, 1>}]} {
    %c0 = arith.constant 0 : index
    %c0_0 = arith.constant 0 : index
    %0 = vector.load %arg2[%c0, %c0_0] : memref<2x8xf32, #tpu.memory_space<vmem>>, vector<2x8xf32>
    %c0_1 = arith.constant 0 : index
    %c0_2 = arith.constant 0 : index
    %1 = vector.load %arg1[%c0_1, %c0_2] : memref<16x128xf32, #tpu.memory_space<vmem>>, vector<16x128xf32>
    %c0_3 = arith.constant 0 : index
    %c0_4 = arith.constant 0 : index
    %2 = vector.load %arg3[%c0_3, %c0_4] : memref<1x128xf32, #tpu.memory_space<vmem>>, vector<1x128xf32>
    %c0_5 = arith.constant 0 : index
    %c0_6 = arith.constant 0 : index
    %3 = vector.load %arg4[%c0_5, %c0_6] : memref<1x128xf32, #tpu.memory_space<vmem>>, vector<1x128xf32>
    %cst = arith.constant dense<0.000000e+00> : vector<16xf32>
    %4 = vector.multi_reduction <add>, %1, %cst [1] : vector<16x128xf32> to vector<16xf32>
    %5 = vector.shape_cast %4 : vector<16xf32> to vector<16x1xf32>
    %cst_7 = arith.constant 1.280000e+02 : f32
    %6 = vector.broadcast %cst_7 : f32 to vector<16x1xf32>
    %7 = arith.divf %5, %6 : vector<16x1xf32>
    %8 = vector.broadcast %7 : vector<16x1xf32> to vector<16x128xf32>
    %9 = arith.subf %1, %8 : vector<16x128xf32>
    %10 = arith.mulf %9, %9 : vector<16x128xf32>
    %cst_8 = arith.constant dense<0.000000e+00> : vector<16xf32>
    %11 = vector.multi_reduction <add>, %10, %cst_8 [1] : vector<16x128xf32> to vector<16xf32>
    %12 = vector.shape_cast %11 : vector<16xf32> to vector<16x1xf32>
    %cst_9 = arith.constant 1.280000e+02 : f32
    %13 = vector.broadcast %cst_9 : f32 to vector<16x1xf32>
    %14 = arith.divf %12, %13 : vector<16x1xf32>
    %15 = vector.broadcast %7 : vector<16x1xf32> to vector<16x128xf32>
    %16 = arith.subf %1, %15 : vector<16x128xf32>
    %cst_10 = arith.constant 9.99999996E-13 : f32
    %17 = vector.broadcast %cst_10 : f32 to vector<16x1xf32>
    %18 = arith.addf %14, %17 : vector<16x1xf32>
    %19 = math.rsqrt %18 : vector<16x1xf32>
    %20 = vector.broadcast %19 : vector<16x1xf32> to vector<16x128xf32>
    %21 = arith.mulf %16, %20 : vector<16x128xf32>
    %22 = vector.broadcast %2 : vector<1x128xf32> to vector<16x128xf32>
    %23 = arith.mulf %21, %22 : vector<16x128xf32>
    %24 = vector.broadcast %3 : vector<1x128xf32> to vector<16x128xf32>
    %25 = arith.addf %23, %24 : vector<16x128xf32>
    %c0_11 = arith.constant 0 : index
    %c0_12 = arith.constant 0 : index
    %c0_13 = arith.constant 0 : index
    %26 = vector.load %arg5[%c0_11, %c0_12, %c0_13] : memref<2x128x384xf32, #tpu.memory_space<vmem>>, vector<1x128x384xf32>
    %27 = vector.shape_cast %26 : vector<1x128x384xf32> to vector<128x384xf32>
    %cst_14 = arith.constant dense<0.000000e+00> : vector<16x384xf32>
    %28 = tpu.matmul %25, %27, %cst_14 {dimension_numbers = #tpu.dot_dimension_numbers<[1], [0], [0], [1], [0, 0, 1, 1], [], []>} : vector<16x128xf32>, vector<128x384xf32>, vector<16x384xf32> -> vector<16x384xf32>
    %c0_15 = arith.constant 0 : index
    %c0_16 = arith.constant 0 : index
    %c0_17 = arith.constant 0 : index
    %29 = vector.load %arg6[%c0_15, %c0_16, %c0_17] : memref<2x1x384xf32, #tpu.memory_space<vmem>>, vector<1x1x384xf32>
    %30 = vector.shape_cast %29 : vector<1x1x384xf32> to vector<1x384xf32>
    %31 = vector.broadcast %30 : vector<1x384xf32> to vector<16x384xf32>
    %32 = arith.addf %28, %31 : vector<16x384xf32>
    %33 = vector.extract_strided_slice %0 {offsets = [0, 0], sizes = [1, 8], strides = [1, 1]} : vector<2x8xf32> to vector<1x8xf32>
    %34 = vector.extract_strided_slice %32 {offsets = [0, 0], sizes = [8, 64], strides = [1, 1]} : vector<16x384xf32> to vector<8x64xf32>
    %35 = vector.extract_strided_slice %32 {offsets = [0, 128], sizes = [8, 64], strides = [1, 1]} : vector<16x384xf32> to vector<8x64xf32>
    %36 = vector.extract_strided_slice %32 {offsets = [0, 256], sizes = [8, 64], strides = [1, 1]} : vector<16x384xf32> to vector<8x64xf32>
    %37 = tpu.transpose %35, [1, 0] : vector<8x64xf32> -> vector<64x8xf32>
    %cst_18 = arith.constant dense<0.000000e+00> : vector<8x8xf32>
    %38 = tpu.matmul %34, %37, %cst_18 {dimension_numbers = #tpu.dot_dimension_numbers<[1], [0], [0], [1], [0, 0, 1, 1], [], []>} : vector<8x64xf32>, vector<64x8xf32>, vector<8x8xf32> -> vector<8x8xf32>
    %cst_19 = arith.constant 1.250000e-01 : f32
    %39 = vector.broadcast %cst_19 : f32 to vector<8x8xf32>
    %40 = arith.mulf %38, %39 : vector<8x8xf32>
    %41 = vector.broadcast %33 : vector<1x8xf32> to vector<8x8xf32>
    %42 = arith.addf %40, %41 : vector<8x8xf32>
    %cst_20 = arith.constant dense<0xFF800000> : vector<8xf32>
    %43 = vector.multi_reduction <maximumf>, %42, %cst_20 [1] : vector<8x8xf32> to vector<8xf32>
    %44 = vector.shape_cast %43 : vector<8xf32> to vector<8x1xf32>
    %45 = vector.broadcast %44 : vector<8x1xf32> to vector<8x8xf32>
    %46 = arith.subf %42, %45 : vector<8x8xf32>
    %47 = math.exp %46 : vector<8x8xf32>
    %cst_21 = arith.constant dense<0.000000e+00> : vector<8xf32>
    %48 = vector.multi_reduction <add>, %47, %cst_21 [1] : vector<8x8xf32> to vector<8xf32>
    %49 = vector.shape_cast %48 : vector<8xf32> to vector<8x1xf32>
    %50 = tpu.reciprocal %49 {approx = true} : vector<8x1xf32> -> vector<8x1xf32>
    %51 = vector.broadcast %50 : vector<8x1xf32> to vector<8x8xf32>
    %52 = arith.mulf %47, %51 : vector<8x8xf32>
    %cst_22 = arith.constant dense<0.000000e+00> : vector<8x64xf32>
    %53 = tpu.matmul %52, %36, %cst_22 {dimension_numbers = #tpu.dot_dimension_numbers<[1], [0], [0], [1], [0, 0, 1, 1], [], []>} : vector<8x8xf32>, vector<8x64xf32>, vector<8x64xf32> -> vector<8x64xf32>
    %54 = vector.extract_strided_slice %32 {offsets = [0, 64], sizes = [8, 64], strides = [1, 1]} : vector<16x384xf32> to vector<8x64xf32>
    %55 = vector.extract_strided_slice %32 {offsets = [0, 192], sizes = [8, 64], strides = [1, 1]} : vector<16x384xf32> to vector<8x64xf32>
    %56 = vector.extract_strided_slice %32 {offsets = [0, 320], sizes = [8, 64], strides = [1, 1]} : vector<16x384xf32> to vector<8x64xf32>
    %57 = tpu.transpose %55, [1, 0] : vector<8x64xf32> -> vector<64x8xf32>
    %cst_23 = arith.constant dense<0.000000e+00> : vector<8x8xf32>
    %58 = tpu.matmul %54, %57, %cst_23 {dimension_numbers = #tpu.dot_dimension_numbers<[1], [0], [0], [1], [0, 0, 1, 1], [], []>} : vector<8x64xf32>, vector<64x8xf32>, vector<8x8xf32> -> vector<8x8xf32>
    %cst_24 = arith.constant 1.250000e-01 : f32
    %59 = vector.broadcast %cst_24 : f32 to vector<8x8xf32>
    %60 = arith.mulf %58, %59 : vector<8x8xf32>
    %61 = vector.broadcast %33 : vector<1x8xf32> to vector<8x8xf32>
    %62 = arith.addf %60, %61 : vector<8x8xf32>
    %cst_25 = arith.constant dense<0xFF800000> : vector<8xf32>
    %63 = vector.multi_reduction <maximumf>, %62, %cst_25 [1] : vector<8x8xf32> to vector<8xf32>
    %64 = vector.shape_cast %63 : vector<8xf32> to vector<8x1xf32>
    %65 = vector.broadcast %64 : vector<8x1xf32> to vector<8x8xf32>
    %66 = arith.subf %62, %65 : vector<8x8xf32>
    %67 = math.exp %66 : vector<8x8xf32>
    %cst_26 = arith.constant dense<0.000000e+00> : vector<8xf32>
    %68 = vector.multi_reduction <add>, %67, %cst_26 [1] : vector<8x8xf32> to vector<8xf32>
    %69 = vector.shape_cast %68 : vector<8xf32> to vector<8x1xf32>
    %70 = tpu.reciprocal %69 {approx = true} : vector<8x1xf32> -> vector<8x1xf32>
    %71 = vector.broadcast %70 : vector<8x1xf32> to vector<8x8xf32>
    %72 = arith.mulf %67, %71 : vector<8x8xf32>
    %cst_27 = arith.constant dense<0.000000e+00> : vector<8x64xf32>
    %73 = tpu.matmul %72, %56, %cst_27 {dimension_numbers = #tpu.dot_dimension_numbers<[1], [0], [0], [1], [0, 0, 1, 1], [], []>} : vector<8x8xf32>, vector<8x64xf32>, vector<8x64xf32> -> vector<8x64xf32>
    %74 = tpu.concatenate %53, %73 in 1 : vector<8x64xf32>, vector<8x64xf32> -> vector<8x128xf32>
    %75 = vector.extract_strided_slice %0 {offsets = [1, 0], sizes = [1, 8], strides = [1, 1]} : vector<2x8xf32> to vector<1x8xf32>
    %76 = vector.extract_strided_slice %32 {offsets = [8, 0], sizes = [8, 64], strides = [1, 1]} : vector<16x384xf32> to vector<8x64xf32>
    %77 = vector.extract_strided_slice %32 {offsets = [8, 128], sizes = [8, 64], strides = [1, 1]} : vector<16x384xf32> to vector<8x64xf32>
    %78 = vector.extract_strided_slice %32 {offsets = [8, 256], sizes = [8, 64], strides = [1, 1]} : vector<16x384xf32> to vector<8x64xf32>
    %79 = tpu.transpose %77, [1, 0] : vector<8x64xf32> -> vector<64x8xf32>
    %cst_28 = arith.constant dense<0.000000e+00> : vector<8x8xf32>
    %80 = tpu.matmul %76, %79, %cst_28 {dimension_numbers = #tpu.dot_dimension_numbers<[1], [0], [0], [1], [0, 0, 1, 1], [], []>} : vector<8x64xf32>, vector<64x8xf32>, vector<8x8xf32> -> vector<8x8xf32>
    %cst_29 = arith.constant 1.250000e-01 : f32
    %81 = vector.broadcast %cst_29 : f32 to vector<8x8xf32>
    %82 = arith.mulf %80, %81 : vector<8x8xf32>
    %83 = vector.broadcast %75 : vector<1x8xf32> to vector<8x8xf32>
    %84 = arith.addf %82, %83 : vector<8x8xf32>
    %cst_30 = arith.constant dense<0xFF800000> : vector<8xf32>
    %85 = vector.multi_reduction <maximumf>, %84, %cst_30 [1] : vector<8x8xf32> to vector<8xf32>
    %86 = vector.shape_cast %85 : vector<8xf32> to vector<8x1xf32>
    %87 = vector.broadcast %86 : vector<8x1xf32> to vector<8x8xf32>
    %88 = arith.subf %84, %87 : vector<8x8xf32>
    %89 = math.exp %88 : vector<8x8xf32>
    %cst_31 = arith.constant dense<0.000000e+00> : vector<8xf32>
    %90 = vector.multi_reduction <add>, %89, %cst_31 [1] : vector<8x8xf32> to vector<8xf32>
    %91 = vector.shape_cast %90 : vector<8xf32> to vector<8x1xf32>
    %92 = tpu.reciprocal %91 {approx = true} : vector<8x1xf32> -> vector<8x1xf32>
    %93 = vector.broadcast %92 : vector<8x1xf32> to vector<8x8xf32>
    %94 = arith.mulf %89, %93 : vector<8x8xf32>
    %cst_32 = arith.constant dense<0.000000e+00> : vector<8x64xf32>
    %95 = tpu.matmul %94, %78, %cst_32 {dimension_numbers = #tpu.dot_dimension_numbers<[1], [0], [0], [1], [0, 0, 1, 1], [], []>} : vector<8x8xf32>, vector<8x64xf32>, vector<8x64xf32> -> vector<8x64xf32>
    %96 = vector.extract_strided_slice %32 {offsets = [8, 64], sizes = [8, 64], strides = [1, 1]} : vector<16x384xf32> to vector<8x64xf32>
    %97 = vector.extract_strided_slice %32 {offsets = [8, 192], sizes = [8, 64], strides = [1, 1]} : vector<16x384xf32> to vector<8x64xf32>
    %98 = vector.extract_strided_slice %32 {offsets = [8, 320], sizes = [8, 64], strides = [1, 1]} : vector<16x384xf32> to vector<8x64xf32>
    %99 = tpu.transpose %97, [1, 0] : vector<8x64xf32> -> vector<64x8xf32>
    %cst_33 = arith.constant dense<0.000000e+00> : vector<8x8xf32>
    %100 = tpu.matmul %96, %99, %cst_33 {dimension_numbers = #tpu.dot_dimension_numbers<[1], [0], [0], [1], [0, 0, 1, 1], [], []>} : vector<8x64xf32>, vector<64x8xf32>, vector<8x8xf32> -> vector<8x8xf32>
    %cst_34 = arith.constant 1.250000e-01 : f32
    %101 = vector.broadcast %cst_34 : f32 to vector<8x8xf32>
    %102 = arith.mulf %100, %101 : vector<8x8xf32>
    %103 = vector.broadcast %75 : vector<1x8xf32> to vector<8x8xf32>
    %104 = arith.addf %102, %103 : vector<8x8xf32>
    %cst_35 = arith.constant dense<0xFF800000> : vector<8xf32>
    %105 = vector.multi_reduction <maximumf>, %104, %cst_35 [1] : vector<8x8xf32> to vector<8xf32>
    %106 = vector.shape_cast %105 : vector<8xf32> to vector<8x1xf32>
    %107 = vector.broadcast %106 : vector<8x1xf32> to vector<8x8xf32>
    %108 = arith.subf %104, %107 : vector<8x8xf32>
    %109 = math.exp %108 : vector<8x8xf32>
    %cst_36 = arith.constant dense<0.000000e+00> : vector<8xf32>
    %110 = vector.multi_reduction <add>, %109, %cst_36 [1] : vector<8x8xf32> to vector<8xf32>
    %111 = vector.shape_cast %110 : vector<8xf32> to vector<8x1xf32>
    %112 = tpu.reciprocal %111 {approx = true} : vector<8x1xf32> -> vector<8x1xf32>
    %113 = vector.broadcast %112 : vector<8x1xf32> to vector<8x8xf32>
    %114 = arith.mulf %109, %113 : vector<8x8xf32>
    %cst_37 = arith.constant dense<0.000000e+00> : vector<8x64xf32>
    %115 = tpu.matmul %114, %98, %cst_37 {dimension_numbers = #tpu.dot_dimension_numbers<[1], [0], [0], [1], [0, 0, 1, 1], [], []>} : vector<8x8xf32>, vector<8x64xf32>, vector<8x64xf32> -> vector<8x64xf32>
    %116 = tpu.concatenate %95, %115 in 1 : vector<8x64xf32>, vector<8x64xf32> -> vector<8x128xf32>
    %117 = tpu.concatenate %74, %116 in 0 : vector<8x128xf32>, vector<8x128xf32> -> vector<16x128xf32>
    %c0_38 = arith.constant 0 : index
    %c0_39 = arith.constant 0 : index
    %c0_40 = arith.constant 0 : index
    %118 = vector.load %arg7[%c0_38, %c0_39, %c0_40] : memref<2x128x128xf32, #tpu.memory_space<vmem>>, vector<1x128x128xf32>
    %119 = vector.shape_cast %118 : vector<1x128x128xf32> to vector<128x128xf32>
    %cst_41 = arith.constant dense<0.000000e+00> : vector<16x128xf32>
    %120 = tpu.matmul %117, %119, %cst_41 {dimension_numbers = #tpu.dot_dimension_numbers<[1], [0], [0], [1], [0, 0, 1, 1], [], []>} : vector<16x128xf32>, vector<128x128xf32>, vector<16x128xf32> -> vector<16x128xf32>
    %c0_42 = arith.constant 0 : index
    %c0_43 = arith.constant 0 : index
    %c0_44 = arith.constant 0 : index
    %121 = vector.load %arg8[%c0_42, %c0_43, %c0_44] : memref<2x1x128xf32, #tpu.memory_space<vmem>>, vector<1x1x128xf32>
    %122 = vector.shape_cast %121 : vector<1x1x128xf32> to vector<1x128xf32>
    %123 = vector.broadcast %122 : vector<1x128xf32> to vector<16x128xf32>
    %124 = arith.addf %120, %123 : vector<16x128xf32>
    %125 = arith.addf %124, %25 : vector<16x128xf32>
    %c0_45 = arith.constant 0 : index
    %c0_46 = arith.constant 0 : index
    %c0_47 = arith.constant 0 : index
    %126 = vector.load %arg13[%c0_45, %c0_46, %c0_47] : memref<2x1x128xf32, #tpu.memory_space<vmem>>, vector<1x1x128xf32>
    %127 = vector.shape_cast %126 : vector<1x1x128xf32> to vector<1x128xf32>
    %c0_48 = arith.constant 0 : index
    %c0_49 = arith.constant 0 : index
    %c0_50 = arith.constant 0 : index
    %128 = vector.load %arg14[%c0_48, %c0_49, %c0_50] : memref<2x1x128xf32, #tpu.memory_space<vmem>>, vector<1x1x128xf32>
    %129 = vector.shape_cast %128 : vector<1x1x128xf32> to vector<1x128xf32>
    %cst_51 = arith.constant dense<0.000000e+00> : vector<16xf32>
    %130 = vector.multi_reduction <add>, %125, %cst_51 [1] : vector<16x128xf32> to vector<16xf32>
    %131 = vector.shape_cast %130 : vector<16xf32> to vector<16x1xf32>
    %cst_52 = arith.constant 1.280000e+02 : f32
    %132 = vector.broadcast %cst_52 : f32 to vector<16x1xf32>
    %133 = arith.divf %131, %132 : vector<16x1xf32>
    %134 = vector.broadcast %133 : vector<16x1xf32> to vector<16x128xf32>
    %135 = arith.subf %125, %134 : vector<16x128xf32>
    %136 = arith.mulf %135, %135 : vector<16x128xf32>
    %cst_53 = arith.constant dense<0.000000e+00> : vector<16xf32>
    %137 = vector.multi_reduction <add>, %136, %cst_53 [1] : vector<16x128xf32> to vector<16xf32>
    %138 = vector.shape_cast %137 : vector<16xf32> to vector<16x1xf32>
    %cst_54 = arith.constant 1.280000e+02 : f32
    %139 = vector.broadcast %cst_54 : f32 to vector<16x1xf32>
    %140 = arith.divf %138, %139 : vector<16x1xf32>
    %141 = vector.broadcast %133 : vector<16x1xf32> to vector<16x128xf32>
    %142 = arith.subf %125, %141 : vector<16x128xf32>
    %cst_55 = arith.constant 9.99999996E-13 : f32
    %143 = vector.broadcast %cst_55 : f32 to vector<16x1xf32>
    %144 = arith.addf %140, %143 : vector<16x1xf32>
    %145 = math.rsqrt %144 : vector<16x1xf32>
    %146 = vector.broadcast %145 : vector<16x1xf32> to vector<16x128xf32>
    %147 = arith.mulf %142, %146 : vector<16x128xf32>
    %148 = vector.broadcast %127 : vector<1x128xf32> to vector<16x128xf32>
    %149 = arith.mulf %147, %148 : vector<16x128xf32>
    %150 = vector.broadcast %129 : vector<1x128xf32> to vector<16x128xf32>
    %151 = arith.addf %149, %150 : vector<16x128xf32>
    %c0_56 = arith.constant 0 : index
    %c0_57 = arith.constant 0 : index
    %c0_58 = arith.constant 0 : index
    %152 = vector.load %arg9[%c0_56, %c0_57, %c0_58] : memref<2x128x256xf32, #tpu.memory_space<vmem>>, vector<1x128x256xf32>
    %153 = vector.shape_cast %152 : vector<1x128x256xf32> to vector<128x256xf32>
    %cst_59 = arith.constant dense<0.000000e+00> : vector<16x256xf32>
    %154 = tpu.matmul %151, %153, %cst_59 {dimension_numbers = #tpu.dot_dimension_numbers<[1], [0], [0], [1], [0, 0, 1, 1], [], []>} : vector<16x128xf32>, vector<128x256xf32>, vector<16x256xf32> -> vector<16x256xf32>
    %c0_60 = arith.constant 0 : index
    %c0_61 = arith.constant 0 : index
    %c0_62 = arith.constant 0 : index
    %155 = vector.load %arg10[%c0_60, %c0_61, %c0_62] : memref<2x1x256xf32, #tpu.memory_space<vmem>>, vector<1x1x256xf32>
    %156 = vector.shape_cast %155 : vector<1x1x256xf32> to vector<1x256xf32>
    %157 = vector.broadcast %156 : vector<1x256xf32> to vector<16x256xf32>
    %158 = arith.addf %154, %157 : vector<16x256xf32>
    %cst_63 = arith.constant 5.000000e-01 : f32
    %159 = vector.broadcast %cst_63 : f32 to vector<16x256xf32>
    %160 = arith.mulf %159, %158 : vector<16x256xf32>
    %cst_64 = arith.constant 0.707106769 : f32
    %161 = vector.broadcast %cst_64 : f32 to vector<16x256xf32>
    %162 = arith.mulf %158, %161 : vector<16x256xf32>
    %163 = math.erf %162 : vector<16x256xf32>
    %cst_65 = arith.constant 1.000000e+00 : f32
    %164 = vector.broadcast %cst_65 : f32 to vector<16x256xf32>
    %165 = arith.addf %164, %163 : vector<16x256xf32>
    %166 = arith.mulf %160, %165 : vector<16x256xf32>
    %c0_66 = arith.constant 0 : index
    %c0_67 = arith.constant 0 : index
    %c0_68 = arith.constant 0 : index
    %167 = vector.load %arg11[%c0_66, %c0_67, %c0_68] : memref<2x256x128xf32, #tpu.memory_space<vmem>>, vector<1x256x128xf32>
    %168 = vector.shape_cast %167 : vector<1x256x128xf32> to vector<256x128xf32>
    %cst_69 = arith.constant dense<0.000000e+00> : vector<16x128xf32>
    %169 = tpu.matmul %166, %168, %cst_69 {dimension_numbers = #tpu.dot_dimension_numbers<[1], [0], [0], [1], [0, 0, 1, 1], [], []>} : vector<16x256xf32>, vector<256x128xf32>, vector<16x128xf32> -> vector<16x128xf32>
    %c0_70 = arith.constant 0 : index
    %c0_71 = arith.constant 0 : index
    %c0_72 = arith.constant 0 : index
    %170 = vector.load %arg12[%c0_70, %c0_71, %c0_72] : memref<2x1x128xf32, #tpu.memory_space<vmem>>, vector<1x1x128xf32>
    %171 = vector.shape_cast %170 : vector<1x1x128xf32> to vector<1x128xf32>
    %172 = vector.broadcast %171 : vector<1x128xf32> to vector<16x128xf32>
    %173 = arith.addf %169, %172 : vector<16x128xf32>
    %174 = arith.addf %173, %151 : vector<16x128xf32>
    %c0_73 = arith.constant 0 : index
    %c0_74 = arith.constant 0 : index
    %c0_75 = arith.constant 0 : index
    %175 = vector.load %arg15[%c0_73, %c0_74, %c0_75] : memref<2x1x128xf32, #tpu.memory_space<vmem>>, vector<1x1x128xf32>
    %176 = vector.shape_cast %175 : vector<1x1x128xf32> to vector<1x128xf32>
    %c0_76 = arith.constant 0 : index
    %c0_77 = arith.constant 0 : index
    %c0_78 = arith.constant 0 : index
    %177 = vector.load %arg16[%c0_76, %c0_77, %c0_78] : memref<2x1x128xf32, #tpu.memory_space<vmem>>, vector<1x1x128xf32>
    %178 = vector.shape_cast %177 : vector<1x1x128xf32> to vector<1x128xf32>
    %cst_79 = arith.constant dense<0.000000e+00> : vector<16xf32>
    %179 = vector.multi_reduction <add>, %174, %cst_79 [1] : vector<16x128xf32> to vector<16xf32>
    %180 = vector.shape_cast %179 : vector<16xf32> to vector<16x1xf32>
    %cst_80 = arith.constant 1.280000e+02 : f32
    %181 = vector.broadcast %cst_80 : f32 to vector<16x1xf32>
    %182 = arith.divf %180, %181 : vector<16x1xf32>
    %183 = vector.broadcast %182 : vector<16x1xf32> to vector<16x128xf32>
    %184 = arith.subf %174, %183 : vector<16x128xf32>
    %185 = arith.mulf %184, %184 : vector<16x128xf32>
    %cst_81 = arith.constant dense<0.000000e+00> : vector<16xf32>
    %186 = vector.multi_reduction <add>, %185, %cst_81 [1] : vector<16x128xf32> to vector<16xf32>
    %187 = vector.shape_cast %186 : vector<16xf32> to vector<16x1xf32>
    %cst_82 = arith.constant 1.280000e+02 : f32
    %188 = vector.broadcast %cst_82 : f32 to vector<16x1xf32>
    %189 = arith.divf %187, %188 : vector<16x1xf32>
    %190 = vector.broadcast %182 : vector<16x1xf32> to vector<16x128xf32>
    %191 = arith.subf %174, %190 : vector<16x128xf32>
    %cst_83 = arith.constant 9.99999996E-13 : f32
    %192 = vector.broadcast %cst_83 : f32 to vector<16x1xf32>
    %193 = arith.addf %189, %192 : vector<16x1xf32>
    %194 = math.rsqrt %193 : vector<16x1xf32>
    %195 = vector.broadcast %194 : vector<16x1xf32> to vector<16x128xf32>
    %196 = arith.mulf %191, %195 : vector<16x128xf32>
    %197 = vector.broadcast %176 : vector<1x128xf32> to vector<16x128xf32>
    %198 = arith.mulf %196, %197 : vector<16x128xf32>
    %199 = vector.broadcast %178 : vector<1x128xf32> to vector<16x128xf32>
    %200 = arith.addf %198, %199 : vector<16x128xf32>
    %c1 = arith.constant 1 : index
    %c0_84 = arith.constant 0 : index
    %c0_85 = arith.constant 0 : index
    %201 = vector.load %arg5[%c1, %c0_84, %c0_85] : memref<2x128x384xf32, #tpu.memory_space<vmem>>, vector<1x128x384xf32>
    %202 = vector.shape_cast %201 : vector<1x128x384xf32> to vector<128x384xf32>
    %cst_86 = arith.constant dense<0.000000e+00> : vector<16x384xf32>
    %203 = tpu.matmul %200, %202, %cst_86 {dimension_numbers = #tpu.dot_dimension_numbers<[1], [0], [0], [1], [0, 0, 1, 1], [], []>} : vector<16x128xf32>, vector<128x384xf32>, vector<16x384xf32> -> vector<16x384xf32>
    %c1_87 = arith.constant 1 : index
    %c0_88 = arith.constant 0 : index
    %c0_89 = arith.constant 0 : index
    %204 = vector.load %arg6[%c1_87, %c0_88, %c0_89] : memref<2x1x384xf32, #tpu.memory_space<vmem>>, vector<1x1x384xf32>
    %205 = vector.shape_cast %204 : vector<1x1x384xf32> to vector<1x384xf32>
    %206 = vector.broadcast %205 : vector<1x384xf32> to vector<16x384xf32>
    %207 = arith.addf %203, %206 : vector<16x384xf32>
    %208 = vector.extract_strided_slice %0 {offsets = [0, 0], sizes = [1, 8], strides = [1, 1]} : vector<2x8xf32> to vector<1x8xf32>
    %209 = vector.extract_strided_slice %207 {offsets = [0, 0], sizes = [8, 64], strides = [1, 1]} : vector<16x384xf32> to vector<8x64xf32>
    %210 = vector.extract_strided_slice %207 {offsets = [0, 128], sizes = [8, 64], strides = [1, 1]} : vector<16x384xf32> to vector<8x64xf32>
    %211 = vector.extract_strided_slice %207 {offsets = [0, 256], sizes = [8, 64], strides = [1, 1]} : vector<16x384xf32> to vector<8x64xf32>
    %212 = tpu.transpose %210, [1, 0] : vector<8x64xf32> -> vector<64x8xf32>
    %cst_90 = arith.constant dense<0.000000e+00> : vector<8x8xf32>
    %213 = tpu.matmul %209, %212, %cst_90 {dimension_numbers = #tpu.dot_dimension_numbers<[1], [0], [0], [1], [0, 0, 1, 1], [], []>} : vector<8x64xf32>, vector<64x8xf32>, vector<8x8xf32> -> vector<8x8xf32>
    %cst_91 = arith.constant 1.250000e-01 : f32
    %214 = vector.broadcast %cst_91 : f32 to vector<8x8xf32>
    %215 = arith.mulf %213, %214 : vector<8x8xf32>
    %216 = vector.broadcast %208 : vector<1x8xf32> to vector<8x8xf32>
    %217 = arith.addf %215, %216 : vector<8x8xf32>
    %cst_92 = arith.constant dense<0xFF800000> : vector<8xf32>
    %218 = vector.multi_reduction <maximumf>, %217, %cst_92 [1] : vector<8x8xf32> to vector<8xf32>
    %219 = vector.shape_cast %218 : vector<8xf32> to vector<8x1xf32>
    %220 = vector.broadcast %219 : vector<8x1xf32> to vector<8x8xf32>
    %221 = arith.subf %217, %220 : vector<8x8xf32>
    %222 = math.exp %221 : vector<8x8xf32>
    %cst_93 = arith.constant dense<0.000000e+00> : vector<8xf32>
    %223 = vector.multi_reduction <add>, %222, %cst_93 [1] : vector<8x8xf32> to vector<8xf32>
    %224 = vector.shape_cast %223 : vector<8xf32> to vector<8x1xf32>
    %225 = tpu.reciprocal %224 {approx = true} : vector<8x1xf32> -> vector<8x1xf32>
    %226 = vector.broadcast %225 : vector<8x1xf32> to vector<8x8xf32>
    %227 = arith.mulf %222, %226 : vector<8x8xf32>
    %cst_94 = arith.constant dense<0.000000e+00> : vector<8x64xf32>
    %228 = tpu.matmul %227, %211, %cst_94 {dimension_numbers = #tpu.dot_dimension_numbers<[1], [0], [0], [1], [0, 0, 1, 1], [], []>} : vector<8x8xf32>, vector<8x64xf32>, vector<8x64xf32> -> vector<8x64xf32>
    %229 = vector.extract_strided_slice %207 {offsets = [0, 64], sizes = [8, 64], strides = [1, 1]} : vector<16x384xf32> to vector<8x64xf32>
    %230 = vector.extract_strided_slice %207 {offsets = [0, 192], sizes = [8, 64], strides = [1, 1]} : vector<16x384xf32> to vector<8x64xf32>
    %231 = vector.extract_strided_slice %207 {offsets = [0, 320], sizes = [8, 64], strides = [1, 1]} : vector<16x384xf32> to vector<8x64xf32>
    %232 = tpu.transpose %230, [1, 0] : vector<8x64xf32> -> vector<64x8xf32>
    %cst_95 = arith.constant dense<0.000000e+00> : vector<8x8xf32>
    %233 = tpu.matmul %229, %232, %cst_95 {dimension_numbers = #tpu.dot_dimension_numbers<[1], [0], [0], [1], [0, 0, 1, 1], [], []>} : vector<8x64xf32>, vector<64x8xf32>, vector<8x8xf32> -> vector<8x8xf32>
    %cst_96 = arith.constant 1.250000e-01 : f32
    %234 = vector.broadcast %cst_96 : f32 to vector<8x8xf32>
    %235 = arith.mulf %233, %234 : vector<8x8xf32>
    %236 = vector.broadcast %208 : vector<1x8xf32> to vector<8x8xf32>
    %237 = arith.addf %235, %236 : vector<8x8xf32>
    %cst_97 = arith.constant dense<0xFF800000> : vector<8xf32>
    %238 = vector.multi_reduction <maximumf>, %237, %cst_97 [1] : vector<8x8xf32> to vector<8xf32>
    %239 = vector.shape_cast %238 : vector<8xf32> to vector<8x1xf32>
    %240 = vector.broadcast %239 : vector<8x1xf32> to vector<8x8xf32>
    %241 = arith.subf %237, %240 : vector<8x8xf32>
    %242 = math.exp %241 : vector<8x8xf32>
    %cst_98 = arith.constant dense<0.000000e+00> : vector<8xf32>
    %243 = vector.multi_reduction <add>, %242, %cst_98 [1] : vector<8x8xf32> to vector<8xf32>
    %244 = vector.shape_cast %243 : vector<8xf32> to vector<8x1xf32>
    %245 = tpu.reciprocal %244 {approx = true} : vector<8x1xf32> -> vector<8x1xf32>
    %246 = vector.broadcast %245 : vector<8x1xf32> to vector<8x8xf32>
    %247 = arith.mulf %242, %246 : vector<8x8xf32>
    %cst_99 = arith.constant dense<0.000000e+00> : vector<8x64xf32>
    %248 = tpu.matmul %247, %231, %cst_99 {dimension_numbers = #tpu.dot_dimension_numbers<[1], [0], [0], [1], [0, 0, 1, 1], [], []>} : vector<8x8xf32>, vector<8x64xf32>, vector<8x64xf32> -> vector<8x64xf32>
    %249 = tpu.concatenate %228, %248 in 1 : vector<8x64xf32>, vector<8x64xf32> -> vector<8x128xf32>
    %250 = vector.extract_strided_slice %0 {offsets = [1, 0], sizes = [1, 8], strides = [1, 1]} : vector<2x8xf32> to vector<1x8xf32>
    %251 = vector.extract_strided_slice %207 {offsets = [8, 0], sizes = [8, 64], strides = [1, 1]} : vector<16x384xf32> to vector<8x64xf32>
    %252 = vector.extract_strided_slice %207 {offsets = [8, 128], sizes = [8, 64], strides = [1, 1]} : vector<16x384xf32> to vector<8x64xf32>
    %253 = vector.extract_strided_slice %207 {offsets = [8, 256], sizes = [8, 64], strides = [1, 1]} : vector<16x384xf32> to vector<8x64xf32>
    %254 = tpu.transpose %252, [1, 0] : vector<8x64xf32> -> vector<64x8xf32>
    %cst_100 = arith.constant dense<0.000000e+00> : vector<8x8xf32>
    %255 = tpu.matmul %251, %254, %cst_100 {dimension_numbers = #tpu.dot_dimension_numbers<[1], [0], [0], [1], [0, 0, 1, 1], [], []>} : vector<8x64xf32>, vector<64x8xf32>, vector<8x8xf32> -> vector<8x8xf32>
    %cst_101 = arith.constant 1.250000e-01 : f32
    %256 = vector.broadcast %cst_101 : f32 to vector<8x8xf32>
    %257 = arith.mulf %255, %256 : vector<8x8xf32>
    %258 = vector.broadcast %250 : vector<1x8xf32> to vector<8x8xf32>
    %259 = arith.addf %257, %258 : vector<8x8xf32>
    %cst_102 = arith.constant dense<0xFF800000> : vector<8xf32>
    %260 = vector.multi_reduction <maximumf>, %259, %cst_102 [1] : vector<8x8xf32> to vector<8xf32>
    %261 = vector.shape_cast %260 : vector<8xf32> to vector<8x1xf32>
    %262 = vector.broadcast %261 : vector<8x1xf32> to vector<8x8xf32>
    %263 = arith.subf %259, %262 : vector<8x8xf32>
    %264 = math.exp %263 : vector<8x8xf32>
    %cst_103 = arith.constant dense<0.000000e+00> : vector<8xf32>
    %265 = vector.multi_reduction <add>, %264, %cst_103 [1] : vector<8x8xf32> to vector<8xf32>
    %266 = vector.shape_cast %265 : vector<8xf32> to vector<8x1xf32>
    %267 = tpu.reciprocal %266 {approx = true} : vector<8x1xf32> -> vector<8x1xf32>
    %268 = vector.broadcast %267 : vector<8x1xf32> to vector<8x8xf32>
    %269 = arith.mulf %264, %268 : vector<8x8xf32>
    %cst_104 = arith.constant dense<0.000000e+00> : vector<8x64xf32>
    %270 = tpu.matmul %269, %253, %cst_104 {dimension_numbers = #tpu.dot_dimension_numbers<[1], [0], [0], [1], [0, 0, 1, 1], [], []>} : vector<8x8xf32>, vector<8x64xf32>, vector<8x64xf32> -> vector<8x64xf32>
    %271 = vector.extract_strided_slice %207 {offsets = [8, 64], sizes = [8, 64], strides = [1, 1]} : vector<16x384xf32> to vector<8x64xf32>
    %272 = vector.extract_strided_slice %207 {offsets = [8, 192], sizes = [8, 64], strides = [1, 1]} : vector<16x384xf32> to vector<8x64xf32>
    %273 = vector.extract_strided_slice %207 {offsets = [8, 320], sizes = [8, 64], strides = [1, 1]} : vector<16x384xf32> to vector<8x64xf32>
    %274 = tpu.transpose %272, [1, 0] : vector<8x64xf32> -> vector<64x8xf32>
    %cst_105 = arith.constant dense<0.000000e+00> : vector<8x8xf32>
    %275 = tpu.matmul %271, %274, %cst_105 {dimension_numbers = #tpu.dot_dimension_numbers<[1], [0], [0], [1], [0, 0, 1, 1], [], []>} : vector<8x64xf32>, vector<64x8xf32>, vector<8x8xf32> -> vector<8x8xf32>
    %cst_106 = arith.constant 1.250000e-01 : f32
    %276 = vector.broadcast %cst_106 : f32 to vector<8x8xf32>
    %277 = arith.mulf %275, %276 : vector<8x8xf32>
    %278 = vector.broadcast %250 : vector<1x8xf32> to vector<8x8xf32>
    %279 = arith.addf %277, %278 : vector<8x8xf32>
    %cst_107 = arith.constant dense<0xFF800000> : vector<8xf32>
    %280 = vector.multi_reduction <maximumf>, %279, %cst_107 [1] : vector<8x8xf32> to vector<8xf32>
    %281 = vector.shape_cast %280 : vector<8xf32> to vector<8x1xf32>
    %282 = vector.broadcast %281 : vector<8x1xf32> to vector<8x8xf32>
    %283 = arith.subf %279, %282 : vector<8x8xf32>
    %284 = math.exp %283 : vector<8x8xf32>
    %cst_108 = arith.constant dense<0.000000e+00> : vector<8xf32>
    %285 = vector.multi_reduction <add>, %284, %cst_108 [1] : vector<8x8xf32> to vector<8xf32>
    %286 = vector.shape_cast %285 : vector<8xf32> to vector<8x1xf32>
    %287 = tpu.reciprocal %286 {approx = true} : vector<8x1xf32> -> vector<8x1xf32>
    %288 = vector.broadcast %287 : vector<8x1xf32> to vector<8x8xf32>
    %289 = arith.mulf %284, %288 : vector<8x8xf32>
    %cst_109 = arith.constant dense<0.000000e+00> : vector<8x64xf32>
    %290 = tpu.matmul %289, %273, %cst_109 {dimension_numbers = #tpu.dot_dimension_numbers<[1], [0], [0], [1], [0, 0, 1, 1], [], []>} : vector<8x8xf32>, vector<8x64xf32>, vector<8x64xf32> -> vector<8x64xf32>
    %291 = tpu.concatenate %270, %290 in 1 : vector<8x64xf32>, vector<8x64xf32> -> vector<8x128xf32>
    %292 = tpu.concatenate %249, %291 in 0 : vector<8x128xf32>, vector<8x128xf32> -> vector<16x128xf32>
    %c1_110 = arith.constant 1 : index
    %c0_111 = arith.constant 0 : index
    %c0_112 = arith.constant 0 : index
    %293 = vector.load %arg7[%c1_110, %c0_111, %c0_112] : memref<2x128x128xf32, #tpu.memory_space<vmem>>, vector<1x128x128xf32>
    %294 = vector.shape_cast %293 : vector<1x128x128xf32> to vector<128x128xf32>
    %cst_113 = arith.constant dense<0.000000e+00> : vector<16x128xf32>
    %295 = tpu.matmul %292, %294, %cst_113 {dimension_numbers = #tpu.dot_dimension_numbers<[1], [0], [0], [1], [0, 0, 1, 1], [], []>} : vector<16x128xf32>, vector<128x128xf32>, vector<16x128xf32> -> vector<16x128xf32>
    %c1_114 = arith.constant 1 : index
    %c0_115 = arith.constant 0 : index
    %c0_116 = arith.constant 0 : index
    %296 = vector.load %arg8[%c1_114, %c0_115, %c0_116] : memref<2x1x128xf32, #tpu.memory_space<vmem>>, vector<1x1x128xf32>
    %297 = vector.shape_cast %296 : vector<1x1x128xf32> to vector<1x128xf32>
    %298 = vector.broadcast %297 : vector<1x128xf32> to vector<16x128xf32>
    %299 = arith.addf %295, %298 : vector<16x128xf32>
    %300 = arith.addf %299, %200 : vector<16x128xf32>
    %c1_117 = arith.constant 1 : index
    %c0_118 = arith.constant 0 : index
    %c0_119 = arith.constant 0 : index
    %301 = vector.load %arg13[%c1_117, %c0_118, %c0_119] : memref<2x1x128xf32, #tpu.memory_space<vmem>>, vector<1x1x128xf32>
    %302 = vector.shape_cast %301 : vector<1x1x128xf32> to vector<1x128xf32>
    %c1_120 = arith.constant 1 : index
    %c0_121 = arith.constant 0 : index
    %c0_122 = arith.constant 0 : index
    %303 = vector.load %arg14[%c1_120, %c0_121, %c0_122] : memref<2x1x128xf32, #tpu.memory_space<vmem>>, vector<1x1x128xf32>
    %304 = vector.shape_cast %303 : vector<1x1x128xf32> to vector<1x128xf32>
    %cst_123 = arith.constant dense<0.000000e+00> : vector<16xf32>
    %305 = vector.multi_reduction <add>, %300, %cst_123 [1] : vector<16x128xf32> to vector<16xf32>
    %306 = vector.shape_cast %305 : vector<16xf32> to vector<16x1xf32>
    %cst_124 = arith.constant 1.280000e+02 : f32
    %307 = vector.broadcast %cst_124 : f32 to vector<16x1xf32>
    %308 = arith.divf %306, %307 : vector<16x1xf32>
    %309 = vector.broadcast %308 : vector<16x1xf32> to vector<16x128xf32>
    %310 = arith.subf %300, %309 : vector<16x128xf32>
    %311 = arith.mulf %310, %310 : vector<16x128xf32>
    %cst_125 = arith.constant dense<0.000000e+00> : vector<16xf32>
    %312 = vector.multi_reduction <add>, %311, %cst_125 [1] : vector<16x128xf32> to vector<16xf32>
    %313 = vector.shape_cast %312 : vector<16xf32> to vector<16x1xf32>
    %cst_126 = arith.constant 1.280000e+02 : f32
    %314 = vector.broadcast %cst_126 : f32 to vector<16x1xf32>
    %315 = arith.divf %313, %314 : vector<16x1xf32>
    %316 = vector.broadcast %308 : vector<16x1xf32> to vector<16x128xf32>
    %317 = arith.subf %300, %316 : vector<16x128xf32>
    %cst_127 = arith.constant 9.99999996E-13 : f32
    %318 = vector.broadcast %cst_127 : f32 to vector<16x1xf32>
    %319 = arith.addf %315, %318 : vector<16x1xf32>
    %320 = math.rsqrt %319 : vector<16x1xf32>
    %321 = vector.broadcast %320 : vector<16x1xf32> to vector<16x128xf32>
    %322 = arith.mulf %317, %321 : vector<16x128xf32>
    %323 = vector.broadcast %302 : vector<1x128xf32> to vector<16x128xf32>
    %324 = arith.mulf %322, %323 : vector<16x128xf32>
    %325 = vector.broadcast %304 : vector<1x128xf32> to vector<16x128xf32>
    %326 = arith.addf %324, %325 : vector<16x128xf32>
    %c1_128 = arith.constant 1 : index
    %c0_129 = arith.constant 0 : index
    %c0_130 = arith.constant 0 : index
    %327 = vector.load %arg9[%c1_128, %c0_129, %c0_130] : memref<2x128x256xf32, #tpu.memory_space<vmem>>, vector<1x128x256xf32>
    %328 = vector.shape_cast %327 : vector<1x128x256xf32> to vector<128x256xf32>
    %cst_131 = arith.constant dense<0.000000e+00> : vector<16x256xf32>
    %329 = tpu.matmul %326, %328, %cst_131 {dimension_numbers = #tpu.dot_dimension_numbers<[1], [0], [0], [1], [0, 0, 1, 1], [], []>} : vector<16x128xf32>, vector<128x256xf32>, vector<16x256xf32> -> vector<16x256xf32>
    %c1_132 = arith.constant 1 : index
    %c0_133 = arith.constant 0 : index
    %c0_134 = arith.constant 0 : index
    %330 = vector.load %arg10[%c1_132, %c0_133, %c0_134] : memref<2x1x256xf32, #tpu.memory_space<vmem>>, vector<1x1x256xf32>
    %331 = vector.shape_cast %330 : vector<1x1x256xf32> to vector<1x256xf32>
    %332 = vector.broadcast %331 : vector<1x256xf32> to vector<16x256xf32>
    %333 = arith.addf %329, %332 : vector<16x256xf32>
    %cst_135 = arith.constant 5.000000e-01 : f32
    %334 = vector.broadcast %cst_135 : f32 to vector<16x256xf32>
    %335 = arith.mulf %334, %333 : vector<16x256xf32>
    %cst_136 = arith.constant 0.707106769 : f32
    %336 = vector.broadcast %cst_136 : f32 to vector<16x256xf32>
    %337 = arith.mulf %333, %336 : vector<16x256xf32>
    %338 = math.erf %337 : vector<16x256xf32>
    %cst_137 = arith.constant 1.000000e+00 : f32
    %339 = vector.broadcast %cst_137 : f32 to vector<16x256xf32>
    %340 = arith.addf %339, %338 : vector<16x256xf32>
    %341 = arith.mulf %335, %340 : vector<16x256xf32>
    %c1_138 = arith.constant 1 : index
    %c0_139 = arith.constant 0 : index
    %c0_140 = arith.constant 0 : index
    %342 = vector.load %arg11[%c1_138, %c0_139, %c0_140] : memref<2x256x128xf32, #tpu.memory_space<vmem>>, vector<1x256x128xf32>
    %343 = vector.shape_cast %342 : vector<1x256x128xf32> to vector<256x128xf32>
    %cst_141 = arith.constant dense<0.000000e+00> : vector<16x128xf32>
    %344 = tpu.matmul %341, %343, %cst_141 {dimension_numbers = #tpu.dot_dimension_numbers<[1], [0], [0], [1], [0, 0, 1, 1], [], []>} : vector<16x256xf32>, vector<256x128xf32>, vector<16x128xf32> -> vector<16x128xf32>
    %c1_142 = arith.constant 1 : index
    %c0_143 = arith.constant 0 : index
    %c0_144 = arith.constant 0 : index
    %345 = vector.load %arg12[%c1_142, %c0_143, %c0_144] : memref<2x1x128xf32, #tpu.memory_space<vmem>>, vector<1x1x128xf32>
    %346 = vector.shape_cast %345 : vector<1x1x128xf32> to vector<1x128xf32>
    %347 = vector.broadcast %346 : vector<1x128xf32> to vector<16x128xf32>
    %348 = arith.addf %344, %347 : vector<16x128xf32>
    %349 = arith.addf %348, %326 : vector<16x128xf32>
    %c1_145 = arith.constant 1 : index
    %c0_146 = arith.constant 0 : index
    %c0_147 = arith.constant 0 : index
    %350 = vector.load %arg15[%c1_145, %c0_146, %c0_147] : memref<2x1x128xf32, #tpu.memory_space<vmem>>, vector<1x1x128xf32>
    %351 = vector.shape_cast %350 : vector<1x1x128xf32> to vector<1x128xf32>
    %c1_148 = arith.constant 1 : index
    %c0_149 = arith.constant 0 : index
    %c0_150 = arith.constant 0 : index
    %352 = vector.load %arg16[%c1_148, %c0_149, %c0_150] : memref<2x1x128xf32, #tpu.memory_space<vmem>>, vector<1x1x128xf32>
    %353 = vector.shape_cast %352 : vector<1x1x128xf32> to vector<1x128xf32>
    %cst_151 = arith.constant dense<0.000000e+00> : vector<16xf32>
    %354 = vector.multi_reduction <add>, %349, %cst_151 [1] : vector<16x128xf32> to vector<16xf32>
    %355 = vector.shape_cast %354 : vector<16xf32> to vector<16x1xf32>
    %cst_152 = arith.constant 1.280000e+02 : f32
    %356 = vector.broadcast %cst_152 : f32 to vector<16x1xf32>
    %357 = arith.divf %355, %356 : vector<16x1xf32>
    %358 = vector.broadcast %357 : vector<16x1xf32> to vector<16x128xf32>
    %359 = arith.subf %349, %358 : vector<16x128xf32>
    %360 = arith.mulf %359, %359 : vector<16x128xf32>
    %cst_153 = arith.constant dense<0.000000e+00> : vector<16xf32>
    %361 = vector.multi_reduction <add>, %360, %cst_153 [1] : vector<16x128xf32> to vector<16xf32>
    %362 = vector.shape_cast %361 : vector<16xf32> to vector<16x1xf32>
    %cst_154 = arith.constant 1.280000e+02 : f32
    %363 = vector.broadcast %cst_154 : f32 to vector<16x1xf32>
    %364 = arith.divf %362, %363 : vector<16x1xf32>
    %365 = vector.broadcast %357 : vector<16x1xf32> to vector<16x128xf32>
    %366 = arith.subf %349, %365 : vector<16x128xf32>
    %cst_155 = arith.constant 9.99999996E-13 : f32
    %367 = vector.broadcast %cst_155 : f32 to vector<16x1xf32>
    %368 = arith.addf %364, %367 : vector<16x1xf32>
    %369 = math.rsqrt %368 : vector<16x1xf32>
    %370 = vector.broadcast %369 : vector<16x1xf32> to vector<16x128xf32>
    %371 = arith.mulf %366, %370 : vector<16x128xf32>
    %372 = vector.broadcast %351 : vector<1x128xf32> to vector<16x128xf32>
    %373 = arith.mulf %371, %372 : vector<16x128xf32>
    %374 = vector.broadcast %353 : vector<1x128xf32> to vector<16x128xf32>
    %375 = arith.addf %373, %374 : vector<16x128xf32>
    %376 = vector.extract_strided_slice %375 {offsets = [0, 0], sizes = [1, 128], strides = [1, 1]} : vector<16x128xf32> to vector<1x128xf32>
    %377 = vector.extract_strided_slice %375 {offsets = [8, 0], sizes = [1, 128], strides = [1, 1]} : vector<16x128xf32> to vector<1x128xf32>
    %378 = tpu.concatenate %376, %377 in 0 : vector<1x128xf32>, vector<1x128xf32> -> vector<2x128xf32>
    %c0_156 = arith.constant 0 : index
    %c0_157 = arith.constant 0 : index
    %379 = vector.load %arg17[%c0_156, %c0_157] : memref<128x128xf32, #tpu.memory_space<vmem>>, vector<128x128xf32>
    %cst_158 = arith.constant dense<0.000000e+00> : vector<2x128xf32>
    %380 = tpu.matmul %378, %379, %cst_158 {dimension_numbers = #tpu.dot_dimension_numbers<[1], [0], [0], [1], [0, 0, 1, 1], [], []>} : vector<2x128xf32>, vector<128x128xf32>, vector<2x128xf32> -> vector<2x128xf32>
    %c0_159 = arith.constant 0 : index
    %c0_160 = arith.constant 0 : index
    %381 = vector.load %arg18[%c0_159, %c0_160] : memref<1x128xf32, #tpu.memory_space<vmem>>, vector<1x128xf32>
    %382 = vector.broadcast %381 : vector<1x128xf32> to vector<2x128xf32>
    %383 = arith.addf %380, %382 : vector<2x128xf32>
    %384 = math.tanh %383 : vector<2x128xf32>
    %c0_161 = arith.constant 0 : index
    %c0_162 = arith.constant 0 : index
    %385 = vector.load %arg19[%c0_161, %c0_162] : memref<1x128xf32, #tpu.memory_space<vmem>>, vector<1x128xf32>
    %386 = vector.broadcast %385 : vector<1x128xf32> to vector<2x128xf32>
    %387 = arith.mulf %384, %386 : vector<2x128xf32>
    %cst_163 = arith.constant dense<0.000000e+00> : vector<2xf32>
    %388 = vector.multi_reduction <add>, %387, %cst_163 [1] : vector<2x128xf32> to vector<2xf32>
    %389 = vector.shape_cast %388 : vector<2xf32> to vector<2x1xf32>
    %c0_164 = arith.constant 0 : index
    %c0_165 = arith.constant 0 : index
    %390 = vector.load %arg20[%c0_164, %c0_165] : memref<1x1xf32, #tpu.memory_space<vmem>>, vector<1x1xf32>
    %391 = vector.broadcast %390 : vector<1x1xf32> to vector<2x1xf32>
    %392 = arith.addf %389, %391 : vector<2x1xf32>
    %c0_166 = arith.constant 0 : index
    %c0_167 = arith.constant 0 : index
    %393 = vector.load %arg21[%c0_166, %c0_167] : memref<2x1xf32, #tpu.memory_space<vmem>>, vector<2x1xf32>
    tpu.vector_store %arg21[%c0_166, %c0_167], %392 {strides = array<i32>} : memref<2x1xf32, #tpu.memory_space<vmem>>, vector<2x1xf32>,
    return
  }
  func.func @transform_0(%arg0: i32) -> (i32, i32) {
    %c0_i32 = arith.constant 0 : i32
    %c0_i32_0 = arith.constant 0 : i32
    %c0_i32_1 = arith.constant 0 : i32
    return %c0_i32, %c0_i32_0 : i32, i32
  }
  func.func @transform_1(%arg0: i32) -> (i32, i32) {
    %c0_i32 = arith.constant 0 : i32
    %c0_i32_0 = arith.constant 0 : i32
    %c0_i32_1 = arith.constant 0 : i32
    return %c0_i32, %c0_i32_0 : i32, i32
  }
  func.func @transform_2(%arg0: i32) -> (i32, i32) {
    %c0_i32 = arith.constant 0 : i32
    %c0_i32_0 = arith.constant 0 : i32
    %c0_i32_1 = arith.constant 0 : i32
    return %c0_i32, %c0_i32_0 : i32, i32
  }
  func.func @transform_3(%arg0: i32) -> (i32, i32) {
    %c0_i32 = arith.constant 0 : i32
    %c0_i32_0 = arith.constant 0 : i32
    %c0_i32_1 = arith.constant 0 : i32
    return %c0_i32, %c0_i32_0 : i32, i32
  }
  func.func @transform_4(%arg0: i32) -> (i32, i32, i32) {
    %c0_i32 = arith.constant 0 : i32
    %c0_i32_0 = arith.constant 0 : i32
    %c0_i32_1 = arith.constant 0 : i32
    %c0_i32_2 = arith.constant 0 : i32
    return %c0_i32, %c0_i32_0, %c0_i32_1 : i32, i32, i32
  }
  func.func @transform_5(%arg0: i32) -> (i32, i32, i32) {
    %c0_i32 = arith.constant 0 : i32
    %c0_i32_0 = arith.constant 0 : i32
    %c0_i32_1 = arith.constant 0 : i32
    %c0_i32_2 = arith.constant 0 : i32
    return %c0_i32, %c0_i32_0, %c0_i32_1 : i32, i32, i32
  }
  func.func @transform_6(%arg0: i32) -> (i32, i32, i32) {
    %c0_i32 = arith.constant 0 : i32
    %c0_i32_0 = arith.constant 0 : i32
    %c0_i32_1 = arith.constant 0 : i32
    %c0_i32_2 = arith.constant 0 : i32
    return %c0_i32, %c0_i32_0, %c0_i32_1 : i32, i32, i32
  }
  func.func @transform_7(%arg0: i32) -> (i32, i32, i32) {
    %c0_i32 = arith.constant 0 : i32
    %c0_i32_0 = arith.constant 0 : i32
    %c0_i32_1 = arith.constant 0 : i32
    %c0_i32_2 = arith.constant 0 : i32
    return %c0_i32, %c0_i32_0, %c0_i32_1 : i32, i32, i32
  }
  func.func @transform_8(%arg0: i32) -> (i32, i32, i32) {
    %c0_i32 = arith.constant 0 : i32
    %c0_i32_0 = arith.constant 0 : i32
    %c0_i32_1 = arith.constant 0 : i32
    %c0_i32_2 = arith.constant 0 : i32
    return %c0_i32, %c0_i32_0, %c0_i32_1 : i32, i32, i32
  }
  func.func @transform_9(%arg0: i32) -> (i32, i32, i32) {
    %c0_i32 = arith.constant 0 : i32
    %c0_i32_0 = arith.constant 0 : i32
    %c0_i32_1 = arith.constant 0 : i32
    %c0_i32_2 = arith.constant 0 : i32
    return %c0_i32, %c0_i32_0, %c0_i32_1 : i32, i32, i32
  }
  func.func @transform_10(%arg0: i32) -> (i32, i32, i32) {
    %c0_i32 = arith.constant 0 : i32
    %c0_i32_0 = arith.constant 0 : i32
    %c0_i32_1 = arith.constant 0 : i32
    %c0_i32_2 = arith.constant 0 : i32
    return %c0_i32, %c0_i32_0, %c0_i32_1 : i32, i32, i32
  }
  func.func @transform_11(%arg0: i32) -> (i32, i32, i32) {
    %c0_i32 = arith.constant 0 : i32
    %c0_i32_0 = arith.constant 0 : i32
    %c0_i32_1 = arith.constant 0 : i32
    %c0_i32_2 = arith.constant 0 : i32
    return %c0_i32, %c0_i32_0, %c0_i32_1 : i32, i32, i32
  }
  func.func @transform_12(%arg0: i32) -> (i32, i32, i32) {
    %c0_i32 = arith.constant 0 : i32
    %c0_i32_0 = arith.constant 0 : i32
    %c0_i32_1 = arith.constant 0 : i32
    %c0_i32_2 = arith.constant 0 : i32
    return %c0_i32, %c0_i32_0, %c0_i32_1 : i32, i32, i32
  }
  func.func @transform_13(%arg0: i32) -> (i32, i32, i32) {
    %c0_i32 = arith.constant 0 : i32
    %c0_i32_0 = arith.constant 0 : i32
    %c0_i32_1 = arith.constant 0 : i32
    %c0_i32_2 = arith.constant 0 : i32
    return %c0_i32, %c0_i32_0, %c0_i32_1 : i32, i32, i32
  }
  func.func @transform_14(%arg0: i32) -> (i32, i32, i32) {
    %c0_i32 = arith.constant 0 : i32
    %c0_i32_0 = arith.constant 0 : i32
    %c0_i32_1 = arith.constant 0 : i32
    %c0_i32_2 = arith.constant 0 : i32
    return %c0_i32, %c0_i32_0, %c0_i32_1 : i32, i32, i32
  }
  func.func @transform_15(%arg0: i32) -> (i32, i32, i32) {
    %c0_i32 = arith.constant 0 : i32
    %c0_i32_0 = arith.constant 0 : i32
    %c0_i32_1 = arith.constant 0 : i32
    %c0_i32_2 = arith.constant 0 : i32
    return %c0_i32, %c0_i32_0, %c0_i32_1 : i32, i32, i32
  }
  func.func @transform_16(%arg0: i32) -> (i32, i32) {
    %c0_i32 = arith.constant 0 : i32
    %c0_i32_0 = arith.constant 0 : i32
    %c0_i32_1 = arith.constant 0 : i32
    return %c0_i32, %c0_i32_0 : i32, i32
  }
  func.func @transform_17(%arg0: i32) -> (i32, i32) {
    %c0_i32 = arith.constant 0 : i32
    %c0_i32_0 = arith.constant 0 : i32
    %c0_i32_1 = arith.constant 0 : i32
    return %c0_i32, %c0_i32_0 : i32, i32
  }
  func.func @transform_18(%arg0: i32) -> (i32, i32) {
    %c0_i32 = arith.constant 0 : i32
    %c0_i32_0 = arith.constant 0 : i32
    %c0_i32_1 = arith.constant 0 : i32
    return %c0_i32, %c0_i32_0 : i32, i32
  }
  func.func @transform_19(%arg0: i32) -> (i32, i32) {
    %c0_i32 = arith.constant 0 : i32
    %c0_i32_0 = arith.constant 0 : i32
    %c0_i32_1 = arith.constant 0 : i32
    return %c0_i32, %c0_i32_0 : i32, i32
  }
  func.func @transform_20(%arg0: i32) -> (i32, i32) {
    %c0_i32 = arith.constant 0 : i32
    %c0_i32_0 = arith.constant 0 : i32
    %c0_i32_1 = arith.constant 0 : i32
    return %c0_i32, %c0_i32_0 : i32, i32
  }
}

</mosaic_0001>

<bundles_post_ra>
// kernel: bert_class_forward.1
= control target key start
LH: loop header
LB: loop body
LE: loop exit
PB: predicated region body
PF: predicated region fallthrough
CT: control target
= control target key end

     0   :  { %s4600_s0 = inlined_call_operand.vmem [shape: f32[16,128], index: 0, kind: input, shape index: {}]   ;;  %s4601_s1 = inlined_call_operand.vmem [shape: f32[2,8], index: 1, kind: input, shape index: {}]   ;;  %s4602_s2 = inlined_call_operand.vmem [shape: f32[1,128], index: 2, kind: input, shape index: {}]   ;;  %s4603_s3 = inlined_call_operand.vmem [shape: f32[1,128], index: 3, kind: input, shape index: {}]   ;;  %s4604_s4 = inlined_call_operand.hbm [shape: f32[2,128,384], index: 4, kind: input, shape index: {}]   ;;  %s4605_s5 = inlined_call_operand.vmem [shape: f32[2,1,384], index: 5, kind: input, shape index: {}]   ;;  %s4606_s6 = inlined_call_operand.vmem [shape: f32[2,128,128], index: 6, kind: input, shape index: {}]   ;;  %s4607_s7 = inlined_call_operand.vmem [shape: f32[2,1,128], index: 7, kind: input, shape index: {}]   ;;  %s4608_s8 = inlined_call_operand.hbm [shape: f32[2,128,256], index: 8, kind: input, shape index: {}]   ;;  %s4609_s9 = inlined_call_operand.vmem [shape: f32[2,1,256], index: 9, kind: input, shape index: {}]   ;;  %s4610_s10 = inlined_call_operand.hbm [shape: f32[2,256,128], index: 10, kind: input, shape index: {}]   ;;  %s4611_s11 = inlined_call_operand.vmem [shape: f32[2,1,128], index: 11, kind: input, shape index: {}]   ;;  %s4612_s12 = inlined_call_operand.vmem [shape: f32[2,1,128], index: 12, kind: input, shape index: {}]   ;;  %s4613_s13 = inlined_call_operand.vmem [shape: f32[2,1,128], index: 13, kind: input, shape index: {}]   ;;  %s4614_s14 = inlined_call_operand.vmem [shape: f32[2,1,128], index: 14, kind: input, shape index: {}]   ;;  %s4615_s15 = inlined_call_operand.vmem [shape: f32[2,1,128], index: 15, kind: input, shape index: {}]   ;;  %s4616_s16 = inlined_call_operand.vmem [shape: f32[128,128], index: 16, kind: input, shape index: {}]   ;;  %s4617_s17 = inlined_call_operand.vmem [shape: f32[1,128], index: 17, kind: input, shape index: {}]   ;;  %s4618_s18 = inlined_call_operand.vmem [shape: f32[1,128], index: 18, kind: input, shape index: {}]   ;;  %s4619_s19 = inlined_call_operand.<no memory space> [shape: f32[1,1], index: 19, kind: input, shape index: {}]   ;;  %s4620_s20 = inlined_call_operand.vmem [shape: f32[2,1], index: 20, kind: output, shape index: {}]  }
   0x1   :  { %4623 = sst [smem:[#allocation10_spill]] %s4600_s0  ;;  %v25_v0 = vstv %s4619_s19 }
   0x2   :  { %4624 = sst [smem:[#allocation11_spill]] %s4601_s1  ;;  %26 = vst [vmem:[#allocation2] sm:$0x1] %v25_v0 }
   0x3   :  { %4625 = sst [smem:[#allocation12_spill]] %s4602_s2 }
   0x4   :  { %4626 = sst [smem:[#allocation13_spill]] %s4603_s3 }
   0x5   :  { %4627 = sst [smem:[#allocation14_spill]] %s4604_s4 }
   0x6   :  { %27 = vsyncpa [#allocation4], 0 }
   0x7   :  { %28 = vsyncpa [#allocation6], 0  ;;  %s3973_s23 = smov [#allocation5]   ;;  %s3903_s3 = scalar_lea.hbm %s4608_s8, 8192 }
   0x8   :  { %s60_s24 = sshll.u32 %s3973_s23, 4  ;;  %p3904_p0 = scmp.ne.s32.totalorder %s4608_s8, %s3903_s3  ;;  %s61_s24 = int_to_ptr.vmem [resolvable:$true] %s60_s24 }
   0x9   :  { %p3907_p1 = scmp.lt.u32.totalorder %s3903_s3, %s4608_s8 }
   0xb   :  { %p3909_p2 = pnand %p3907_p1, %p3904_p0 }
   0xd   :  { %3912 = shalt.err (!%p3909_p2)
}
   0xe   :  { %s3913_s19 = scalar_lea.vmem %s61_s24, 8192  ;;  %p3918_p4 = scmp.lt.s32.totalorder %s61_s24, %s61_s24 }
   0xf   :  { %p3914_p3 = scmp.ne.s32.totalorder %s61_s24, %s3913_s19  ;;  %p3919_p5 = scmp.lt.s32.totalorder %s3913_s19, %s3913_s19 }
  0x11   :  { %p3920_p6 = por %p3919_p5, %p3918_p4 }
  0x13   :  { %p3921_p7 = pnand %p3920_p6, %p3914_p3 }
  0x15   :  { %3924 = shalt.err (!%p3921_p7)
}
  0x16   :  { %s3974_s29 = smov 256   ;;  %s3975_s30 = smov 16  }
  0x17   :  { %66 = dma.hbm_to_vmem [thread:$0]  %s4608_s8, 8192, %s61_s24, [#allocation6], %s3974_s29, %s3974_s29, %s3975_s30  }
  0x18   :  { %s3976_s1 = smov [#allocation3]   ;;  %s4628_s25 = sld [smem:[#allocation14_spill]] }
  0x19   :  { %s42_s22 = sshll.u32 %s3976_s1, 4  ;;  %s43_s22 = int_to_ptr.vmem [resolvable:$true] %s42_s22 }
  0x1e   :  { %s3925_s3 = scalar_lea.hbm %s4628_s25, 12288 }
  0x1f   :  { %p3926_p8 = scmp.ne.s32.totalorder %s4628_s25, %s3925_s3  ;;  %p3929_p9 = scmp.lt.u32.totalorder %s3925_s3, %s4628_s25 }
  0x21   :  { %p3931_p10 = pnand %p3929_p9, %p3926_p8 }
  0x23   :  { %3934 = shalt.err (!%p3931_p10)
}
  0x24   :  { %s3935_s19 = scalar_lea.vmem %s43_s22, 12288  ;;  %p3940_p12 = scmp.lt.s32.totalorder %s43_s22, %s43_s22 }
  0x25   :  { %p3936_p11 = scmp.ne.s32.totalorder %s43_s22, %s3935_s19  ;;  %p3941_p13 = scmp.lt.s32.totalorder %s3935_s19, %s3935_s19 }
  0x27   :  { %p3942_p0 = por %p3941_p13, %p3940_p12 }
  0x29   :  { %p3943_p1 = pnand %p3942_p0, %p3936_p11 }
  0x2b   :  { %3946 = shalt.err (!%p3943_p1)
}
  0x2c   :  { %s3977_s8 = smov 384   ;;  %s3978_s24 = smov 24  }
  0x2d   :  { %48 = dma.hbm_to_vmem [thread:$0]  %s4628_s25, 12288, %s43_s22, [#allocation4], %s3977_s8, %s3977_s8, %s3978_s24  }
  0x2e   :  { %s3979_s0 = smov [#allocation7]   ;;  %s3947_s2 = scalar_lea.hbm %s4610_s10, 8192 }
  0x2f   :  { %s74_s21 = sshll.u32 %s3979_s0, 4  ;;  %p3948_p2 = scmp.ne.s32.totalorder %s4610_s10, %s3947_s2  ;;  %s75_s21 = int_to_ptr.vmem [resolvable:$true] %s74_s21 }
  0x30   :  { %p3951_p3 = scmp.lt.u32.totalorder %s3947_s2, %s4610_s10 }
  0x32   :  { %p3953_p4 = pnand %p3951_p3, %p3948_p2 }
  0x34   :  { %3956 = shalt.err (!%p3953_p4)
}
  0x35   :  { %s3957_s4 = scalar_lea.vmem %s75_s21, 8192  ;;  %p3962_p6 = scmp.lt.s32.totalorder %s75_s21, %s75_s21 }
  0x36   :  { %p3958_p5 = scmp.ne.s32.totalorder %s75_s21, %s3957_s4  ;;  %p3963_p7 = scmp.lt.s32.totalorder %s3957_s4, %s3957_s4 }
  0x38   :  { %p3964_p8 = por %p3963_p7, %p3962_p6 }
  0x3a   :  { %p3965_p9 = pnand %p3964_p8, %p3958_p5 }
  0x3c   :  { %3968 = shalt.err (!%p3965_p9)
}
  0x3d   :  { %s3980_s22 = smov 128   ;;  %s3981_s25 = smov 8  }
  0x3e   :  { %80 = dma.hbm_to_vmem [thread:$0]  %s4610_s10, 8192, %s75_s21, [#allocation6], %s3980_s22, %s3980_s22, %s3981_s25  }
  0x3f   :  { %3969 = dma.done.wait [#allocation4], 12288  }
  0x40   :  { %3970 = vsyncadd [#allocation4], 4294955008 }
  0x41   :  { %3971 = dma.done.wait [#allocation6], 16384  }
  0x42   :  { %3972 = vsyncadd [#allocation6], 4294950912  ;;  %s4629_s30 = sld [smem:[#allocation10_spill]]  ;;  %v153_v3 = vld [vmem:[#allocation3 + $0x8] sm:$0xff]  ;;  %v156_v4 = vld [vmem:[#allocation3 + $0x20] sm:$0xff]  ;;  %s4630_s23 = sld [smem:[#allocation12_spill]] }
  0x43   :  { %v152_v5 = vld [vmem:[#allocation3] sm:$0xff]  ;;  %v3466_v6 = vpack.c.bf16 %v156_v4, %v153_v3  ;;  %v155_v7 = vld [vmem:[#allocation3 + $0x18] sm:$0xff]  ;;  %v162_v9 = vld [vmem:[#allocation3 + $0x50] sm:$0xff]  ;;  %s4631_s26 = sld [smem:[#allocation13_spill]]  ;;  %vm3983_vm0 = vmmov 0   ;;  %vm369_vm1 = vcmask 523264  }
  0x44   :  { %v159_v8 = vld [vmem:[#allocation3 + $0x38] sm:$0xff]  ;;  %v3468_v10 = vpack.c.bf16 %v155_v7, %v152_v5  ;;  %v154_v12 = vld [vmem:[#allocation3 + $0x10] sm:$0xff]  ;;  %v157_v13 = vld [vmem:[#allocation3 + $0x28] sm:$0xff]  ;;  %v3982_v5 = vmov 0.0   ;;  %s3984_s4 = smov 64   ;;  %s4632_s19 = sld [smem:[#allocation11_spill]] }
  0x45   :  { %v3470_v11 = vpack.c.bf16 %v162_v9, %v159_v8  ;;  %v158_v14 = vld [vmem:[#allocation3 + $0x30] sm:$0xff]  ;;  %3467 = vmatprep.subr.bf16.mxu0 %v3466_v6  ;;  %v3498_v15 = vpack.c.bf16 %v157_v13, %v154_v12  ;;  %v161_v16 = vld [vmem:[#allocation3 + $0x48] sm:$0xff]  ;;  %v168_v18 = vld [vmem:[#allocation3 + $0x80] sm:$0xff]  ;;  %281 = vmatprep.mubr.f32.mxu0 %v3982_v5  ;;  %vm452_vm2 = vcmask 64512   ;;  %vm2825_vm3 = vcmask 1040384  }
  0x46   :  { %v165_v17 = vld [vmem:[#allocation3 + $0x68] sm:$0xff]  ;;  %3469 = vmatpush1.bf16.msra.mxu0 %v3468_v10  ;;  %v3472_v19 = vpack.c.bf16 %v161_v16, %v158_v14  ;;  %v160_v20 = vld [vmem:[#allocation3 + $0x40] sm:$0xff]  ;;  %v163_v21 = vld [vmem:[#allocation3 + $0x58] sm:$0xff]  ;;  %vm2929_vm4 = vcmask 1041408   ;;  %vm2941_vm5 = vcmask 1024  }
  0x47   :  { %3471 = vmatprep.subr.bf16.mxu0 %v3470_v11  ;;  %3499 = vmatprep.subr.bf16.mxu1 %v3498_v15  ;;  %v3474_v22 = vpack.c.bf16 %v168_v18, %v165_v17  ;;  %v3502_v23 = vpack.c.bf16 %v163_v21, %v160_v20  ;;  %v164_v24 = vld [vmem:[#allocation3 + $0x60] sm:$0xff]  ;;  %v167_v25 = vld [vmem:[#allocation3 + $0x78] sm:$0xff]  ;;  %v174_v36 = vld [vmem:[#allocation3 + $0xb0] sm:$0xff] }
  0x48   :  { %v109_v1 = vld [vmem:[%s4629_s30] sm:$0xff]  ;;  %v110_v2 = vld [vmem:[%s4629_s30 + $0x8] sm:$0xff]  ;;  %3501 = vmatpush3.bf16.msra.mxu1 %v3498_v15  ;;  %v3476_v26 = vpack.c.bf16 %v167_v25, %v164_v24  ;;  %v166_v37 = vld [vmem:[#allocation3 + $0x70] sm:$0xff] }
  0x49   :  { %113 = vadd.xlane.f32.xlu0 %v109_v1  ;;  %3503 = vmatprep.subr.bf16.mxu1 %v3502_v23  ;;  %v171_v35 = vld [vmem:[#allocation3 + $0x98] sm:$0xff]  ;;  %v169_v39 = vld [vmem:[#allocation3 + $0x88] sm:$0xff]  ;;  %v170_v40 = vld [vmem:[#allocation3 + $0x90] sm:$0xff] }
  0x4a   :  { %3473 = vmatpush1.bf16.msra.mxu0 %v3472_v19  ;;  %v3478_v38 = vpack.c.bf16 %v174_v36, %v171_v35  ;;  %v173_v41 = vld [vmem:[#allocation3 + $0xa8] sm:$0xff]  ;;  %v3506_v42 = vpack.c.bf16 %v169_v39, %v166_v37  ;;  %v180_v45 = vld [vmem:[#allocation3 + $0xe0] sm:$0xff]  ;;  %v175_v48 = vld [vmem:[#allocation3 + $0xb8] sm:$0xff] }
  0x4b   :  { %3475 = vmatprep.subr.bf16.mxu0 %v3474_v22  ;;  %v3480_v43 = vpack.c.bf16 %v173_v41, %v170_v40  ;;  %v177_v44 = vld [vmem:[#allocation3 + $0xc8] sm:$0xff]  ;;  %v172_v46 = vld [vmem:[#allocation3 + $0xa0] sm:$0xff]  ;;  %v179_v50 = vld [vmem:[#allocation3 + $0xd8] sm:$0xff] }
  0x4c   :  { %3505 = vmatpush3.bf16.msra.mxu1 %v3502_v23  ;;  %v3482_v47 = vpack.c.bf16 %v180_v45, %v177_v44  ;;  %v176_v49 = vld [vmem:[#allocation3 + $0xc0] sm:$0xff]  ;;  %v3510_v51 = vpack.c.bf16 %v175_v48, %v172_v46  ;;  %v183_v53 = vld [vmem:[#allocation3 + $0xf8] sm:$0xff]  ;;  %v186_v54 = vld [vmem:[#allocation3 + $0x110] sm:$0xff] }
  0x4d   :  { %115 = vadd.xlane.f32.xlu0 %v110_v2  ;;  %3507 = vmatprep.subr.bf16.mxu1 %v3506_v42  ;;  %v3484_v52 = vpack.c.bf16 %v179_v50, %v176_v49  ;;  %v178_v55 = vld [vmem:[#allocation3 + $0xd0] sm:$0xff]  ;;  %v3486_v56 = vpack.c.bf16 %v186_v54, %v183_v53  ;;  %v181_v57 = vld [vmem:[#allocation3 + $0xe8] sm:$0xff]  ;;  %v192_v63 = vld [vmem:[#allocation3 + $0x140] sm:$0xff] }
  0x4e   :  { %3477 = vmatpush1.bf16.msra.mxu0 %v3476_v26  ;;  %v182_v58 = vld [vmem:[#allocation3 + $0xf0] sm:$0xff]  ;;  %v185_v59 = vld [vmem:[#allocation3 + $0x108] sm:$0xff]  ;;  %v3514_v60 = vpack.c.bf16 %v181_v57, %v178_v55  ;;  %v184_v0 = vld [vmem:[#allocation3 + $0x100] sm:$0xff] }
  0x4f   :  { %3479 = vmatprep.subr.bf16.mxu0 %v3478_v38  ;;  %v3488_v61 = vpack.c.bf16 %v185_v59, %v182_v58  ;;  %v189_v62 = vld [vmem:[#allocation3 + $0x128] sm:$0xff]  ;;  %v188_v3 = vld [vmem:[#allocation3 + $0x120] sm:$0xff]  ;;  %v191_v4 = vld [vmem:[#allocation3 + $0x138] sm:$0xff] }
  0x50   :  { %3509 = vmatpush3.bf16.msra.mxu1 %v3506_v42  ;;  %v3492_v7 = vpack.c.bf16 %v191_v4, %v188_v3  ;;  %v195_v8 = vld [vmem:[#allocation3 + $0x158] sm:$0xff]  ;;  %v198_v9 = vld [vmem:[#allocation3 + $0x170] sm:$0xff]  ;;  %v193_v12 = vld [vmem:[#allocation3 + $0x148] sm:$0xff] }
  0x51   :  { %3511 = vmatprep.subr.bf16.mxu1 %v3510_v51  ;;  %v190_v10 = vld [vmem:[#allocation3 + $0x130] sm:$0xff]  ;;  %v3494_v11 = vpack.c.bf16 %v198_v9, %v195_v8  ;;  %v197_v14 = vld [vmem:[#allocation3 + $0x168] sm:$0xff]  ;;  %v196_v17 = vld [vmem:[#allocation3 + $0x160] sm:$0xff] }
  0x52   :  { %3481 = vmatpush1.bf16.msra.mxu0 %v3480_v43  ;;  %v194_v13 = vld [vmem:[#allocation3 + $0x150] sm:$0xff]  ;;  %v3522_v15 = vpack.c.bf16 %v193_v12, %v190_v10  ;;  %v199_v18 = vld [vmem:[#allocation3 + $0x178] sm:$0xff] }
  0x53   :  { %3483 = vmatprep.subr.bf16.mxu0 %v3482_v47  ;;  %v3496_v16 = vpack.c.bf16 %v197_v14, %v194_v13  ;;  %v3526_v19 = vpack.c.bf16 %v199_v18, %v196_v17  ;;  %v200_v39 = vld [vmem:[%s4605_s5] sm:$0x7] }
  0x54   :  { %3513 = vmatpush3.bf16.msra.mxu1 %v3510_v51 }
  0x55   :  { %3515 = vmatprep.subr.bf16.mxu1 %v3514_v60 }
  0x56   :  { %3485 = vmatpush1.bf16.msra.mxu0 %v3484_v52 }
  0x57   :  { %3487 = vmatprep.subr.bf16.mxu0 %v3486_v56 }
  0x58   :  { %3517 = vmatpush3.bf16.msra.mxu1 %v3514_v60 }
  0x5a   :  { %3489 = vmatpush1.bf16.msra.mxu0 %v3488_v61  ;;  %v108_v61 = vld [vmem:[%s4632_s19] sm:$0x3] }
  0xd6   :  { %v114_v27 = vpop.xlane.xlu0 %113 }
  0xd7   :  { %v118_v28 = vmul.f32 0.0078125, %v114_v27  ;;  %v2949_v27 = vld [vmem:[%s4630_s23] ss:$0 sm:$0xff] }
  0xd9   :  { %v4136_v29 = vsub.f32 %v109_v1, %v118_v28  ;;  %v3490_v1 = vpack.c.bf16 %v192_v63, %v189_v62 }
  0xda   :  { %v116_v30 = vpop.xlane.xlu0 %115 }
  0xdb   :  { %v119_v31 = vmul.f32 0.0078125, %v116_v30  ;;  %v122_v32 = vmul.f32 %v4136_v29, %v4136_v29  ;;  %3491 = vmatprep.subr.bf16.mxu0 %v3490_v1  ;;  %v2950_v30 = vld [vmem:[%s4631_s26] ss:$0 sm:$0xff] }
  0xdc   :  { %3493 = vmatpush1.bf16.msra.mxu0 %v3492_v7 }
  0xdd   :  { %v4140_v33 = vsub.f32 %v110_v2, %v119_v31  ;;  %124 = vadd.xlane.f32.xlu1 %v122_v32  ;;  %v187_v2 = vld [vmem:[#allocation3 + $0x118] sm:$0xff]  ;;  %3495 = vmatprep.subr.bf16.mxu0 %v3494_v11 }
  0xde   :  { %v3518_v6 = vpack.c.bf16 %v187_v2, %v184_v0 }
  0xdf   :  { %v123_v34 = vmul.f32 %v4140_v33, %v4140_v33 }
  0xe0   :  { %3519 = vmatprep.subr.bf16.mxu1 %v3518_v6  ;;  %3497 = vmatpush1.bf16.msra.mxu0 %v3496_v16 }
  0xe1   :  { %126 = vadd.xlane.f32.xlu1 %v123_v34  ;;  %3521 = vmatpush3.bf16.msra.mxu1 %v3518_v6 }
  0xe2   :  { %3523 = vmatprep.subr.bf16.mxu1 %v3522_v15  ;;  %3251 = vmatprep.subr.mxu0 %v3982_v5 }
  0xe5   :  { %3525 = vmatpush3.bf16.msra.mxu1 %v3522_v15 }
  0xe6   :  { %3527 = vmatprep.subr.bf16.mxu1 %v3526_v19 }
  0xe9   :  { %3529 = vmatpush3.bf16.msra.mxu1 %v3526_v19 }
  0xea   :  { %3246 = vmatprep.subr.mxu1 %v3982_v5 }
 0x16a   :  { %v125_v20 = vpop.xlane.xlu1 %124 }
 0x16b   :  { %v128_v21 = vmul.f32 0.0078125, %v125_v20 }
 0x16d   :  { %v130_v22 = vadd.f32 1e-12, %v128_v21 }
 0x16e   :  { %v127_v23 = vpop.xlane.xlu1 %126 }
 0x16f   :  { %3833 = vrsqrt.f32 %v130_v22  ;;  %v129_v24 = vmul.f32 0.0078125, %v127_v23 }
 0x171   :  { %v131_v25 = vadd.f32 1e-12, %v129_v24 }
 0x173   :  { %3835 = vrsqrt.f32 %v131_v25 }
 0x179   :  { %v3834_v26 = vpop.eup %3833 }
 0x17a   :  { %v134_v28 = vmul.f32 %v3834_v26, %v4136_v29  ;;  %v202_v29 = vlaneseq }
 0x17c   :  { %v142_v31 = vmul.f32 %v2949_v27, %v134_v28 }
 0x17d   :  { %v3836_v32 = vpop.eup %3835 }
 0x17e   :  { %v4154_v34 = vadd.f32 %v2950_v30, %v142_v31  ;;  %v135_v35 = vmul.f32 %v3836_v32, %v4140_v33  ;;  %v4168_v33 = vshrl.u32 %v202_v29, 7 }
 0x180   :  { %282 = vmatmul.mubr.f32.vlgmr.msra.gmra.mrb[0].mxu0 %v4154_v34  ;;  %3243 = vmatprep.mubr.f32.mxu1 %v4154_v34  ;;  %v143_v36 = vmul.f32 %v2949_v27, %v135_v35  ;;  %v4171_v38 = vsub.s32 0, %v4168_v33  ;;  %v4177_v40 = vsub.s32 1, %v4168_v33  ;;  %v212_v42 = vsub.s32 2, %v4168_v33 }
 0x181   :  { %287 = vmatprep.mubr.f32.mxu0 %v3982_v5 }
 0x182   :  { %v4160_v37 = vadd.f32 %v2950_v30, %v143_v36  ;;  %v205_v41 = vrot.slane %v200_v39, %v4171_v38  ;;  %v209_v43 = vrot.slane %v200_v39, %v4177_v40  ;;  %v213_v47 = vrot.slane %v200_v39, %v212_v42 }
 0x183   :  { %v4215_v62 = vrot.slane %v108_v61, %v4171_v38  ;;  %v4221_v9 = vrot.slane %v108_v61, %v4177_v40 }
 0x184   :  { %288 = vmatmul.mubr.f32.gmra.mrb[2].mxu0 %v4160_v37  ;;  %3244 = vmatmul.mubr.f32.vlgmr.msra.gmra.mrb[0].mxu1 %v4160_v37 }
 0x185   :  { %3248 = vmatprep.mubr.msk.f32.mxu1 %vm3983_vm0, %v3982_v5  ;;  %3253 = vmatprep.mubr.msk.f32.mxu0 %vm3983_vm0, %v3982_v5 }
 0x253   :  { %v283_v44 = vpop.f32.mrb[0].mxu0 }
 0x254   :  { %v284_v45 = vadd.f32 %v283_v44, %v205_v41  ;;  %v285_v46 = vpop.f32.mrb[1].mxu0 }
 0x255   :  { %v286_v48 = vadd.f32 %v285_v46, %v209_v43 }
 0x256   :  { %537 = vrot.lane.b32.xlu1 %v284_v45, %s3984_s4 }
 0x257   :  { %539 = vrot.lane.b32.xlu0 %v286_v48, %s3984_s4  ;;  %v289_v49 = vpop.f32.mrb[2].mxu0  ;;  %v3245_v50 = vpop.f32.mrb[0].mxu1  ;;  %3247 = vmatpush3.xpose.msk.msra.mxu1 %vm369_vm1, %v286_v48 }
 0x258   :  { %v4187_v51 = vadd.f32 %v3245_v50, %v213_v47  ;;  %v291_v52 = vpop.f32.mrb[3].mxu0  ;;  %v360_v53 = vpop.f32.mrb[1].mxu1  ;;  %3256 = vmatprep.subr.mxu1 %v3982_v5  ;;  %v290_v56 = vadd.f32 %v289_v49, %v205_v41 }
 0x259   :  { %v292_v54 = vadd.f32 %v291_v52, %v209_v43  ;;  %v4190_v55 = vadd.f32 %v360_v53, %v213_v47 }
 0x25a   :  { %3249 = vmatmul.mubr.msk.f32.vlgmr.msra.gmra.mrb[2].mxu1 %vm369_vm1, %v284_v45 }
 0x25b   :  { %3252 = vmatpush3.msra.mxu0 %v4190_v55  ;;  %878 = vrot.lane.b32.xlu1 %v292_v54, %s3984_s4 }
 0x25c   :  { %3258 = vmatprep.mubr.msk.f32.mxu1 %vm3983_vm0, %v3982_v5  ;;  %3261 = vmatprep.subr.mxu0 %v3982_v5 }
 0x25f   :  { %876 = vrot.lane.b32.xlu1 %v290_v56, %s3984_s4 }
 0x2c8   :  { %v538_v57 = vpop.permute.xlu1 %537 }
 0x2c9   :  { %v540_v58 = vpop.permute.xlu0 %539 }
 0x2ca   :  { %3257 = vmatpush3.xpose.msk.msra.mxu1 %vm369_vm1, %v540_v58 }
 0x2cb   :  { %3266 = vmatprep.subr.mxu1 %v3982_v5 }
 0x2cd   :  { %3259 = vmatmul.mubr.msk.f32.vlgmr.msra.gmra.mrb[4].mxu1 %vm369_vm1, %v538_v57  ;;  %v879_v59 = vpop.permute.xlu1 %878 }
 0x2ce   :  { %3267 = vmatpush3.xpose.msk.msra.mxu1 %vm369_vm1, %v292_v54  ;;  %3268 = vmatprep.mubr.msk.f32.mxu1 %vm3983_vm0, %v3982_v5 }
 0x2cf   :  { %3276 = vmatprep.subr.mxu1 %v3982_v5 }
 0x2d1   :  { %3269 = vmatmul.mubr.msk.f32.vlgmr.msra.gmra.mrb[6].mxu1 %vm369_vm1, %v290_v56  ;;  %v877_v60 = vpop.permute.xlu1 %876 }
 0x2d2   :  { %3277 = vmatpush3.xpose.msk.msra.mxu1 %vm369_vm1, %v879_v59  ;;  %3278 = vmatprep.mubr.msk.f32.mxu1 %vm3983_vm0, %v3982_v5 }
 0x2d5   :  { %3279 = vmatmul.mubr.msk.f32.vlgmr.msra.gmra.mrb[8].mxu1 %vm369_vm1, %v877_v60 }
 0x32d   :  { %v442_v63 = vpop.f32.mrb[2].mxu1 }
 0x32e   :  { %v446_v0 = vmul.f32 0.125, %v442_v63  ;;  %v3250_v1 = vpop.f32.mrb[3].mxu1  ;;  %v1050_v63 = vld [vmem:[%s4606_s6 + $0x8] sm:$0xff] }
 0x330   :  { %v451_v2 = vadd.f32 %v4215_v62, %v446_v0  ;;  %v1051_v0 = vld [vmem:[%s4606_s6 + $0x10] sm:$0xff] }
 0x332   :  { %v453_v3 = vsel %vm452_vm2, %v451_v2, -inf }
 0x333   :  { %454 = vmax.xlane.f32.xlu0 %v453_v3 }
 0x3a0   :  { %v611_v4 = vpop.f32.mrb[4].mxu1 }
 0x3a1   :  { %v615_v6 = vmul.f32 0.125, %v611_v4  ;;  %v3260_v7 = vpop.f32.mrb[5].mxu1 }
 0x3a2   :  { %v1054_v7 = vld [vmem:[%s4606_s6 + $0x28] sm:$0xff] }
 0x3a3   :  { %v616_v8 = vadd.f32 %v615_v6, %v4215_v62  ;;  %v1053_v6 = vld [vmem:[%s4606_s6 + $0x20] sm:$0xff] }
 0x3a4   :  { %v782_v10 = vpop.f32.mrb[6].mxu1 }
 0x3a5   :  { %v786_v11 = vmul.f32 0.125, %v782_v10  ;;  %v3270_v12 = vpop.f32.mrb[7].mxu1  ;;  %v617_v13 = vsel %vm452_vm2, %v616_v8, -inf  ;;  %v3538_v10 = vpack.c.bf16 %v1054_v7, %v1053_v6 }
 0x3a6   :  { %618 = vmax.xlane.f32.xlu1 %v617_v13  ;;  %v1056_v12 = vld [vmem:[%s4606_s6 + $0x38] sm:$0xff] }
 0x3a7   :  { %v791_v14 = vadd.f32 %v4221_v9, %v786_v11  ;;  %v1055_v11 = vld [vmem:[%s4606_s6 + $0x30] sm:$0xff] }
 0x3a8   :  { %v950_v15 = vpop.f32.mrb[8].mxu1  ;;  %v3542_v13 = vpack.c.bf16 %v1056_v12, %v1055_v11  ;;  %v1202_v11 = vld [vmem:[#allocation5 + $0x68] sm:$0xff]  ;;  %v1204_v12 = vld [vmem:[#allocation5 + $0x78] sm:$0xff] }
 0x3a9   :  { %v954_v16 = vmul.f32 0.125, %v950_v15  ;;  %v3280_v17 = vpop.f32.mrb[9].mxu1  ;;  %v792_v18 = vsel %vm452_vm2, %v791_v14, -inf  ;;  %v1058_v15 = vld [vmem:[%s4606_s6 + $0x48] sm:$0xff] }
 0x3aa   :  { %793 = vmax.xlane.f32.xlu0 %v792_v18  ;;  %v1059_v17 = vld [vmem:[%s4606_s6 + $0x50] sm:$0xff]  ;;  %v1060_v18 = vld [vmem:[%s4606_s6 + $0x58] sm:$0xff] }
 0x3ab   :  { %v955_v19 = vadd.f32 %v954_v16, %v4221_v9 }
 0x3ad   :  { %v956_v20 = vsel %vm452_vm2, %v955_v19, -inf }
 0x3ae   :  { %957 = vmax.xlane.f32.xlu0 %v956_v20  ;;  %v1061_v20 = vld [vmem:[%s4606_s6 + $0x60] sm:$0xff] }
 0x3c0   :  { %v455_v21 = vpop.xlane.xlu0 %454 }
 0x3c1   :  { %v456_v22 = vsub.f32 %v451_v2, %v455_v21  ;;  %v1052_v2 = vld [vmem:[%s4606_s6 + $0x18] sm:$0xff]  ;;  %v1062_v21 = vld [vmem:[%s4606_s6 + $0x68] sm:$0xff] }
 0x3c2   :  { %v3534_v4 = vpack.c.bf16 %v1052_v2, %v1051_v0  ;;  %v1199_v2 = vld [vmem:[#allocation5 + $0x50] sm:$0xff] }
 0x3c3   :  { %v457_v23 = vmul.f32 1.442695, %v456_v22  ;;  %v3554_v22 = vpack.c.bf16 %v1062_v21, %v1061_v20  ;;  %v1205_v20 = vld [vmem:[#allocation5 + $0x80] sm:$0xff]  ;;  %v1207_v21 = vld [vmem:[#allocation5 + $0x90] sm:$0xff] }
 0x3c5   :  { %3837 = vpow2.f32 %v457_v23  ;;  %v1063_v23 = vld [vmem:[%s4606_s6 + $0x70] sm:$0xff] }
 0x3cf   :  { %v3838_v24 = vpop.eup %3837 }
 0x3d0   :  { %v459_v25 = vsel %vm452_vm2, %v3838_v24, 0.0 }
 0x3d1   :  { %460 = vadd.xlane.f32.xlu0 %v459_v25 }
 0x433   :  { %v619_v26 = vpop.xlane.xlu1 %618 }
 0x434   :  { %v620_v27 = vsub.f32 %v616_v8, %v619_v26 }
 0x436   :  { %v621_v28 = vmul.f32 1.442695, %v620_v27 }
 0x437   :  { %v794_v30 = vpop.xlane.xlu0 %793 }
 0x438   :  { %3839 = vpow2.f32 %v621_v28  ;;  %v795_v31 = vsub.f32 %v791_v14, %v794_v30  ;;  %v1057_v14 = vld [vmem:[%s4606_s6 + $0x40] sm:$0xff] }
 0x439   :  { %v3546_v16 = vpack.c.bf16 %v1058_v15, %v1057_v14  ;;  %v1201_v14 = vld [vmem:[#allocation5 + $0x60] sm:$0xff]  ;;  %v1203_v15 = vld [vmem:[#allocation5 + $0x70] sm:$0xff] }
 0x43a   :  { %v796_v32 = vmul.f32 1.442695, %v795_v31 }
 0x43b   :  { %v958_v35 = vpop.xlane.xlu0 %957 }
 0x43c   :  { %3841 = vpow2.f32 %v796_v32  ;;  %v959_v36 = vsub.f32 %v955_v19, %v958_v35  ;;  %v3550_v19 = vpack.c.bf16 %v1060_v18, %v1059_v17  ;;  %v1206_v17 = vld [vmem:[#allocation5 + $0x88] sm:$0xff]  ;;  %v1208_v18 = vld [vmem:[#allocation5 + $0x98] sm:$0xff] }
 0x43e   :  { %v960_v29 = vmul.f32 1.442695, %v959_v36 }
 0x440   :  { %3843 = vpow2.f32 %v960_v29 }
 0x442   :  { %v3840_v39 = vpop.eup %3839 }
 0x443   :  { %v623_v41 = vsel %vm452_vm2, %v3840_v39, 0.0 }
 0x444   :  { %624 = vadd.xlane.f32.xlu1 %v623_v41 }
 0x446   :  { %v3842_v43 = vpop.eup %3841 }
 0x447   :  { %v798_v44 = vsel %vm452_vm2, %v3842_v43, 0.0 }
 0x448   :  { %799 = vadd.xlane.f32.xlu0 %v798_v44  ;;  %v2963_v44 = vld [vmem:[%s4607_s7] ss:$0 sm:$0xff] }
 0x44a   :  { %v3844_v45 = vpop.eup %3843 }
 0x44b   :  { %v962_v46 = vsel %vm452_vm2, %v3844_v45, 0.0 }
 0x44c   :  { %963 = vadd.xlane.f32.xlu1 %v962_v46 }
 0x45d   :  { %968 = vrot.lane.b32.xlu1 %v4187_v51, %s3984_s4 }
 0x45e   :  { %629 = vrot.lane.b32.xlu0 %v4190_v55, %s3984_s4  ;;  %v461_v47 = vpop.xlane.xlu0 %460 }
 0x45f   :  { %3845 = vrcp.f32 %v461_v47 }
 0x469   :  { %v3846_v48 = vpop.eup %3845 }
 0x46a   :  { %v463_v49 = vmul.f32 %v3846_v48, %v3838_v24  ;;  %v1064_v24 = vld [vmem:[%s4606_s6 + $0x78] sm:$0xff] }
 0x46b   :  { %v3558_v25 = vpack.c.bf16 %v1064_v24, %v1063_v23  ;;  %v1210_v23 = vld [vmem:[#allocation5 + $0xa8] sm:$0xff]  ;;  %v1212_v24 = vld [vmem:[#allocation5 + $0xb8] sm:$0xff] }
 0x46c   :  { %3254 = vmatmul.mubr.msk.f32.vlgmr.msra.gmra.mrb[4].mxu0 %vm452_vm2, %v463_v49 }
 0x46d   :  { %3263 = vmatprep.mubr.msk.f32.mxu0 %vm3983_vm0, %v3982_v5 }
 0x4d1   :  { %v625_v50 = vpop.xlane.xlu1 %624 }
 0x4d2   :  { %3847 = vrcp.f32 %v625_v50  ;;  %v1190_v50 = vld [vmem:[#allocation5 + $0x8] sm:$0xff] }
 0x4d5   :  { %v800_v52 = vpop.xlane.xlu0 %799 }
 0x4d6   :  { %3849 = vrcp.f32 %v800_v52  ;;  %v1192_v52 = vld [vmem:[#allocation5 + $0x18] sm:$0xff] }
 0x4d9   :  { %v964_v53 = vpop.xlane.xlu1 %963  ;;  %v630_v54 = vpop.permute.xlu0 %629 }
 0x4da   :  { %3851 = vrcp.f32 %v964_v53  ;;  %3262 = vmatpush3.msra.mxu0 %v630_v54  ;;  %v1189_v53 = vld [vmem:[#allocation5] sm:$0xff]  ;;  %v3562_v54 = vpack.c.bf16 %v1192_v52, %v1190_v50 }
 0x4db   :  { %3271 = vmatprep.subr.mxu0 %v3982_v5 }
 0x4dc   :  { %v3848_v55 = vpop.eup %3847 }
 0x4dd   :  { %v627_v56 = vmul.f32 %v3848_v55, %v3840_v39  ;;  %v969_v59 = vpop.permute.xlu1 %968  ;;  %v1191_v55 = vld [vmem:[#allocation5 + $0x10] sm:$0xff] }
 0x4df   :  { %3264 = vmatmul.mubr.msk.f32.vlgmr.msra.gmra.mrb[6].mxu0 %vm452_vm2, %v627_v56  ;;  %v1194_v56 = vld [vmem:[#allocation5 + $0x28] sm:$0xff] }
 0x4e0   :  { %v3850_v57 = vpop.eup %3849  ;;  %3272 = vmatpush3.msra.mxu0 %v4187_v51  ;;  %3273 = vmatprep.mubr.msk.f32.mxu0 %vm3983_vm0, %v3982_v5  ;;  %v1049_v51 = vld [vmem:[%s4606_s6] sm:$0xff] }
 0x4e1   :  { %v802_v58 = vmul.f32 %v3850_v57, %v3842_v43  ;;  %3281 = vmatprep.subr.mxu0 %v3982_v5  ;;  %v3530_v1 = vpack.c.bf16 %v1050_v63, %v1049_v51  ;;  %v1196_v57 = vld [vmem:[#allocation5 + $0x38] sm:$0xff]  ;;  %v1198_v51 = vld [vmem:[#allocation5 + $0x48] sm:$0xff] }
 0x4e2   :  { %v1200_v63 = vld [vmem:[#allocation5 + $0x58] sm:$0xff] }
 0x4e3   :  { %3274 = vmatmul.mubr.msk.f32.vlgmr.msra.gmra.mrb[8].mxu0 %vm452_vm2, %v802_v58  ;;  %3531 = vmatprep.subr.bf16.mxu1 %v3530_v1  ;;  %v3564_v58 = vpack.c.bf16 %v1191_v55, %v1189_v53  ;;  %v4313_v55 = vld [vmem:[%s4612_s12] ss:$0 sm:$0xff] }
 0x4e4   :  { %v3852_v60 = vpop.eup %3851  ;;  %3282 = vmatpush3.msra.mxu0 %v969_v59  ;;  %3283 = vmatprep.mubr.msk.f32.mxu0 %vm3983_vm0, %v3982_v5  ;;  %v3566_v59 = vpack.c.bf16 %v1196_v57, %v1194_v56  ;;  %v4318_v57 = vld [vmem:[%s4613_s13] ss:$0 sm:$0xff] }
 0x4e5   :  { %v966_v61 = vmul.f32 %v3852_v60, %v3844_v45  ;;  %3533 = vmatpush3.bf16.msra.mxu1 %v3530_v1  ;;  %v1193_v60 = vld [vmem:[#allocation5 + $0x20] sm:$0xff]  ;;  %3563 = vmatprep.subr.bf16.mxu0 %v3562_v54  ;;  %v3570_v1 = vpack.c.bf16 %v1200_v63, %v1198_v51 }
 0x4e6   :  { %3535 = vmatprep.subr.bf16.mxu1 %v3534_v4  ;;  %v1330_v51 = vld [vmem:[#allocation7] sm:$0xff] }
 0x4e7   :  { %3284 = vmatmul.mubr.msk.f32.vlgmr.msra.gmra.mrb[10].mxu0 %vm452_vm2, %v966_v61  ;;  %v1195_v61 = vld [vmem:[#allocation5 + $0x30] sm:$0xff] }
 0x4e8   :  { %1297 = vmatprep.mubr.f32.mxu0 %v3982_v5  ;;  %3565 = vmatpush1.bf16.msra.mxu0 %v3564_v58  ;;  %v3568_v0 = vpack.c.bf16 %v1195_v61, %v1193_v60  ;;  %v1346_v60 = vld [vmem:[#allocation7 + $0x80] sm:$0xff]  ;;  %v1347_v61 = vld [vmem:[#allocation7 + $0x88] sm:$0xff] }
 0x4e9   :  { %3537 = vmatpush3.bf16.msra.mxu1 %v3534_v4  ;;  %3567 = vmatprep.subr.bf16.mxu0 %v3566_v59  ;;  %v3594_v63 = vpack.c.bf16 %v1347_v61, %v1346_v60 }
 0x4ea   :  { %3539 = vmatprep.subr.bf16.mxu1 %v3538_v10 }
 0x4ec   :  { %3569 = vmatpush1.bf16.msra.mxu0 %v3568_v0  ;;  %v1331_v0 = vld [vmem:[#allocation7 + $0x8] sm:$0xff] }
 0x4ed   :  { %3541 = vmatpush3.bf16.msra.mxu1 %v3538_v10  ;;  %3571 = vmatprep.subr.bf16.mxu0 %v3570_v1  ;;  %v1348_v1 = vld [vmem:[#allocation7 + $0x90] sm:$0xff] }
 0x4ee   :  { %3543 = vmatprep.subr.bf16.mxu1 %v3542_v13 }
 0x4f1   :  { %3545 = vmatpush3.bf16.msra.mxu1 %v3542_v13  ;;  %v3574_v13 = vpack.c.bf16 %v1204_v12, %v1202_v11  ;;  %v1334_v12 = vld [vmem:[#allocation7 + $0x20] sm:$0xff] }
 0x4f2   :  { %3547 = vmatprep.subr.bf16.mxu1 %v3546_v16 }
 0x4f5   :  { %3549 = vmatpush3.bf16.msra.mxu1 %v3546_v16  ;;  %v3576_v16 = vpack.c.bf16 %v1203_v15, %v1201_v14  ;;  %v1352_v15 = vld [vmem:[#allocation7 + $0xb0] sm:$0xff] }
 0x4f6   :  { %3551 = vmatprep.subr.bf16.mxu1 %v3550_v19 }
 0x4f9   :  { %3553 = vmatpush3.bf16.msra.mxu1 %v3550_v19  ;;  %v3578_v19 = vpack.c.bf16 %v1208_v18, %v1206_v17  ;;  %v1336_v18 = vld [vmem:[#allocation7 + $0x30] sm:$0xff] }
 0x4fa   :  { %3555 = vmatprep.subr.bf16.mxu1 %v3554_v22 }
 0x4fd   :  { %3557 = vmatpush3.bf16.msra.mxu1 %v3554_v22  ;;  %v3580_v22 = vpack.c.bf16 %v1207_v21, %v1205_v20  ;;  %v1354_v21 = vld [vmem:[#allocation7 + $0xc0] sm:$0xff] }
 0x4fe   :  { %3559 = vmatprep.subr.bf16.mxu1 %v3558_v25 }
 0x501   :  { %3561 = vmatpush3.bf16.msra.mxu1 %v3558_v25  ;;  %v1209_v25 = vld [vmem:[#allocation5 + $0xa0] sm:$0xff] }
 0x502   :  { %3595 = vmatprep.subr.bf16.mxu1 %v3594_v63 }
 0x53f   :  { %v533_v3 = vpop.f32.mrb[4].mxu0 }
 0x540   :  { %v3255_v8 = vpop.f32.mrb[5].mxu0 }
 0x5b2   :  { %v701_v26 = vpop.f32.mrb[6].mxu0 }
 0x5b3   :  { %v3265_v27 = vpop.f32.mrb[7].mxu0 }
 0x5b6   :  { %v872_v28 = vpop.f32.mrb[8].mxu0 }
 0x5b7   :  { %v3275_v30 = vpop.f32.mrb[9].mxu0 }
 0x5b8   :  { %v1216_v30 = vld [vmem:[#allocation5 + $0xd8] sm:$0xff] }
 0x5ba   :  { %v1040_v31 = vpop.f32.mrb[10].mxu0 }
 0x5bb   :  { %v3823_v32 = vpack.i.bf16 %v1040_v31, %v701_v26  ;;  %v3285_v35 = vpop.f32.mrb[11].mxu0  ;;  %v1211_v26 = vld [vmem:[#allocation5 + $0xb0] sm:$0xff]  ;;  %v1213_v31 = vld [vmem:[#allocation5 + $0xc0] sm:$0xff] }
 0x5bc   :  { %v3584_v27 = vpack.c.bf16 %v1211_v26, %v1209_v25  ;;  %v1215_v35 = vld [vmem:[#allocation5 + $0xd0] sm:$0xff]  ;;  %v1339_v25 = vld [vmem:[#allocation7 + $0x48] sm:$0xff] }
 0x5bd   :  { %3824 = vrot.lane.b32.xlu1 %v3823_v32, %s3984_s4  ;;  %v1356_v26 = vld [vmem:[#allocation7 + $0xd0] sm:$0xff] }
 0x62f   :  { %v3825_v36 = vpop.permute.xlu1 %3824 }
 0x630   :  { %v3827_v29 = vunpack.i.h.bf16 %v3825_v36  ;;  %v3826_v39 = vunpack.i.l.bf16 %v3825_v36  ;;  %v1218_v36 = vld [vmem:[#allocation5 + $0xe8] sm:$0xff] }
 0x632   :  { %v709_v41 = vsel %vm369_vm1, %v533_v3, %v3826_v39  ;;  %v1048_v43 = vsel %vm369_vm1, %v872_v28, %v3827_v29  ;;  %v1214_v28 = vld [vmem:[#allocation5 + $0xc8] sm:$0xff]  ;;  %v1220_v29 = vld [vmem:[#allocation5 + $0xf8] sm:$0xff]  ;;  %v3588_v39 = vpack.c.bf16 %v1215_v35, %v1213_v31  ;;  %v1358_v35 = vld [vmem:[#allocation7 + $0xe0] sm:$0xff] }
 0x633   :  { %3318 = vmatprep.mubr.f32.mxu1 %v709_v41  ;;  %v3586_v32 = vpack.c.bf16 %v1216_v30, %v1214_v28  ;;  %v3590_v41 = vpack.c.bf16 %v1220_v29, %v1218_v36  ;;  %v1340_v30 = vld [vmem:[#allocation7 + $0x50] sm:$0xff]  ;;  %v1341_v31 = vld [vmem:[#allocation7 + $0x58] sm:$0xff]  ;;  %v1359_v36 = vld [vmem:[#allocation7 + $0xe8] sm:$0xff] }
 0x634   :  { %3319 = vmatmul.mubr.f32.vlgmr.msra.gmra.mrb[10].mxu1 %v1048_v43  ;;  %v1217_v43 = vld [vmem:[#allocation5 + $0xe0] sm:$0xff]  ;;  %v3618_v29 = vpack.c.bf16 %v1359_v36, %v1358_v35  ;;  %v1488_v35 = vld [vmem:[#allocation3 + $0x188] sm:$0xff] }
 0x635   :  { %v1491_v36 = vld [vmem:[#allocation3 + $0x1a0] sm:$0xff] }
 0x707   :  { %v3320_v45 = vpop.f32.mrb[10].mxu1 }
 0x708   :  { %v1144_v46 = vadd.f32 %v3320_v45, %v2963_v44  ;;  %v1138_v47 = vpop.f32.mrb[11].mxu1 }
 0x709   :  { %v1139_v48 = vadd.f32 %v2963_v44, %v1138_v47  ;;  %v1219_v44 = vld [vmem:[#allocation5 + $0xf0] sm:$0xff] }
 0x70a   :  { %v1148_v10 = vadd.f32 %v1144_v46, %v4160_v37  ;;  %v3582_v37 = vpack.c.bf16 %v1212_v24, %v1210_v23  ;;  %v3592_v45 = vpack.c.bf16 %v1219_v44, %v1217_v43  ;;  %v1338_v24 = vld [vmem:[#allocation7 + $0x40] sm:$0xff]  ;;  %v1360_v44 = vld [vmem:[#allocation7 + $0xf0] sm:$0xff] }
 0x70b   :  { %v1147_v49 = vadd.f32 %v1139_v48, %v4154_v34  ;;  %v1197_v34 = vld [vmem:[#allocation5 + $0x40] sm:$0xff] }
 0x70c   :  { %v3572_v3 = vpack.c.bf16 %v1199_v2, %v1197_v34  ;;  %v1349_v34 = vld [vmem:[#allocation7 + $0x98] sm:$0xff]  ;;  %v3596_v2 = vpack.c.bf16 %v1331_v0, %v1330_v51 }
 0x70d   :  { %1151 = vadd.xlane.f32.xlu1 %v1147_v49  ;;  %v1221_v51 = vld [vmem:[%s4609_s9] sm:$0x3] }
 0x70e   :  { %3573 = vmatpush1.bf16.msra.mxu0 %v3572_v3  ;;  %v3598_v3 = vpack.c.bf16 %v1349_v34, %v1348_v1  ;;  %3597 = vmatpush3.bf16.msra.mxu1 %v3596_v2  ;;  %v1226_v63 = vrot.slane %v1221_v51, %v4171_v38  ;;  %v1230_v0 = vrot.slane %v1221_v51, %v4177_v40 }
 0x70f   :  { %3575 = vmatprep.subr.bf16.mxu0 %v3574_v13  ;;  %v1335_v13 = vld [vmem:[#allocation7 + $0x28] sm:$0xff] }
 0x710   :  { %3599 = vmatprep.subr.bf16.mxu1 %v3598_v3  ;;  %v3604_v14 = vpack.c.bf16 %v1335_v13, %v1334_v12 }
 0x712   :  { %3577 = vmatpush1.bf16.msra.mxu0 %v3576_v16  ;;  %v1353_v16 = vld [vmem:[#allocation7 + $0xb8] sm:$0xff] }
 0x713   :  { %3579 = vmatprep.subr.bf16.mxu0 %v3578_v19  ;;  %v3606_v17 = vpack.c.bf16 %v1353_v16, %v1352_v15  ;;  %v1337_v19 = vld [vmem:[#allocation7 + $0x38] sm:$0xff] }
 0x714   :  { %v3608_v20 = vpack.c.bf16 %v1337_v19, %v1336_v18 }
 0x716   :  { %3581 = vmatpush1.bf16.msra.mxu0 %v3580_v22  ;;  %v1355_v22 = vld [vmem:[#allocation7 + $0xc8] sm:$0xff] }
 0x717   :  { %3583 = vmatprep.subr.bf16.mxu0 %v3582_v37  ;;  %v3610_v23 = vpack.c.bf16 %v1355_v22, %v1354_v21  ;;  %v3612_v37 = vpack.c.bf16 %v1339_v25, %v1338_v24 }
 0x71a   :  { %3585 = vmatpush1.bf16.msra.mxu0 %v3584_v27  ;;  %v1357_v27 = vld [vmem:[#allocation7 + $0xd8] sm:$0xff] }
 0x71b   :  { %3587 = vmatprep.subr.bf16.mxu0 %v3586_v32  ;;  %v3614_v28 = vpack.c.bf16 %v1357_v27, %v1356_v26  ;;  %v3616_v32 = vpack.c.bf16 %v1341_v31, %v1340_v30  ;;  %v2966_v27 = vld [vmem:[%s4611_s11] ss:$0 sm:$0xff] }
 0x71e   :  { %3589 = vmatpush1.bf16.msra.mxu0 %v3588_v39  ;;  %v1342_v39 = vld [vmem:[#allocation7 + $0x60] sm:$0xff] }
 0x71f   :  { %3591 = vmatprep.subr.bf16.mxu0 %v3590_v41  ;;  %v1343_v41 = vld [vmem:[#allocation7 + $0x68] sm:$0xff] }
 0x720   :  { %v3620_v43 = vpack.c.bf16 %v1343_v41, %v1342_v39  ;;  %v3626_v39 = vpack.c.bf16 %v1491_v36, %v1488_v35  ;;  %v1490_v41 = vld [vmem:[#allocation3 + $0x198] sm:$0xff]  ;;  %v1489_v35 = vld [vmem:[#allocation3 + $0x190] sm:$0xff]  ;;  %v1492_v36 = vld [vmem:[#allocation3 + $0x1a8] sm:$0xff] }
 0x722   :  { %3593 = vmatpush1.bf16.msra.mxu0 %v3592_v45  ;;  %v1361_v45 = vld [vmem:[#allocation7 + $0xf8] sm:$0xff] }
 0x723   :  { %3627 = vmatprep.subr.bf16.mxu0 %v3626_v39  ;;  %v3658_v39 = vpack.c.bf16 %v1492_v36, %v1489_v35 }
 0x79a   :  { %v1152_v4 = vpop.xlane.xlu1 %1151 }
 0x79b   :  { %v1155_v6 = vmul.f32 0.0078125, %v1152_v4  ;;  %v1332_v4 = vld [vmem:[#allocation7 + $0x10] sm:$0xff] }
 0x79d   :  { %v1157_v7 = vsub.f32 %v1147_v49, %v1155_v6  ;;  %v1333_v6 = vld [vmem:[#allocation7 + $0x18] sm:$0xff] }
 0x79f   :  { %v1159_v8 = vmul.f32 %v1157_v7, %v1157_v7 }
 0x7a1   :  { %1161 = vadd.xlane.f32.xlu0 %v1159_v8  ;;  %v1351_v8 = vld [vmem:[#allocation7 + $0xa8] sm:$0xff] }
 0x7a5   :  { %1153 = vadd.xlane.f32.xlu0 %v1148_v10 }
 0x82e   :  { %v1162_v46 = vpop.xlane.xlu0 %1161 }
 0x82f   :  { %v1165_v47 = vmul.f32 0.0078125, %v1162_v46  ;;  %v3622_v46 = vpack.c.bf16 %v1361_v45, %v1360_v44  ;;  %v1497_v44 = vld [vmem:[#allocation3 + $0x1d0] sm:$0xff] }
 0x831   :  { %v1167_v48 = vadd.f32 1e-12, %v1165_v47  ;;  %v1344_v47 = vld [vmem:[#allocation7 + $0x70] sm:$0xff] }
 0x832   :  { %v1154_v49 = vpop.xlane.xlu0 %1153 }
 0x833   :  { %3853 = vrsqrt.f32 %v1167_v48  ;;  %v1156_v50 = vmul.f32 0.0078125, %v1154_v49  ;;  %v1345_v48 = vld [vmem:[#allocation7 + $0x78] sm:$0xff] }
 0x834   :  { %v3624_v49 = vpack.c.bf16 %v1345_v48, %v1344_v47  ;;  %v1493_v47 = vld [vmem:[#allocation3 + $0x1b0] sm:$0xff]  ;;  %v1496_v48 = vld [vmem:[#allocation3 + $0x1c8] sm:$0xff] }
 0x835   :  { %v4306_v52 = vsub.f32 %v1148_v10, %v1156_v50  ;;  %v3600_v10 = vpack.c.bf16 %v1333_v6, %v1332_v4 }
 0x837   :  { %v1160_v53 = vmul.f32 %v4306_v52, %v4306_v52  ;;  %3601 = vmatpush3.bf16.msra.mxu1 %v3600_v10 }
 0x839   :  { %1163 = vadd.xlane.f32.xlu0 %v1160_v53 }
 0x83d   :  { %v3854_v54 = vpop.eup %3853 }
 0x83e   :  { %v1171_v56 = vmul.f32 %v3854_v54, %v1157_v7  ;;  %v1350_v7 = vld [vmem:[#allocation7 + $0xa0] sm:$0xff] }
 0x83f   :  { %v3602_v11 = vpack.c.bf16 %v1351_v8, %v1350_v7 }
 0x840   :  { %v1179_v58 = vmul.f32 %v4313_v55, %v1171_v56 }
 0x841   :  { %3603 = vmatprep.subr.bf16.mxu1 %v3602_v11 }
 0x842   :  { %v4322_v59 = vadd.f32 %v4318_v57, %v1179_v58  ;;  %3605 = vmatpush3.bf16.msra.mxu1 %v3604_v14 }
 0x843   :  { %3607 = vmatprep.subr.bf16.mxu1 %v3606_v17 }
 0x844   :  { %1298 = vmatmul.mubr.f32.vlgmr.msra.gmra.mrb[12].mxu0 %v4322_v59 }
 0x845   :  { %1303 = vmatprep.mubr.f32.mxu0 %v3982_v5 }
 0x846   :  { %3609 = vmatpush3.bf16.msra.mxu1 %v3608_v20 }
 0x847   :  { %3611 = vmatprep.subr.bf16.mxu1 %v3610_v23 }
 0x84a   :  { %3613 = vmatpush3.bf16.msra.mxu1 %v3612_v37 }
 0x84b   :  { %3615 = vmatprep.subr.bf16.mxu1 %v3614_v28 }
 0x84e   :  { %3617 = vmatpush3.bf16.msra.mxu1 %v3616_v32 }
 0x84f   :  { %3619 = vmatprep.subr.bf16.mxu1 %v3618_v29  ;;  %v1487_v29 = vld [vmem:[#allocation3 + $0x180] sm:$0xff] }
 0x850   :  { %v3628_v45 = vpack.c.bf16 %v1490_v41, %v1487_v29  ;;  %v1495_v29 = vld [vmem:[#allocation3 + $0x1c0] sm:$0xff]  ;;  %v1498_v41 = vld [vmem:[#allocation3 + $0x1d8] sm:$0xff] }
 0x852   :  { %3621 = vmatpush3.bf16.msra.mxu1 %v3620_v43  ;;  %v1494_v43 = vld [vmem:[#allocation3 + $0x1b8] sm:$0xff]  ;;  %3629 = vmatpush1.bf16.msra.mxu0 %v3628_v45  ;;  %v1504_v45 = vld [vmem:[#allocation3 + $0x208] sm:$0xff] }
 0x853   :  { %3623 = vmatprep.subr.bf16.mxu1 %v3622_v46  ;;  %v3630_v46 = vpack.c.bf16 %v1497_v44, %v1494_v43  ;;  %v3662_v43 = vpack.c.bf16 %v1498_v41, %v1495_v29  ;;  %v1501_v44 = vld [vmem:[#allocation3 + $0x1f0] sm:$0xff] }
 0x855   :  { %3631 = vmatprep.subr.bf16.mxu0 %v3630_v46  ;;  %v3666_v46 = vpack.c.bf16 %v1504_v45, %v1501_v44 }
 0x856   :  { %3625 = vmatpush3.bf16.msra.mxu1 %v3624_v49  ;;  %v1500_v49 = vld [vmem:[#allocation3 + $0x1e8] sm:$0xff] }
 0x857   :  { %3659 = vmatprep.subr.bf16.mxu1 %v3658_v39 }
 0x8c6   :  { %v1164_v50 = vpop.xlane.xlu0 %1163 }
 0x8c7   :  { %v1166_v53 = vmul.f32 0.0078125, %v1164_v50  ;;  %v1503_v50 = vld [vmem:[#allocation3 + $0x200] sm:$0xff] }
 0x8c9   :  { %v1168_v54 = vadd.f32 1e-12, %v1166_v53  ;;  %v3632_v53 = vpack.c.bf16 %v1496_v48, %v1493_v47 }
 0x8cb   :  { %3855 = vrsqrt.f32 %v1168_v54  ;;  %v3634_v54 = vpack.c.bf16 %v1503_v50, %v1500_v49  ;;  %3633 = vmatpush1.bf16.msra.mxu0 %v3632_v53 }
 0x8cd   :  { %3635 = vmatprep.subr.bf16.mxu0 %v3634_v54 }
 0x8d5   :  { %v3856_v56 = vpop.eup %3855 }
 0x8d6   :  { %v1172_v58 = vmul.f32 %v3856_v56, %v4306_v52  ;;  %v1502_v56 = vld [vmem:[#allocation3 + $0x1f8] sm:$0xff] }
 0x8d8   :  { %v1180_v60 = vmul.f32 %v4313_v55, %v1172_v58 }
 0x8da   :  { %v4329_v61 = vadd.f32 %v4318_v57, %v1180_v60 }
 0x8dc   :  { %1304 = vmatmul.mubr.f32.gmra.mrb[14].mxu0 %v4329_v61 }
 0x8dd   :  { %1617 = vmatprep.mubr.f32.mxu0 %v3982_v5 }
 0x917   :  { %v1299_v1 = vpop.f32.mrb[12].mxu0 }
 0x918   :  { %v1300_v34 = vadd.f32 %v1299_v1, %v1226_v63  ;;  %v1301_v52 = vpop.f32.mrb[13].mxu0 }
 0x919   :  { %v1302_v2 = vadd.f32 %v1301_v52, %v1230_v0 }
 0x91a   :  { %v1314_v55 = vmul.f32 0.70710677, %v1300_v34  ;;  %v1310_v10 = vmul.f32 0.5, %v1300_v34 }
 0x91b   :  { %v1315_v3 = vmul.f32 0.70710677, %v1302_v2  ;;  %v1311_v7 = vmul.f32 0.5, %v1302_v2 }
 0x91c   :  { %3857 = verf.f32 %v1314_v55 }
 0x91d   :  { %3859 = verf.f32 %v1315_v3  ;;  %v1506_v3 = vld [vmem:[#allocation3 + $0x218] sm:$0xff] }
 0x926   :  { %v3858_v57 = vpop.eup %3857 }
 0x927   :  { %v3860_v4 = vpop.eup %3859  ;;  %v1322_v6 = vadd.f32 1.0, %v3858_v57  ;;  %v1509_v57 = vld [vmem:[#allocation3 + $0x230] sm:$0xff] }
 0x928   :  { %v1323_v8 = vadd.f32 1.0, %v3860_v4  ;;  %v3638_v4 = vpack.c.bf16 %v1509_v57, %v1506_v3  ;;  %v1519_v57 = vld [vmem:[#allocation3 + $0x280] sm:$0xff] }
 0x929   :  { %v1326_v12 = vmul.f32 %v1322_v6, %v1310_v10  ;;  %v1505_v6 = vld [vmem:[#allocation3 + $0x210] sm:$0xff]  ;;  %v1512_v10 = vld [vmem:[#allocation3 + $0x248] sm:$0xff] }
 0x92a   :  { %v1327_v11 = vmul.f32 %v1323_v8, %v1311_v7  ;;  %v1508_v7 = vld [vmem:[#allocation3 + $0x228] sm:$0xff] }
 0x92b   :  { %v3640_v8 = vpack.c.bf16 %v1508_v7, %v1505_v6  ;;  %v1525_v7 = vld [vmem:[#allocation3 + $0x2b0] sm:$0xff] }
 0x92c   :  { %1433 = vmatprep.mubr.f32.mxu1 %v1327_v11  ;;  %v1515_v11 = vld [vmem:[#allocation3 + $0x260] sm:$0xff] }
 0x92d   :  { %1434 = vmatmul.mubr.f32.vlgmr.msra.gmra.mrb[12].mxu1 %v1326_v12  ;;  %v3642_v12 = vpack.c.bf16 %v1515_v11, %v1512_v10  ;;  %v1531_v11 = vld [vmem:[#allocation3 + $0x2e0] sm:$0xff] }
 0x92e   :  { %3661 = vmatpush3.bf16.msra.mxu1 %v3658_v39 }
 0x92f   :  { %3663 = vmatprep.subr.bf16.mxu1 %v3662_v43 }
 0x932   :  { %3665 = vmatpush3.bf16.msra.mxu1 %v3662_v43 }
 0x933   :  { %3667 = vmatprep.subr.bf16.mxu1 %v3666_v46 }
 0x936   :  { %3669 = vmatpush3.bf16.msra.mxu1 %v3666_v46 }
 0x9af   :  { %v1305_v13 = vpop.f32.mrb[14].mxu0 }
 0x9b0   :  { %v1306_v14 = vadd.f32 %v1305_v13, %v1226_v63  ;;  %v1307_v15 = vpop.f32.mrb[15].mxu0  ;;  %v1511_v13 = vld [vmem:[#allocation3 + $0x240] sm:$0xff] }
 0x9b1   :  { %v1308_v16 = vadd.f32 %v1307_v15, %v1230_v0 }
 0x9b2   :  { %v1316_v17 = vmul.f32 0.70710677, %v1306_v14  ;;  %v1312_v24 = vmul.f32 0.5, %v1306_v14  ;;  %v1514_v14 = vld [vmem:[#allocation3 + $0x258] sm:$0xff] }
 0x9b3   :  { %v1317_v18 = vmul.f32 0.70710677, %v1308_v16  ;;  %v1313_v22 = vmul.f32 0.5, %v1308_v16  ;;  %v3644_v15 = vpack.c.bf16 %v1514_v14, %v1511_v13  ;;  %v1521_v16 = vld [vmem:[#allocation3 + $0x290] sm:$0xff] }
 0x9b4   :  { %3861 = verf.f32 %v1316_v17 }
 0x9b5   :  { %3863 = verf.f32 %v1317_v18  ;;  %v1517_v18 = vld [vmem:[#allocation3 + $0x270] sm:$0xff] }
 0x9be   :  { %v3862_v19 = vpop.eup %3861 }
 0x9bf   :  { %v3864_v20 = vpop.eup %3863  ;;  %v1324_v21 = vadd.f32 1.0, %v3862_v19  ;;  %v1520_v19 = vld [vmem:[#allocation3 + $0x288] sm:$0xff] }
 0x9c0   :  { %v1325_v23 = vadd.f32 1.0, %v3864_v20  ;;  %v3648_v20 = vpack.c.bf16 %v1520_v19, %v1517_v18 }
 0x9c1   :  { %v1328_v37 = vmul.f32 %v1324_v21, %v1312_v24  ;;  %v1524_v21 = vld [vmem:[#allocation3 + $0x2a8] sm:$0xff]  ;;  %v1523_v24 = vld [vmem:[#allocation3 + $0x2a0] sm:$0xff] }
 0x9c2   :  { %v1329_v25 = vmul.f32 %v1325_v23, %v1313_v22  ;;  %v1527_v22 = vld [vmem:[#allocation3 + $0x2c0] sm:$0xff] }
 0x9c3   :  { %v3650_v23 = vpack.c.bf16 %v1527_v22, %v1524_v21 }
 0x9c4   :  { %1438 = vmatprep.mubr.f32.mxu1 %v1329_v25  ;;  %v1526_v25 = vld [vmem:[#allocation3 + $0x2b8] sm:$0xff] }
 0x9c5   :  { %1439 = vmatmul.mubr.f32.gmra.mrb[14].mxu1 %v1328_v37  ;;  %v3652_v37 = vpack.c.bf16 %v1526_v25, %v1523_v24 }
 0xa00   :  { %v3098_v26 = vpop.f32.mrb[12].mxu1 }
 0xa01   :  { %v3099_v28 = vpop.f32.mrb[13].mxu1 }
 0xa02   :  { %v3100_v30 = vadd.f32 %v3099_v28, %v3098_v26  ;;  %v1530_v26 = vld [vmem:[#allocation3 + $0x2d8] sm:$0xff]  ;;  %v1529_v28 = vld [vmem:[#allocation3 + $0x2d0] sm:$0xff] }
 0xa04   :  { %v1436_v31 = vadd.f32 %v3100_v30, %v2966_v27 }
 0xa06   :  { %v1444_v32 = vadd.f32 %v1436_v31, %v4322_v59  ;;  %v1499_v59 = vld [vmem:[#allocation3 + $0x1e0] sm:$0xff]  ;;  %v1532_v31 = vld [vmem:[#allocation3 + $0x2e8] sm:$0xff] }
 0xa07   :  { %v3636_v58 = vpack.c.bf16 %v1502_v56, %v1499_v59 }
 0xa08   :  { %1448 = vadd.xlane.f32.xlu1 %v1444_v32 }
 0xa09   :  { %3637 = vmatpush1.bf16.msra.mxu0 %v3636_v58  ;;  %v2967_v58 = vld [vmem:[%s4614_s14] ss:$0 sm:$0xff] }
 0xa0a   :  { %3639 = vmatprep.subr.bf16.mxu0 %v3638_v4  ;;  %v1522_v4 = vld [vmem:[#allocation3 + $0x298] sm:$0xff] }
 0xa0b   :  { %v3678_v6 = vpack.c.bf16 %v1522_v4, %v1519_v57 }
 0xa0d   :  { %3641 = vmatpush1.bf16.msra.mxu0 %v3640_v8  ;;  %v1528_v8 = vld [vmem:[#allocation3 + $0x2c8] sm:$0xff] }
 0xa0e   :  { %3643 = vmatprep.subr.bf16.mxu0 %v3642_v12  ;;  %v3682_v10 = vpack.c.bf16 %v1528_v8, %v1525_v7  ;;  %v1534_v12 = vld [vmem:[#allocation3 + $0x2f8] sm:$0xff] }
 0xa0f   :  { %v3686_v13 = vpack.c.bf16 %v1534_v12, %v1531_v11 }
 0xa11   :  { %3645 = vmatpush1.bf16.msra.mxu0 %v3644_v15 }
 0xa95   :  { %v1449_v60 = vpop.xlane.xlu1 %1448 }
 0xa96   :  { %v1452_v51 = vmul.f32 0.0078125, %v1449_v60 }
 0xa98   :  { %v4342_v63 = vsub.f32 %v1444_v32, %v1452_v51  ;;  %v3101_v0 = vpop.f32.mrb[14].mxu1  ;;  %v3656_v32 = vpack.c.bf16 %v1532_v31, %v1529_v28  ;;  %v2968_v51 = vld [vmem:[%s4615_s15] ss:$0 sm:$0xff] }
 0xa99   :  { %v3102_v1 = vpop.f32.mrb[15].mxu1 }
 0xa9a   :  { %v3103_v34 = vadd.f32 %v3102_v1, %v3101_v0  ;;  %v1456_v52 = vmul.f32 %v4342_v63, %v4342_v63 }
 0xa9c   :  { %v1441_v2 = vadd.f32 %v3103_v34, %v2966_v27  ;;  %1458 = vadd.xlane.f32.xlu0 %v1456_v52  ;;  %v1533_v27 = vld [vmem:[#allocation3 + $0x2f0] sm:$0xff]  ;;  %v1507_v34 = vld [vmem:[#allocation3 + $0x220] sm:$0xff]  ;;  %v1510_v52 = vld [vmem:[#allocation3 + $0x238] sm:$0xff] }
 0xa9d   :  { %v3654_v30 = vpack.c.bf16 %v1533_v27, %v1530_v26 }
 0xa9e   :  { %v4347_v55 = vadd.f32 %v1441_v2, %v4329_v61  ;;  %v1518_v61 = vld [vmem:[#allocation3 + $0x278] sm:$0xff]  ;;  %v3670_v2 = vpack.c.bf16 %v1510_v52, %v1507_v34 }
 0xa9f   :  { %v3646_v17 = vpack.c.bf16 %v1521_v16, %v1518_v61 }
 0xaa0   :  { %1450 = vadd.xlane.f32.xlu1 %v4347_v55  ;;  %3671 = vmatprep.subr.bf16.mxu1 %v3670_v2 }
 0xaa1   :  { %3647 = vmatprep.subr.bf16.mxu0 %v3646_v17  ;;  %3673 = vmatpush3.bf16.msra.mxu1 %v3670_v2 }
 0xaa2   :  { %3649 = vmatpush1.bf16.msra.mxu0 %v3648_v20  ;;  %v2969_v20 = vld [vmem:[%s4605_s5 + $0x3] sm:$0x7] }
 0xaa3   :  { %3651 = vmatprep.subr.bf16.mxu0 %v3650_v23  ;;  %v4377_v21 = vrot.slane %v2969_v20, %v4177_v40  ;;  %v1541_v23 = vrot.slane %v2969_v20, %v4171_v38  ;;  %v1549_v26 = vrot.slane %v2969_v20, %v212_v42 }
 0xaa6   :  { %3653 = vmatpush1.bf16.msra.mxu0 %v3652_v37 }
 0xaa7   :  { %3655 = vmatprep.subr.bf16.mxu0 %v3654_v30 }
 0xaaa   :  { %3657 = vmatpush1.bf16.msra.mxu0 %v3656_v32 }
 0xaab   :  { %3356 = vmatprep.subr.mxu0 %v3982_v5 }
 0xb29   :  { %v1459_v47 = vpop.xlane.xlu0 %1458 }
 0xb2a   :  { %v1462_v48 = vmul.f32 0.0078125, %v1459_v47 }
 0xb2c   :  { %v1464_v49 = vadd.f32 1e-12, %v1462_v48 }
 0xb2d   :  { %v1451_v50 = vpop.xlane.xlu1 %1450 }
 0xb2e   :  { %3865 = vrsqrt.f32 %v1464_v49  ;;  %v1453_v53 = vmul.f32 0.0078125, %v1451_v50 }
 0xb30   :  { %v1455_v54 = vsub.f32 %v4347_v55, %v1453_v53  ;;  %v1513_v55 = vld [vmem:[#allocation3 + $0x250] sm:$0xff] }
 0xb32   :  { %v1457_v59 = vmul.f32 %v1455_v54, %v1455_v54 }
 0xb34   :  { %1460 = vadd.xlane.f32.xlu0 %v1457_v59 }
 0xb38   :  { %v3866_v56 = vpop.eup %3865 }
 0xb39   :  { %v1468_v60 = vmul.f32 %v3866_v56, %v4342_v63  ;;  %v1516_v63 = vld [vmem:[#allocation3 + $0x268] sm:$0xff] }
 0xb3a   :  { %v3674_v3 = vpack.c.bf16 %v1516_v63, %v1513_v55 }
 0xb3b   :  { %v1476_v0 = vmul.f32 %v2967_v58, %v1468_v60 }
 0xb3c   :  { %3675 = vmatprep.subr.bf16.mxu1 %v3674_v3 }
 0xb3d   :  { %v4359_v1 = vadd.f32 %v2968_v51, %v1476_v0  ;;  %3677 = vmatpush3.bf16.msra.mxu1 %v3674_v3 }
 0xb3e   :  { %3679 = vmatprep.subr.bf16.mxu1 %v3678_v6 }
 0xb3f   :  { %1618 = vmatmul.mubr.f32.vlgmr.msra.gmra.mrb[16].mxu0 %v4359_v1  ;;  %3353 = vmatprep.mubr.f32.mxu1 %v4359_v1 }
 0xb40   :  { %1623 = vmatprep.mubr.f32.mxu0 %v3982_v5 }
 0xb41   :  { %3681 = vmatpush3.bf16.msra.mxu1 %v3678_v6 }
 0xb42   :  { %3683 = vmatprep.subr.bf16.mxu1 %v3682_v10 }
 0xb45   :  { %3685 = vmatpush3.bf16.msra.mxu1 %v3682_v10 }
 0xb46   :  { %3687 = vmatprep.subr.bf16.mxu1 %v3686_v13 }
 0xb49   :  { %3689 = vmatpush3.bf16.msra.mxu1 %v3686_v13 }
 0xb4a   :  { %3391 = vmatprep.subr.mxu1 %v3982_v5 }
 0xbc1   :  { %v1461_v14 = vpop.xlane.xlu0 %1460 }
 0xbc2   :  { %v1463_v15 = vmul.f32 0.0078125, %v1461_v14 }
 0xbc4   :  { %v1465_v61 = vadd.f32 1e-12, %v1463_v15 }
 0xbc6   :  { %3867 = vrsqrt.f32 %v1465_v61 }
 0xbd0   :  { %v3868_v16 = vpop.eup %3867 }
 0xbd1   :  { %v1469_v17 = vmul.f32 %v3868_v16, %v1455_v54 }
 0xbd3   :  { %v1477_v18 = vmul.f32 %v2967_v58, %v1469_v17 }
 0xbd5   :  { %v4365_v19 = vadd.f32 %v2968_v51, %v1477_v18 }
 0xbd7   :  { %1624 = vmatmul.mubr.f32.gmra.mrb[18].mxu0 %v4365_v19  ;;  %3354 = vmatmul.mubr.f32.vlgmr.msra.gmra.mrb[16].mxu1 %v4365_v19 }
 0xbd8   :  { %3358 = vmatprep.mubr.msk.f32.mxu0 %vm3983_vm0, %v3982_v5  ;;  %3393 = vmatprep.mubr.msk.f32.mxu1 %vm3983_vm0, %v3982_v5 }
 0xc12   :  { %v1619_v22 = vpop.f32.mrb[16].mxu0 }
 0xc13   :  { %v1621_v24 = vpop.f32.mrb[17].mxu0  ;;  %v1620_v37 = vadd.f32 %v1619_v22, %v1541_v23 }
 0xc14   :  { %v1622_v25 = vadd.f32 %v1621_v24, %v4377_v21 }
 0xc16   :  { %3357 = vmatpush3.xpose.msk.msra.mxu0 %vm369_vm1, %v1622_v25 }
 0xc17   :  { %3361 = vmatprep.subr.mxu0 %v3982_v5 }
 0xc19   :  { %3359 = vmatmul.mubr.msk.f32.vlgmr.msra.gmra.mrb[20].mxu0 %vm369_vm1, %v1620_v37 }
 0xc1a   :  { %3363 = vmatprep.mubr.msk.f32.mxu0 %vm3983_vm0, %v3982_v5 }
 0xcaa   :  { %v1625_v27 = vpop.f32.mrb[18].mxu0  ;;  %v3355_v28 = vpop.f32.mrb[16].mxu1 }
 0xcab   :  { %v4388_v30 = vadd.f32 %v3355_v28, %v1549_v26  ;;  %v1627_v31 = vpop.f32.mrb[19].mxu0  ;;  %v1696_v32 = vpop.f32.mrb[17].mxu1  ;;  %v1626_v34 = vadd.f32 %v1625_v27, %v1541_v23 }
 0xcac   :  { %v1697_v35 = vadd.f32 %v1696_v32, %v1549_v26  ;;  %v1628_v7 = vadd.f32 %v1627_v31, %v4377_v21 }
 0xcae   :  { %3362 = vmatpush3.msra.mxu0 %v1697_v35 }
 0xcaf   :  { %3366 = vmatprep.subr.mxu0 %v3982_v5 }
 0xcec   :  { %v1777_v36 = vpop.f32.mrb[20].mxu0 }
 0xced   :  { %v1781_v29 = vmul.f32 0.125, %v1777_v36  ;;  %v3360_v39 = vpop.f32.mrb[21].mxu0 }
 0xcef   :  { %v1782_v41 = vadd.f32 %v1781_v29, %v4215_v62 }
 0xcf1   :  { %v1783_v43 = vsel %vm452_vm2, %v1782_v41, -inf }
 0xcf2   :  { %1784 = vmax.xlane.f32.xlu1 %v1783_v43 }
 0xd03   :  { %1869 = vrot.lane.b32.xlu1 %v1622_v25, %s3984_s4 }
 0xd7f   :  { %v1785_v33 = vpop.xlane.xlu1 %1784 }
 0xd80   :  { %v1786_v42 = vsub.f32 %v1782_v41, %v1785_v33 }
 0xd82   :  { %v1787_v44 = vmul.f32 1.442695, %v1786_v42 }
 0xd83   :  { %v1870_v50 = vpop.permute.xlu1 %1869 }
 0xd84   :  { %3869 = vpow2.f32 %v1787_v44 }
 0xd8e   :  { %v3870_v45 = vpop.eup %3869 }
 0xd8f   :  { %v1789_v46 = vsel %vm452_vm2, %v3870_v45, 0.0 }
 0xd90   :  { %1790 = vadd.xlane.f32.xlu0 %v1789_v46  ;;  %v2984_v46 = vld [vmem:[%s4606_s6 + $0x90] sm:$0xff] }
 0xda6   :  { %1867 = vrot.lane.b32.xlu0 %v1620_v37, %s3984_s4 }
 0xe1d   :  { %v1791_v47 = vpop.xlane.xlu0 %1790 }
 0xe1e   :  { %3871 = vrcp.f32 %v1791_v47 }
 0xe21   :  { %v1868_v53 = vpop.permute.xlu0 %1867 }
 0xe28   :  { %v3872_v48 = vpop.eup %3871 }
 0xe29   :  { %v1793_v49 = vmul.f32 %v3872_v48, %v3870_v45  ;;  %v2983_v45 = vld [vmem:[%s4606_s6 + $0x88] sm:$0xff]  ;;  %v2985_v48 = vld [vmem:[%s4606_s6 + $0x98] sm:$0xff] }
 0xe2b   :  { %3364 = vmatmul.mubr.msk.f32.vlgmr.msra.gmra.mrb[22].mxu0 %vm452_vm2, %v1793_v49  ;;  %v3694_v49 = vpack.c.bf16 %v2985_v48, %v2984_v46  ;;  %v2533_v48 = vld [vmem:[#allocation5 + $0x168] sm:$0xff] }
 0xe2c   :  { %3367 = vmatpush3.xpose.msk.msra.mxu0 %vm369_vm1, %v1870_v50  ;;  %3368 = vmatprep.mubr.msk.f32.mxu0 %vm3983_vm0, %v3982_v5  ;;  %v2986_v50 = vld [vmem:[%s4606_s6 + $0xa0] sm:$0xff] }
 0xe2d   :  { %3371 = vmatprep.subr.mxu0 %v3982_v5 }
 0xe2f   :  { %3369 = vmatmul.mubr.msk.f32.vlgmr.msra.gmra.mrb[24].mxu0 %vm369_vm1, %v1868_v53  ;;  %v2987_v53 = vld [vmem:[%s4606_s6 + $0xa8] sm:$0xff] }
 0xe30   :  { %3373 = vmatprep.mubr.msk.f32.mxu0 %vm3983_vm0, %v3982_v5 }
 0xefe   :  { %v4404_v54 = vpop.f32.mrb[22].mxu0 }
 0xeff   :  { %v3365_v59 = vpop.f32.mrb[23].mxu0 }
 0xf00   :  { %v3698_v59 = vpack.c.bf16 %v2987_v53, %v2986_v50  ;;  %v2532_v53 = vld [vmem:[#allocation5 + $0x160] sm:$0xff] }
 0xf02   :  { %v1941_v56 = vpop.f32.mrb[24].mxu0 }
 0xf03   :  { %v1945_v58 = vmul.f32 0.125, %v1941_v56  ;;  %v3370_v60 = vpop.f32.mrb[25].mxu0  ;;  %v2988_v56 = vld [vmem:[%s4606_s6 + $0xb0] sm:$0xff] }
 0xf05   :  { %v1946_v51 = vadd.f32 %v1945_v58, %v4215_v62  ;;  %v2989_v58 = vld [vmem:[%s4606_s6 + $0xb8] sm:$0xff] }
 0xf06   :  { %v3702_v60 = vpack.c.bf16 %v2989_v58, %v2988_v56  ;;  %v2537_v58 = vld [vmem:[#allocation5 + $0x188] sm:$0xff] }
 0xf07   :  { %v1947_v0 = vsel %vm452_vm2, %v1946_v51, -inf }
 0xf08   :  { %1948 = vmax.xlane.f32.xlu1 %v1947_v0  ;;  %v2991_v0 = vld [vmem:[%s4606_s6 + $0xc8] sm:$0xff] }
 0xf19   :  { %1959 = vrot.lane.b32.xlu1 %v1697_v35, %s3984_s4 }
 0xf1d   :  { %2202 = vrot.lane.b32.xlu1 %v1626_v34, %s3984_s4 }
 0xf95   :  { %v1949_v52 = vpop.xlane.xlu1 %1948 }
 0xf96   :  { %v1950_v2 = vsub.f32 %v1946_v51, %v1949_v52  ;;  %v2990_v51 = vld [vmem:[%s4606_s6 + $0xc0] sm:$0xff]  ;;  %v2992_v52 = vld [vmem:[%s4606_s6 + $0xd0] sm:$0xff] }
 0xf98   :  { %v1951_v55 = vmul.f32 1.442695, %v1950_v2  ;;  %v2993_v2 = vld [vmem:[%s4606_s6 + $0xd8] sm:$0xff] }
 0xf99   :  { %v1960_v63 = vpop.permute.xlu1 %1959 }
 0xf9a   :  { %3873 = vpow2.f32 %v1951_v55  ;;  %3372 = vmatpush3.msra.mxu0 %v1960_v63  ;;  %v3710_v55 = vpack.c.bf16 %v2993_v2, %v2992_v52  ;;  %v2994_v63 = vld [vmem:[%s4606_s6 + $0xe0] sm:$0xff]  ;;  %v2541_v2 = vld [vmem:[#allocation5 + $0x1a8] sm:$0xff] }
 0xf9b   :  { %3376 = vmatprep.subr.mxu0 %v3982_v5 }
 0xf9d   :  { %v2203_v25 = vpop.permute.xlu1 %2202 }
 0xfa4   :  { %v3874_v3 = vpop.eup %3873 }
 0xfa5   :  { %v1953_v57 = vsel %vm452_vm2, %v3874_v3, 0.0 }
 0xfa6   :  { %1954 = vadd.xlane.f32.xlu0 %v1953_v57 }
0x1033   :  { %v1955_v62 = vpop.xlane.xlu0 %1954 }
0x1034   :  { %3875 = vrcp.f32 %v1955_v62  ;;  %v2996_v62 = vld [vmem:[%s4606_s6 + $0xf0] sm:$0xff] }
0x103e   :  { %v3876_v4 = vpop.eup %3875 }
0x103f   :  { %v1957_v6 = vmul.f32 %v3876_v4, %v3874_v3  ;;  %v2995_v3 = vld [vmem:[%s4606_s6 + $0xe8] sm:$0xff]  ;;  %v2997_v4 = vld [vmem:[%s4606_s6 + $0xf8] sm:$0xff] }
0x1040   :  { %v3714_v57 = vpack.c.bf16 %v2995_v3, %v2994_v63  ;;  %v2540_v3 = vld [vmem:[#allocation5 + $0x1a0] sm:$0xff] }
0x1041   :  { %3374 = vmatmul.mubr.msk.f32.vlgmr.msra.gmra.mrb[26].mxu0 %vm452_vm2, %v1957_v6  ;;  %v3718_v6 = vpack.c.bf16 %v2997_v4, %v2996_v62  ;;  %v2545_v62 = vld [vmem:[#allocation5 + $0x1c8] sm:$0xff] }
0x1042   :  { %3377 = vmatpush3.xpose.msk.msra.mxu0 %vm369_vm1, %v1628_v7  ;;  %3378 = vmatprep.mubr.msk.f32.mxu0 %vm3983_vm0, %v3982_v5 }
0x1043   :  { %3381 = vmatprep.subr.mxu0 %v3982_v5 }
0x1045   :  { %3379 = vmatmul.mubr.msk.f32.vlgmr.msra.gmra.mrb[28].mxu0 %vm369_vm1, %v1626_v34  ;;  %v3706_v34 = vpack.c.bf16 %v2991_v0, %v2990_v51  ;;  %v2536_v0 = vld [vmem:[#allocation5 + $0x180] sm:$0xff] }
0x1046   :  { %3382 = vmatpush3.msra.mxu0 %v4388_v30  ;;  %3383 = vmatprep.mubr.msk.f32.mxu0 %vm3983_vm0, %v3982_v5 }
0x1047   :  { %3386 = vmatprep.subr.mxu0 %v3982_v5 }
0x1114   :  { %v4423_v8 = vpop.f32.mrb[26].mxu0 }
0x1115   :  { %v3375_v10 = vpop.f32.mrb[27].mxu0 }
0x1118   :  { %v2112_v11 = vpop.f32.mrb[28].mxu0 }
0x1119   :  { %v2116_v12 = vmul.f32 0.125, %v2112_v11  ;;  %v3380_v13 = vpop.f32.mrb[29].mxu0 }
0x111b   :  { %v2117_v14 = vadd.f32 %v2116_v12, %v4221_v9 }
0x111d   :  { %v2118_v15 = vsel %vm452_vm2, %v2117_v14, -inf }
0x111e   :  { %2119 = vmax.xlane.f32.xlu0 %v2118_v15 }
0x11ab   :  { %v2120_v61 = vpop.xlane.xlu0 %2119 }
0x11ac   :  { %v2121_v16 = vsub.f32 %v2117_v14, %v2120_v61 }
0x11ae   :  { %v2122_v17 = vmul.f32 1.442695, %v2121_v16  ;;  %v2999_v16 = vld [vmem:[%s4607_s7 + $0x1] ss:$0 sm:$0xff] }
0x11b0   :  { %3877 = vpow2.f32 %v2122_v17 }
0x11ba   :  { %v3878_v18 = vpop.eup %3877 }
0x11bb   :  { %v2124_v20 = vsel %vm452_vm2, %v3878_v18, 0.0 }
0x11bc   :  { %2125 = vadd.xlane.f32.xlu0 %v2124_v20 }
0x11d2   :  { %2204 = vrot.lane.b32.xlu0 %v1628_v7, %s3984_s4 }
0x1249   :  { %v2126_v21 = vpop.xlane.xlu0 %2125 }
0x124a   :  { %3879 = vrcp.f32 %v2126_v21 }
0x124d   :  { %v2205_v24 = vpop.permute.xlu0 %2204 }
0x1254   :  { %v3880_v22 = vpop.eup %3879 }
0x1255   :  { %v2128_v23 = vmul.f32 %v3880_v22, %v3878_v18 }
0x1257   :  { %3384 = vmatmul.mubr.msk.f32.vlgmr.msra.gmra.mrb[30].mxu0 %vm452_vm2, %v2128_v23  ;;  %v2523_v23 = vld [vmem:[#allocation5 + $0x118] sm:$0xff] }
0x1258   :  { %3387 = vmatpush3.xpose.msk.msra.mxu0 %vm369_vm1, %v2205_v24  ;;  %3388 = vmatprep.mubr.msk.f32.mxu0 %vm3983_vm0, %v3982_v5  ;;  %v2520_v24 = vld [vmem:[#allocation5 + $0x100] sm:$0xff] }
0x125b   :  { %3389 = vmatmul.mubr.msk.f32.vlgmr.msra.gmra.mrb[32].mxu0 %vm369_vm1, %v2203_v25 }
0x132a   :  { %v4434_v37 = vpop.f32.mrb[30].mxu0 }
0x132b   :  { %v3385_v26 = vpop.f32.mrb[31].mxu0 }
0x132c   :  { %v2525_v26 = vld [vmem:[#allocation5 + $0x128] sm:$0xff] }
0x132e   :  { %v2276_v27 = vpop.f32.mrb[32].mxu0 }
0x132f   :  { %v2280_v28 = vmul.f32 0.125, %v2276_v27  ;;  %v3390_v31 = vpop.f32.mrb[33].mxu0  ;;  %v2527_v27 = vld [vmem:[#allocation5 + $0x138] sm:$0xff] }
0x1330   :  { %v3726_v31 = vpack.c.bf16 %v2527_v27, %v2525_v26  ;;  %v2666_v26 = vld [vmem:[#allocation7 + $0x118] sm:$0xff]  ;;  %v2683_v27 = vld [vmem:[#allocation7 + $0x1a0] sm:$0xff] }
0x1331   :  { %v2281_v32 = vadd.f32 %v2280_v28, %v4221_v9 }
0x1333   :  { %v2282_v35 = vsel %vm452_vm2, %v2281_v32, -inf }
0x1334   :  { %2283 = vmax.xlane.f32.xlu1 %v2282_v35  ;;  %v2526_v35 = vld [vmem:[#allocation5 + $0x130] sm:$0xff] }
0x1345   :  { %2294 = vrot.lane.b32.xlu1 %v4388_v30, %s3984_s4  ;;  %v2982_v30 = vld [vmem:[%s4606_s6 + $0x80] sm:$0xff] }
0x1346   :  { %v3690_v47 = vpack.c.bf16 %v2983_v45, %v2982_v30 }
0x1348   :  { %3691 = vmatprep.subr.bf16.mxu0 %v3690_v47 }
0x1349   :  { %3693 = vmatpush3.bf16.msra.mxu0 %v3690_v47 }
0x134a   :  { %3695 = vmatprep.subr.bf16.mxu0 %v3694_v49 }
0x134d   :  { %3697 = vmatpush3.bf16.msra.mxu0 %v3694_v49  ;;  %v2535_v49 = vld [vmem:[#allocation5 + $0x178] sm:$0xff] }
0x134e   :  { %3699 = vmatprep.subr.bf16.mxu0 %v3698_v59  ;;  %v3734_v50 = vpack.c.bf16 %v2535_v49, %v2533_v48 }
0x1351   :  { %3701 = vmatpush3.bf16.msra.mxu0 %v3698_v59  ;;  %v2534_v59 = vld [vmem:[#allocation5 + $0x170] sm:$0xff] }
0x1352   :  { %3703 = vmatprep.subr.bf16.mxu0 %v3702_v60  ;;  %v3736_v56 = vpack.c.bf16 %v2534_v59, %v2532_v53 }
0x1355   :  { %3705 = vmatpush3.bf16.msra.mxu0 %v3702_v60  ;;  %v2539_v60 = vld [vmem:[#allocation5 + $0x198] sm:$0xff] }
0x1356   :  { %3707 = vmatprep.subr.bf16.mxu0 %v3706_v34  ;;  %v3738_v51 = vpack.c.bf16 %v2539_v60, %v2537_v58  ;;  %v2669_v60 = vld [vmem:[#allocation7 + $0x130] sm:$0xff] }
0x1359   :  { %3709 = vmatpush3.bf16.msra.mxu0 %v3706_v34  ;;  %v2538_v34 = vld [vmem:[#allocation5 + $0x190] sm:$0xff] }
0x135a   :  { %3711 = vmatprep.subr.bf16.mxu0 %v3710_v55  ;;  %v3740_v52 = vpack.c.bf16 %v2538_v34, %v2536_v0  ;;  %v2688_v34 = vld [vmem:[#allocation7 + $0x1c8] sm:$0xff] }
0x135d   :  { %3713 = vmatpush3.bf16.msra.mxu0 %v3710_v55  ;;  %v2543_v55 = vld [vmem:[#allocation5 + $0x1b8] sm:$0xff] }
0x135e   :  { %3715 = vmatprep.subr.bf16.mxu0 %v3714_v57  ;;  %v3742_v63 = vpack.c.bf16 %v2543_v55, %v2541_v2  ;;  %v2671_v2 = vld [vmem:[#allocation7 + $0x140] sm:$0xff]  ;;  %v2672_v55 = vld [vmem:[#allocation7 + $0x148] sm:$0xff] }
0x1361   :  { %3717 = vmatpush3.bf16.msra.mxu0 %v3714_v57  ;;  %v2542_v57 = vld [vmem:[#allocation5 + $0x1b0] sm:$0xff] }
0x1362   :  { %3719 = vmatprep.subr.bf16.mxu0 %v3718_v6  ;;  %v3744_v4 = vpack.c.bf16 %v2542_v57, %v2540_v3  ;;  %v2689_v3 = vld [vmem:[#allocation7 + $0x1d0] sm:$0xff]  ;;  %v2690_v57 = vld [vmem:[#allocation7 + $0x1d8] sm:$0xff] }
0x1365   :  { %3721 = vmatpush3.bf16.msra.mxu0 %v3718_v6  ;;  %v2547_v6 = vld [vmem:[#allocation5 + $0x1d8] sm:$0xff] }
0x13c1   :  { %v2284_v36 = vpop.xlane.xlu1 %2283 }
0x13c2   :  { %v2285_v29 = vsub.f32 %v2281_v32, %v2284_v36  ;;  %v2524_v32 = vld [vmem:[#allocation5 + $0x120] sm:$0xff]  ;;  %v2529_v36 = vld [vmem:[#allocation5 + $0x148] sm:$0xff] }
0x13c4   :  { %v2286_v39 = vmul.f32 1.442695, %v2285_v29  ;;  %v2531_v29 = vld [vmem:[#allocation5 + $0x158] sm:$0xff] }
0x13c5   :  { %v2295_v41 = vpop.permute.xlu1 %2294 }
0x13c6   :  { %3881 = vpow2.f32 %v2286_v39  ;;  %3392 = vmatpush3.msra.mxu1 %v2295_v41  ;;  %v2528_v39 = vld [vmem:[#allocation5 + $0x140] sm:$0xff]  ;;  %v2530_v41 = vld [vmem:[#allocation5 + $0x150] sm:$0xff] }
0x13d0   :  { %v3882_v43 = vpop.eup %3881 }
0x13d1   :  { %v2288_v33 = vsel %vm452_vm2, %v3882_v43, 0.0 }
0x13d2   :  { %2289 = vadd.xlane.f32.xlu0 %v2288_v33 }
0x145f   :  { %v2290_v42 = vpop.xlane.xlu0 %2289 }
0x1460   :  { %3883 = vrcp.f32 %v2290_v42 }
0x146a   :  { %v3884_v44 = vpop.eup %3883 }
0x146b   :  { %v2292_v9 = vmul.f32 %v3884_v44, %v3882_v43  ;;  %v3732_v43 = vpack.c.bf16 %v2530_v41, %v2528_v39 }
0x146d   :  { %3394 = vmatmul.mubr.msk.f32.vlgmr.msra.gmra.mrb[18].mxu1 %vm452_vm2, %v2292_v9 }
0x146e   :  { %2629 = vmatprep.mubr.f32.mxu1 %v3982_v5 }
0x1540   :  { %v2366_v7 = vpop.f32.mrb[18].mxu1 }
0x1541   :  { %v3828_v10 = vpack.i.bf16 %v2366_v7, %v4423_v8  ;;  %v3395_v11 = vpop.f32.mrb[19].mxu1  ;;  %v2544_v7 = vld [vmem:[#allocation5 + $0x1c0] sm:$0xff] }
0x1542   :  { %v3746_v11 = vpack.c.bf16 %v2547_v6, %v2545_v62  ;;  %v3774_v62 = vpack.c.bf16 %v2690_v57, %v2689_v3  ;;  %v3985_v3 = vmov 0.0|0.0  }
0x1543   :  { %3829 = vrot.lane.b32.xlu0 %v3828_v10, %s3984_s4  ;;  %v2546_v10 = vld [vmem:[#allocation5 + $0x1d0] sm:$0xff] }
0x15b5   :  { %v3830_v12 = vpop.permute.xlu0 %3829 }
0x15b6   :  { %v3832_v13 = vunpack.i.h.bf16 %v3830_v12  ;;  %v3831_v14 = vunpack.i.l.bf16 %v3830_v12  ;;  %v2549_v12 = vld [vmem:[#allocation5 + $0x1e8] sm:$0xff] }
0x15b8   :  { %v2039_v15 = vsel %vm369_vm1, %v4404_v54, %v3831_v14  ;;  %v2374_v61 = vsel %vm369_vm1, %v4434_v37, %v3832_v13  ;;  %v2521_v54 = vld [vmem:[#allocation5 + $0x108] sm:$0xff]  ;;  %v2522_v37 = vld [vmem:[#allocation5 + $0x110] sm:$0xff]  ;;  %v2551_v13 = vld [vmem:[#allocation5 + $0x1f8] sm:$0xff]  ;;  %v3748_v14 = vpack.c.bf16 %v2546_v10, %v2544_v7 }
0x15b9   :  { %3428 = vmatprep.mubr.f32.mxu0 %v2039_v15  ;;  %v3722_v25 = vpack.c.bf16 %v2523_v23, %v2521_v54  ;;  %v3724_v28 = vpack.c.bf16 %v2522_v37, %v2520_v24  ;;  %v3750_v15 = vpack.c.bf16 %v2551_v13, %v2549_v12  ;;  %v2681_v54 = vld [vmem:[#allocation7 + $0x190] sm:$0xff]  ;;  %v2682_v23 = vld [vmem:[#allocation7 + $0x198] sm:$0xff]  ;;  %v2691_v7 = vld [vmem:[#allocation7 + $0x1e0] sm:$0xff] }
0x15ba   :  { %3429 = vmatmul.mubr.f32.vlgmr.msra.gmra.mrb[34].mxu0 %v2374_v61  ;;  %v2548_v61 = vld [vmem:[#allocation5 + $0x1e0] sm:$0xff]  ;;  %v2665_v37 = vld [vmem:[#allocation7 + $0x110] sm:$0xff]  ;;  %v2692_v10 = vld [vmem:[#allocation7 + $0x1e8] sm:$0xff] }
0x15bb   :  { %3723 = vmatprep.subr.bf16.mxu1 %v3722_v25  ;;  %v3758_v25 = vpack.c.bf16 %v2682_v23, %v2681_v54  ;;  %v2675_v12 = vld [vmem:[#allocation7 + $0x160] sm:$0xff]  ;;  %v2676_v13 = vld [vmem:[#allocation7 + $0x168] sm:$0xff] }
0x15bc   :  { %3725 = vmatpush1.bf16.msra.mxu1 %v3724_v28  ;;  %v2684_v28 = vld [vmem:[#allocation7 + $0x1a8] sm:$0xff] }
0x15bd   :  { %3727 = vmatprep.subr.bf16.mxu1 %v3726_v31  ;;  %v3760_v31 = vpack.c.bf16 %v2666_v26, %v2665_v37 }
0x168d   :  { %v3430_v17 = vpop.f32.mrb[34].mxu0 }
0x168e   :  { %v2472_v8 = vadd.f32 %v3430_v17, %v2999_v16  ;;  %v2466_v18 = vpop.f32.mrb[35].mxu0 }
0x168f   :  { %v2467_v20 = vadd.f32 %v2999_v16, %v2466_v18  ;;  %v2550_v16 = vld [vmem:[#allocation5 + $0x1f0] sm:$0xff]  ;;  %v2680_v18 = vld [vmem:[#allocation7 + $0x188] sm:$0xff] }
0x1690   :  { %v2476_v21 = vadd.f32 %v2472_v8, %v4365_v19  ;;  %v3728_v19 = vpack.c.bf16 %v2526_v35, %v2524_v32  ;;  %v3752_v17 = vpack.c.bf16 %v2550_v16, %v2548_v61  ;;  %v2679_v8 = vld [vmem:[#allocation7 + $0x180] sm:$0xff]  ;;  %v3762_v32 = vpack.c.bf16 %v2684_v28, %v2683_v27  ;;  %v2694_v61 = vld [vmem:[#allocation7 + $0x1f8] sm:$0xff] }
0x1691   :  { %v2475_v22 = vadd.f32 %v2467_v20, %v4359_v1  ;;  %v3730_v1 = vpack.c.bf16 %v2531_v29, %v2529_v36  ;;  %v2663_v20 = vld [vmem:[#allocation7 + $0x100] sm:$0xff]  ;;  %v2668_v36 = vld [vmem:[#allocation7 + $0x128] sm:$0xff] }
0x1692   :  { %2483 = vadd.xlane.f32.xlu0 %v2476_v21  ;;  %3729 = vmatpush1.bf16.msra.mxu1 %v3728_v19  ;;  %v2667_v35 = vld [vmem:[#allocation7 + $0x120] sm:$0xff] }
0x1693   :  { %2481 = vadd.xlane.f32.xlu1 %v2475_v22  ;;  %3731 = vmatprep.subr.bf16.mxu1 %v3730_v1  ;;  %v3764_v29 = vpack.c.bf16 %v2668_v36, %v2667_v35 }
0x1696   :  { %3733 = vmatpush1.bf16.msra.mxu1 %v3732_v43 }
0x1697   :  { %3735 = vmatprep.subr.bf16.mxu1 %v3734_v50 }
0x169a   :  { %3737 = vmatpush1.bf16.msra.mxu1 %v3736_v56  ;;  %v2686_v56 = vld [vmem:[#allocation7 + $0x1b8] sm:$0xff] }
0x169b   :  { %3739 = vmatprep.subr.bf16.mxu1 %v3738_v51  ;;  %v2670_v51 = vld [vmem:[#allocation7 + $0x138] sm:$0xff] }
0x169c   :  { %v3768_v0 = vpack.c.bf16 %v2670_v51, %v2669_v60 }
0x169e   :  { %3741 = vmatpush1.bf16.msra.mxu1 %v3740_v52 }
0x169f   :  { %3743 = vmatprep.subr.bf16.mxu1 %v3742_v63  ;;  %v3772_v63 = vpack.c.bf16 %v2672_v55, %v2671_v2  ;;  %v2827_v55 = vld [vmem:[%s4616_s16] sm:$0xff] }
0x16a2   :  { %3745 = vmatpush1.bf16.msra.mxu1 %v3744_v4  ;;  %v2674_v4 = vld [vmem:[#allocation7 + $0x158] sm:$0xff] }
0x16a3   :  { %3747 = vmatprep.subr.bf16.mxu1 %v3746_v11  ;;  %v3778_v11 = vpack.c.bf16 %v2692_v10, %v2691_v7 }
0x16a6   :  { %3749 = vmatpush1.bf16.msra.mxu1 %v3748_v14  ;;  %v3780_v14 = vpack.c.bf16 %v2676_v13, %v2675_v12  ;;  %v2830_v12 = vld [vmem:[%s4616_s16 + $0x18] sm:$0xff] }
0x16a7   :  { %3751 = vmatprep.subr.bf16.mxu1 %v3750_v15  ;;  %v2693_v15 = vld [vmem:[#allocation7 + $0x1f0] sm:$0xff] }
0x16a8   :  { %v3782_v16 = vpack.c.bf16 %v2694_v61, %v2693_v15  ;;  %v2832_v15 = vld [vmem:[%s4616_s16 + $0x28] sm:$0xff] }
0x16aa   :  { %3753 = vmatpush1.bf16.msra.mxu1 %v3752_v17  ;;  %v2677_v17 = vld [vmem:[#allocation7 + $0x170] sm:$0xff] }
0x16ab   :  { %3786 = vmatprep.subr.bf16.mxu1 %v3985_v3 }
0x171f   :  { %v2484_v33 = vpop.xlane.xlu0 %2483 }
0x1720   :  { %v2482_v42 = vpop.xlane.xlu1 %2481  ;;  %v2486_v44 = vmul.f32 0.0078125, %v2484_v33 }
0x1721   :  { %v2485_v9 = vmul.f32 0.0078125, %v2482_v42 }
0x1722   :  { %v4504_v45 = vsub.f32 %v2476_v21, %v2486_v44  ;;  %v3754_v21 = vpack.c.bf16 %v2680_v18, %v2679_v8  ;;  %v3002_v44 = vld [vmem:[%s4612_s12 + $0x1] ss:$0 sm:$0xff]  ;;  %v2678_v8 = vld [vmem:[#allocation7 + $0x178] sm:$0xff] }
0x1723   :  { %v4502_v30 = vsub.f32 %v2475_v22, %v2485_v9  ;;  %v2664_v22 = vld [vmem:[#allocation7 + $0x108] sm:$0xff]  ;;  %v3784_v18 = vpack.c.bf16 %v2678_v8, %v2677_v17  ;;  %v2834_v17 = vld [vmem:[%s4616_s16 + $0x38] sm:$0xff] }
0x1724   :  { %v2490_v47 = vmul.f32 %v4504_v45, %v4504_v45  ;;  %v3756_v24 = vpack.c.bf16 %v2664_v22, %v2663_v20  ;;  %3755 = vmatprep.subr.bf16.mxu0 %v3754_v21  ;;  %v3004_v20 = vld [vmem:[%s4609_s9 + $0x2] sm:$0x3] }
0x1725   :  { %v2489_v46 = vmul.f32 %v4502_v30, %v4502_v30  ;;  %v2558_v21 = vrot.slane %v3004_v20, %v4171_v38  ;;  %v2562_v22 = vrot.slane %v3004_v20, %v4177_v40  ;;  %v2836_v20 = vld [vmem:[%s4616_s16 + $0x48] sm:$0xff] }
0x1726   :  { %3757 = vmatpush3.bf16.msra.mxu0 %v3756_v24 }
0x1727   :  { %2491 = vadd.xlane.f32.xlu1 %v2489_v46  ;;  %3759 = vmatprep.subr.bf16.mxu0 %v3758_v25  ;;  %v3003_v46 = vld [vmem:[%s4613_s13 + $0x1] ss:$0 sm:$0xff] }
0x172a   :  { %3761 = vmatpush3.bf16.msra.mxu0 %v3760_v31 }
0x172b   :  { %2493 = vadd.xlane.f32.xlu1 %v2490_v47  ;;  %3763 = vmatprep.subr.bf16.mxu0 %v3762_v32 }
0x172e   :  { %3765 = vmatpush3.bf16.msra.mxu0 %v3764_v29 }
0x17b4   :  { %v2492_v19 = vpop.xlane.xlu1 %2491 }
0x17b5   :  { %v2495_v1 = vmul.f32 0.0078125, %v2492_v19 }
0x17b7   :  { %v2497_v39 = vadd.f32 1e-12, %v2495_v1 }
0x17b8   :  { %v2494_v41 = vpop.xlane.xlu1 %2493 }
0x17b9   :  { %3885 = vrsqrt.f32 %v2497_v39  ;;  %v2496_v43 = vmul.f32 0.0078125, %v2494_v41 }
0x17bb   :  { %v2498_v33 = vadd.f32 1e-12, %v2496_v43 }
0x17bd   :  { %3887 = vrsqrt.f32 %v2498_v33 }
0x17c3   :  { %v3886_v42 = vpop.eup %3885 }
0x17c4   :  { %v2501_v9 = vmul.f32 %v3886_v42, %v4502_v30  ;;  %v2685_v30 = vld [vmem:[#allocation7 + $0x1b0] sm:$0xff] }
0x17c5   :  { %v3766_v58 = vpack.c.bf16 %v2686_v56, %v2685_v30  ;;  %v3006_v30 = vld [vmem:[%s4611_s11 + $0x1] ss:$0 sm:$0xff] }
0x17c6   :  { %v2509_v47 = vmul.f32 %v3002_v44, %v2501_v9 }
0x17c7   :  { %v3888_v48 = vpop.eup %3887  ;;  %3767 = vmatprep.subr.bf16.mxu0 %v3766_v58 }
0x17c8   :  { %v4517_v49 = vadd.f32 %v3003_v46, %v2509_v47  ;;  %v2502_v50 = vmul.f32 %v3888_v48, %v4504_v45  ;;  %3769 = vmatpush3.bf16.msra.mxu0 %v3768_v0  ;;  %v2687_v45 = vld [vmem:[#allocation7 + $0x1c0] sm:$0xff] }
0x17c9   :  { %v3770_v52 = vpack.c.bf16 %v2688_v34, %v2687_v45 }
0x17ca   :  { %2630 = vmatmul.mubr.f32.vlgmr.msra.gmra.mrb[20].mxu1 %v4517_v49  ;;  %v2510_v53 = vmul.f32 %v3002_v44, %v2502_v50 }
0x17cb   :  { %2635 = vmatprep.mubr.f32.mxu1 %v3982_v5  ;;  %3771 = vmatprep.subr.bf16.mxu0 %v3770_v52 }
0x17cc   :  { %v4522_v59 = vadd.f32 %v3003_v46, %v2510_v53  ;;  %3773 = vmatpush3.bf16.msra.mxu0 %v3772_v63  ;;  %v2828_v63 = vld [vmem:[%s4616_s16 + $0x8] sm:$0xff] }
0x17cd   :  { %3775 = vmatprep.subr.bf16.mxu0 %v3774_v62  ;;  %v3787_v57 = vpack.c.bf16 %v2828_v63, %v2827_v55 }
0x17ce   :  { %2636 = vmatmul.mubr.f32.gmra.mrb[22].mxu1 %v4522_v59 }
0x17cf   :  { %3463 = vmatprep.mubr.msk.f32.mxu1 %vm3983_vm0, %v3982_v5  ;;  %v2673_v5 = vld [vmem:[#allocation7 + $0x150] sm:$0xff]  ;;  %3788 = vmatpush3.bf16.msra.mxu1 %v3787_v57 }
0x17d0   :  { %v3776_v6 = vpack.c.bf16 %v2674_v4, %v2673_v5  ;;  %3789 = vmatprep.subr.bf16.mxu1 %v3985_v3 }
0x17d2   :  { %3777 = vmatpush3.bf16.msra.mxu0 %v3776_v6 }
0x17d3   :  { %3779 = vmatprep.subr.bf16.mxu0 %v3778_v11  ;;  %v2829_v11 = vld [vmem:[%s4616_s16 + $0x10] sm:$0xff] }
0x17d4   :  { %v3790_v13 = vpack.c.bf16 %v2830_v12, %v2829_v11 }
0x17d6   :  { %3781 = vmatpush3.bf16.msra.mxu0 %v3780_v14  ;;  %3791 = vmatpush3.bf16.msra.mxu1 %v3790_v13  ;;  %v2831_v14 = vld [vmem:[%s4616_s16 + $0x20] sm:$0xff] }
0x17d7   :  { %3783 = vmatprep.subr.bf16.mxu0 %v3782_v16  ;;  %3792 = vmatprep.subr.bf16.mxu1 %v3985_v3  ;;  %v3793_v61 = vpack.c.bf16 %v2832_v15, %v2831_v14  ;;  %v2833_v16 = vld [vmem:[%s4616_s16 + $0x30] sm:$0xff] }
0x17d8   :  { %v3796_v8 = vpack.c.bf16 %v2834_v17, %v2833_v16 }
0x17da   :  { %3785 = vmatpush3.bf16.msra.mxu0 %v3784_v18  ;;  %3794 = vmatpush3.bf16.msra.mxu1 %v3793_v61  ;;  %v2835_v18 = vld [vmem:[%s4616_s16 + $0x40] sm:$0xff] }
0x17db   :  { %3795 = vmatprep.subr.bf16.mxu1 %v3985_v3 }
0x17de   :  { %3797 = vmatpush3.bf16.msra.mxu1 %v3796_v8 }
0x17df   :  { %3798 = vmatprep.subr.bf16.mxu1 %v3985_v3 }
0x189d   :  { %v2631_v54 = vpop.f32.mrb[20].mxu1 }
0x189e   :  { %v2632_v23 = vadd.f32 %v2631_v54, %v2558_v21  ;;  %v2633_v24 = vpop.f32.mrb[21].mxu1  ;;  %v2838_v54 = vld [vmem:[%s4616_s16 + $0x58] sm:$0xff] }
0x189f   :  { %v2634_v25 = vadd.f32 %v2633_v24, %v2562_v22  ;;  %v2839_v24 = vld [vmem:[%s4616_s16 + $0x60] sm:$0xff] }
0x18a0   :  { %v2646_v37 = vmul.f32 0.70710677, %v2632_v23  ;;  %v2642_v39 = vmul.f32 0.5, %v2632_v23 }
0x18a1   :  { %v2647_v26 = vmul.f32 0.70710677, %v2634_v25  ;;  %v2637_v27 = vpop.f32.mrb[22].mxu1  ;;  %v2643_v40 = vmul.f32 0.5, %v2634_v25  ;;  %v2840_v25 = vld [vmem:[%s4616_s16 + $0x68] sm:$0xff] }
0x18a2   :  { %3889 = verf.f32 %v2646_v37  ;;  %v2638_v28 = vadd.f32 %v2637_v27, %v2558_v21  ;;  %v2639_v31 = vpop.f32.mrb[23].mxu1  ;;  %v3799_v21 = vpack.c.bf16 %v2836_v20, %v2835_v18  ;;  %v2841_v37 = vld [vmem:[%s4616_s16 + $0x70] sm:$0xff]  ;;  %v2842_v27 = vld [vmem:[%s4616_s16 + $0x78] sm:$0xff] }
0x18a3   :  { %3891 = verf.f32 %v2647_v26  ;;  %v2640_v32 = vadd.f32 %v2639_v31, %v2562_v22  ;;  %v2837_v22 = vld [vmem:[%s4616_s16 + $0x50] sm:$0xff]  ;;  %v3805_v26 = vpack.c.bf16 %v2840_v25, %v2839_v24 }
0x18a4   :  { %v2648_v35 = vmul.f32 0.70710677, %v2638_v28  ;;  %v2644_v47 = vmul.f32 0.5, %v2638_v28  ;;  %3800 = vmatpush3.bf16.msra.mxu1 %v3799_v21  ;;  %v3802_v23 = vpack.c.bf16 %v2838_v54, %v2837_v22  ;;  %v3808_v28 = vpack.c.bf16 %v2842_v27, %v2841_v37 }
0x18a5   :  { %v2649_v36 = vmul.f32 0.70710677, %v2640_v32  ;;  %v2645_v9 = vmul.f32 0.5, %v2640_v32  ;;  %3801 = vmatprep.subr.bf16.mxu1 %v3985_v3 }
0x18a6   :  { %3893 = verf.f32 %v2648_v35 }
0x18a7   :  { %3895 = verf.f32 %v2649_v36 }
0x18a8   :  { %3803 = vmatpush3.bf16.msra.mxu1 %v3802_v23 }
0x18a9   :  { %3804 = vmatprep.subr.bf16.mxu1 %v3985_v3 }
0x18ac   :  { %v3890_v29 = vpop.eup %3889  ;;  %3806 = vmatpush3.bf16.msra.mxu1 %v3805_v26 }
0x18ad   :  { %v3892_v38 = vpop.eup %3891  ;;  %v2654_v19 = vadd.f32 1.0, %v3890_v29  ;;  %3807 = vmatprep.subr.bf16.mxu1 %v3985_v3 }
0x18ae   :  { %v2655_v1 = vadd.f32 1.0, %v3892_v38 }
0x18af   :  { %v2658_v42 = vmul.f32 %v2654_v19, %v2642_v39  ;;  %v3009_v39 = vld [vmem:[%s4614_s14 + $0x1] ss:$0 sm:$0xff] }
0x18b0   :  { %v3894_v41 = vpop.eup %3893  ;;  %v2659_v43 = vmul.f32 %v2655_v1, %v2643_v40  ;;  %3809 = vmatpush3.bf16.msra.mxu1 %v3808_v28 }
0x18b1   :  { %v3896_v33 = vpop.eup %3895  ;;  %v2656_v44 = vadd.f32 1.0, %v3894_v41 }
0x18b2   :  { %v2657_v46 = vadd.f32 1.0, %v3896_v33  ;;  %2767 = vmatprep.mubr.f32.mxu0 %v2659_v43 }
0x18b3   :  { %2768 = vmatmul.mubr.f32.vlgmr.msra.gmra.mrb[36].mxu0 %v2658_v42  ;;  %v2660_v50 = vmul.f32 %v2656_v44, %v2644_v47  ;;  %v3010_v42 = vld [vmem:[%s4615_s15 + $0x1] ss:$0 sm:$0xff] }
0x18b4   :  { %v2661_v48 = vmul.f32 %v2657_v46, %v2645_v9 }
0x18b6   :  { %2772 = vmatprep.mubr.f32.mxu0 %v2661_v48  ;;  %v3011_v48 = vld [vmem:[%s4617_s17] ss:$0 sm:$0xff] }
0x18b7   :  { %2773 = vmatmul.mubr.f32.gmra.mrb[38].mxu0 %v2660_v50 }
0x1986   :  { %v3188_v53 = vpop.f32.mrb[36].mxu0 }
0x1987   :  { %v3189_v56 = vpop.f32.mrb[37].mxu0 }
0x1988   :  { %v3190_v58 = vadd.f32 %v3189_v56, %v3188_v53  ;;  %v3012_v56 = vld [vmem:[%s4618_s18] ss:$0 sm:$0xff] }
0x198a   :  { %v2770_v60 = vadd.f32 %v3190_v58, %v3006_v30  ;;  %v3191_v51 = vpop.f32.mrb[38].mxu0 }
0x198b   :  { %v3192_v0 = vpop.f32.mrb[39].mxu0 }
0x198c   :  { %v3193_v45 = vadd.f32 %v3192_v0, %v3191_v51  ;;  %v2778_v34 = vadd.f32 %v2770_v60, %v4517_v49  ;;  %v3013_v0 = vld [vmem:[#allocation2] ss:$0 sm:$0xff] }
0x198e   :  { %v2775_v52 = vadd.f32 %v3193_v45, %v3006_v30  ;;  %2784 = vadd.xlane.f32.xlu1 %v2778_v34 }
0x1990   :  { %v2779_v2 = vadd.f32 %v2775_v52, %v4522_v59 }
0x1992   :  { %2786 = vadd.xlane.f32.xlu0 %v2779_v2 }
0x1a1b   :  { %v2785_v62 = vpop.xlane.xlu1 %2784 }
0x1a1c   :  { %v2788_v49 = vmul.f32 0.0078125, %v2785_v62 }
0x1a1e   :  { %v2790_v5 = vsub.f32 %v2778_v34, %v2788_v49 }
0x1a1f   :  { %v2787_v4 = vpop.xlane.xlu0 %2786 }
0x1a20   :  { %v2789_v6 = vmul.f32 0.0078125, %v2787_v4  ;;  %v2792_v59 = vmul.f32 %v2790_v5, %v2790_v5 }
0x1a22   :  { %v2791_v7 = vsub.f32 %v2779_v2, %v2789_v6  ;;  %2794 = vadd.xlane.f32.xlu1 %v2792_v59 }
0x1a24   :  { %v2793_v10 = vmul.f32 %v2791_v7, %v2791_v7 }
0x1a26   :  { %2796 = vadd.xlane.f32.xlu0 %v2793_v10 }
0x1aaf   :  { %v2795_v31 = vpop.xlane.xlu1 %2794 }
0x1ab0   :  { %v2798_v32 = vmul.f32 0.0078125, %v2795_v31 }
0x1ab2   :  { %v2800_v35 = vadd.f32 1e-12, %v2798_v32 }
0x1ab3   :  { %v2797_v36 = vpop.xlane.xlu0 %2796 }
0x1ab4   :  { %3897 = vrsqrt.f32 %v2800_v35  ;;  %v2799_v29 = vmul.f32 0.0078125, %v2797_v36 }
0x1ab6   :  { %v2801_v38 = vadd.f32 1e-12, %v2799_v29 }
0x1ab8   :  { %3899 = vrsqrt.f32 %v2801_v38 }
0x1abe   :  { %v3898_v19 = vpop.eup %3897 }
0x1abf   :  { %v2804_v40 = vmul.f32 %v3898_v19, %v2790_v5 }
0x1ac1   :  { %v2812_v43 = vmul.f32 %v3009_v39, %v2804_v40 }
0x1ac2   :  { %v3900_v1 = vpop.eup %3899 }
0x1ac3   :  { %v2805_v41 = vmul.f32 %v3900_v1, %v2791_v7  ;;  %v2820_v9 = vadd.f32 %v3010_v42, %v2812_v43 }
0x1ac5   :  { %v2813_v33 = vmul.f32 %v3009_v39, %v2805_v41 }
0x1ac7   :  { %v2821_v44 = vadd.f32 %v3010_v42, %v2813_v33 }
0x1ac9   :  { %v2823_v46 = vrot.slane %v2821_v44, 7 }
0x1acb   :  { %v2826_v47 = vsel %vm2825_vm3, %v2820_v9, %v2823_v46 }
0x1acc   :  { %3464 = vmatmul.mubr.f32.vlgmr.msra.gmra.mrb[24].mxu1 %v2826_v47 }
0x1b9f   :  { %v2916_v50 = vpop.f32.mrb[24].mxu1 }
0x1ba0   :  { %v2917_v53 = vadd.f32 %v3011_v48, %v2916_v50  ;;  %v3465_v30 = vpop.f32.mrb[25].mxu1 }
0x1ba2   :  { %3901 = vtanh.f32 %v2917_v53 }
0x1bac   :  { %v3902_v58 = vpop.eup %3901 }
0x1bad   :  { %v2928_v60 = vmul.f32 %v3902_v58, %v3012_v56 }
0x1baf   :  { %v2930_v51 = vsel %vm2929_vm4, %v2928_v60, 0.0 }
0x1bb0   :  { %2931 = vadd.xlane.f32.xlu0 %v2930_v51 }
0x1c3d   :  { %v2932_v45 = vpop.xlane.xlu0 %2931 }
0x1c3e   :  { %v2940_v34 = vadd.f32 %v3013_v0, %v2932_v45 }
0x1c40   :  { %2942 = vst.msk [vmem:[%s4620_s20] sm:$0x3] %vm2941_vm5, %v2940_v34 }
0x1c41   :  { %2947 = vsyncpa [#allocation4], 1 }
0x1c42   :  { %2948 = vsyncpa [#allocation6], 1 }

</bundles_post_ra>
